<compile_context>
chip_gen: v7x
topology: tpu7x:2x2x1
jax: 0.10.0
libtpu: 0.0.40
codegen_flags: <defaults>
</compile_context>

<pallas_src>
import jax
import jax.numpy as jnp
from jax import lax
from jax.experimental import pallas as pl
from jax.experimental.pallas import tpu as pltpu


_H1, _W1 = 32, 32            # conv1 / pool1 spatial grid
_H2, _W2 = 16, 16            # conv2 / pool2 spatial grid
_N1 = _H1 * _W1              # 1024
_N2 = _H2 * _W2              # 256
_C1, _C2 = 8, 16             # conv output channels
_CIN_PAD = 8                 # conv1 input channels zero-padded 3 -> 8 (alignment)
_OUT_PAD = 128               # lane-dense padded logit width
_BBLK_MAX = 32               # samples per grid step (VMEM-safe incl. v7x's 64 MiB)
_TAPS = tuple((kh - 1, kw - 1) for kh in range(3) for kw in range(3))


# ----------------------- host-built constants (hoisted) ---------------------- #

def _pool_sel(h, w):
    """(h*w, h*w/4) 0/1 matrix selecting the (even, even) positions."""
    ho, wo = h // 2, w // 2
    src = jnp.arange(h * w, dtype=jnp.int32)[:, None]
    dst = jnp.arange(ho * wo, dtype=jnp.int32)[None, :]
    qh = dst // wo
    want = qh * (2 * w) + (dst - qh * wo) * 2
    return (src == want).astype(jnp.float32)


def _conv_masks(h, w, bblk):
    """(9, bblk*h*w) boundary masks for the 3x3 taps, periodic in h*w so the
    circular lane roll never leaks across sample boundaries."""
    n = h * w
    lane = jnp.arange(bblk * n, dtype=jnp.int32) % n
    hh = lane // w
    ww = lane - hh * w
    rows = []
    for dh, dw in _TAPS:
        ok = (hh + dh >= 0) & (hh + dh < h) & (ww + dw >= 0) & (ww + dw < w)
        rows.append(ok)
    return jnp.stack(rows, axis=0).astype(jnp.float32)


# ----------------------------- in-kernel helpers ---------------------------- #

def _shift_lanes(x, delta):
    """y[:, j] = x[:, (j + delta) % n]  (circular; wrap positions are masked)."""
    n = x.shape[-1]
    s = (-delta) % n
    return x if s == 0 else pltpu.roll(x, s, axis=1)


def _conv3x3_relu(x, w_ref, b_ref, mask_ref, width):
    """3x3 'SAME' conv + bias + ReLU as ONE stacked-K MXU matmul.

    x: (Cin, Bblk*H*W), w_ref: (Cout, 9*Cin) tap-major, mask_ref: (9, Bblk*H*W).
    """
    pieces = []
    for t, (dh, dw) in enumerate(_TAPS):
        if dh == 0 and dw == 0:
            pieces.append(x)
        else:
            pieces.append(_shift_lanes(x, dh * width + dw) * mask_ref[t:t + 1, :])
    stacked = jnp.concatenate(pieces, axis=0)            # (9*Cin, Bblk*H*W)
    y = jnp.dot(w_ref[...], stacked, preferred_element_type=jnp.float32)
    return jnp.maximum(y + b_ref[...], 0.0)


def _pool_max(x, width):
    """Pairwise maxima so position (h, w) holds max of its 2x2 window."""
    m = jnp.maximum(x, _shift_lanes(x, 1))
    return jnp.maximum(m, _shift_lanes(m, width))


# --------------------------------- kernel ----------------------------------- #

def _make_kernel(bblk):
    def kernel(x_ref, m1_ref, m2_ref, sel1_ref, sel2_ref,
               w1_ref, b1_ref, w2_ref, b2_ref,
               wf1_ref, bf1_ref, wf2_ref, bf2_ref, out_ref):
        x = x_ref[0]                                          # (8, bblk*1024)

        c1 = _conv3x3_relu(x, w1_ref, b1_ref, m1_ref, _W1)    # (8, bblk*1024)

        m1 = _pool_max(c1, _W1)
        sel1 = sel1_ref[...]                                  # (1024, 256)
        p1_parts = [jnp.dot(m1[:, s * _N1:(s + 1) * _N1], sel1,
                            preferred_element_type=jnp.float32)
                    for s in range(bblk)]
        p1 = jnp.concatenate(p1_parts, axis=1)                # (8, bblk*256)

        c2 = _conv3x3_relu(p1, w2_ref, b2_ref, m2_ref, _W2)   # (16, bblk*256)

        m2 = _pool_max(c2, _W2)
        sel2 = sel2_ref[...]                                  # (256, 64)
        rows = []
        for s in range(bblk):
            p2_s = jnp.dot(m2[:, s * _N2:(s + 1) * _N2], sel2,
                           preferred_element_type=jnp.float32)   # (16, 64)
            # PyTorch (C, H, W) flatten -> channel-major lane concat.
            rows.append(jnp.concatenate([p2_s[c:c + 1, :] for c in range(_C2)],
                                        axis=1))                 # (1, 1024)
        p2 = jnp.concatenate(rows, axis=0)                       # (bblk, 1024)

        h = jnp.maximum(jnp.dot(p2, wf1_ref[...],
                                preferred_element_type=jnp.float32)
                        + bf1_ref[...], 0.0)                     # (bblk, 64)
        out = jnp.dot(h, wf2_ref[...],
                      preferred_element_type=jnp.float32) + bf2_ref[...]
        out_ref[0] = out                                         # (bblk, 128)
    return kernel


# ------------------------------ host-side glue ------------------------------ #

def prepare_params(params):
    """One-time re-layout of the PyTorch-shaped parameters."""
    w1 = jnp.transpose(params["conv1_w"], (0, 2, 3, 1))            # (8,3,3,3)
    w1 = jnp.pad(w1, ((0, 0), (0, 0), (0, 0), (0, _CIN_PAD - 3)))  # cin 3->8
    w1 = w1.reshape(_C1, 9 * _CIN_PAD)                             # (8, 72)
    w2 = jnp.transpose(params["conv2_w"], (0, 2, 3, 1)).reshape(_C2, 9 * _C1)
    wf1 = jnp.transpose(params["fc1_w"])                           # (1024, 64)
    wf2 = jnp.zeros((64, _OUT_PAD), jnp.float32).at[:, :10].set(
        jnp.transpose(params["fc2_w"]))
    bf2 = jnp.zeros((1, _OUT_PAD), jnp.float32).at[:, :10].set(
        params["fc2_b"][None, :])
    return {
        "w1": w1, "b1": params["conv1_b"].reshape(_C1, 1),
        "w2": w2, "b2": params["conv2_b"].reshape(_C2, 1),
        "wf1": wf1, "bf1": params["fc1_b"].reshape(1, 64),
        "wf2": wf2, "bf2": bf2,
    }


def _pick_bblk(batch):
    # >= 2 grid steps whenever B >= 2 so v7x's two TensorCores both get work.
    return max(1, min(_BBLK_MAX, (batch + 1) // 2))


@jax.jit
def nested_model_forward(x_nchw, kp):
    B = x_nchw.shape[0]
    bblk = _pick_bblk(B)
    nblk = -(-B // bblk)
    bpad = nblk * bblk

    x = x_nchw.reshape(B, 3, _N1)
    x = jnp.pad(x, ((0, bpad - B), (0, _CIN_PAD - 3), (0, 0)))
    # (nblk, Cin, bblk*N1): samples concatenated on the lane axis.
    xb = (x.reshape(nblk, bblk, _CIN_PAD, _N1)
            .transpose(0, 2, 1, 3)
            .reshape(nblk, _CIN_PAD, bblk * _N1))

    mask1 = _conv_masks(_H1, _W1, bblk)
    mask2 = _conv_masks(_H2, _W2, bblk)
    sel1 = _pool_sel(_H1, _W1)
    sel2 = _pool_sel(_H2, _W2)

    cspec = lambda a: pl.BlockSpec(a.shape, lambda b: (0, 0))   # resident const

    out = pl.pallas_call(
        _make_kernel(bblk),
        out_shape=jax.ShapeDtypeStruct((nblk, bblk, _OUT_PAD), jnp.float32),
        grid=(nblk,),
        in_specs=[
            pl.BlockSpec((1, _CIN_PAD, bblk * _N1), lambda b: (b, 0, 0)),
            cspec(mask1), cspec(mask2), cspec(sel1), cspec(sel2),
            cspec(kp["w1"]), cspec(kp["b1"]), cspec(kp["w2"]), cspec(kp["b2"]),
            cspec(kp["wf1"]), cspec(kp["bf1"]), cspec(kp["wf2"]), cspec(kp["bf2"]),
        ],
        out_specs=pl.BlockSpec((1, bblk, _OUT_PAD), lambda b: (b, 0, 0)),
        compiler_params=pltpu.CompilerParams(
            dimension_semantics=("parallel",),
            vmem_limit_bytes=48 * 1024 * 1024,
        ),
    )(xb, mask1, mask2, sel1, sel2,
      kp["w1"], kp["b1"], kp["w2"], kp["b2"],
      kp["wf1"], kp["bf1"], kp["wf2"], kp["bf2"])

    return out.reshape(bpad, _OUT_PAD)[:B, :10]


# ------------------------------- parameters --------------------------------- #

def init_params(key):
    keys = jax.random.split(key, 8)

    def uni(k, shape, fan_in):
        bound = 1.0 / jnp.sqrt(float(fan_in))
        return jax.random.uniform(k, shape, jnp.float32, -bound, bound)

    return {
        "conv1_w": uni(keys[0], (8, 3, 3, 3), 3 * 9),
        "conv1_b": uni(keys[1], (8,), 3 * 9),
        "conv2_w": uni(keys[2], (16, 8, 3, 3), 8 * 9),
        "conv2_b": uni(keys[3], (16,), 8 * 9),
        "fc1_w": uni(keys[4], (64, 16 * 8 * 8), 16 * 8 * 8),
        "fc1_b": uni(keys[5], (64,), 16 * 8 * 8),
        "fc2_w": uni(keys[6], (10, 64), 64),
        "fc2_b": uni(keys[7], (10,), 64),
    }


# ---------------------------- pure-JAX reference ----------------------------- #

def reference_forward(x_nchw, params):
    x = jnp.transpose(x_nchw, (0, 2, 3, 1))
    dn = ("NHWC", "HWIO", "NHWC")

    def conv_relu(x, w, b):
        w_hwio = jnp.transpose(w, (2, 3, 1, 0))
        y = lax.conv_general_dilated(x, w_hwio, (1, 1), "SAME",
                                     dimension_numbers=dn) + b
        return jnp.maximum(y, 0.0)

    def pool(x):
        return lax.reduce_window(x, -jnp.inf, lax.max,
                                 (1, 2, 2, 1), (1, 2, 2, 1), "VALID")

    x = pool(conv_relu(x, params["conv1_w"], params["conv1_b"]))
    x = pool(conv_relu(x, params["conv2_w"], params["conv2_b"]))
    B = x.shape[0]
    x = jnp.transpose(x, (0, 3, 1, 2)).reshape(B, -1)
    x = jnp.maximum(x @ params["fc1_w"].T + params["fc1_b"], 0.0)
    return x @ params["fc2_w"].T + params["fc2_b"]


# ----------------------------------- main ------------------------------------ #

if __name__ == "__main__":
    key = jax.random.PRNGKey(0)
    k_x, k_p = jax.random.split(key)

    # classifier expects 16*8*8 features -> input spatial is 32x32 (two /2 pools)
    x = jax.random.normal(k_x, (2, 3, 32, 32), jnp.float32)   # NCHW like PyTorch
    params = init_params(k_p)
    kparams = prepare_params(params)

    out = jax.block_until_ready(nested_model_forward(x, kparams))
    assert out.shape == (2, 10), out.shape

    ref = jax.block_until_ready(reference_forward(x, params))
    err = float(jnp.max(jnp.abs(out - ref)))
    # f32 MXU matmuls at default precision may take bf16 passes on TPU (both in
    # the kernel and in XLA's reference conv/matmul), so allow ~1e-2 abs diff.
    assert err < 2e-2, err

    print("KERNEL_OK")
</pallas_src>

<mosaic_0001>
module attributes {stable_mosaic.version = 11 : i64} {
  func.func @kernel(%arg0: i32, %arg1: memref<1x8x1024xf32, #tpu.memory_space<vmem>>, %arg2: memref<9x1024xf32, #tpu.memory_space<vmem>>, %arg3: memref<9x256xf32, #tpu.memory_space<vmem>>, %arg4: memref<1024x256xf32, #tpu.memory_space<vmem>>, %arg5: memref<256x64xf32, #tpu.memory_space<vmem>>, %arg6: memref<8x72xf32, #tpu.memory_space<vmem>>, %arg7: memref<8x1xf32, #tpu.memory_space<vmem>>, %arg8: memref<16x72xf32, #tpu.memory_space<vmem>>, %arg9: memref<16x1xf32, #tpu.memory_space<vmem>>, %arg10: memref<1024x64xf32, #tpu.memory_space<vmem>>, %arg11: memref<1x64xf32, #tpu.memory_space<vmem>>, %arg12: memref<64x128xf32, #tpu.memory_space<vmem>>, %arg13: memref<1x128xf32, #tpu.memory_space<vmem>>, %arg14: memref<1x1x128xf32, #tpu.memory_space<vmem>>) attributes {dimension_semantics = [#tpu.dimension_semantics<parallel>], iteration_bounds = array<i64: 2>, scalar_prefetch = 0 : i64, scratch_operands = 0 : i64, tpu.core_type = #tpu.core_type<tc>, window_params = [{transform_indices = @transform_0, window_bounds = array<i64: 1, 8, 1024>}, {pipeline_mode = #tpu.pipeline_mode<synchronous>, transform_indices = @transform_1, window_bounds = array<i64: 9, 1024>}, {pipeline_mode = #tpu.pipeline_mode<synchronous>, transform_indices = @transform_2, window_bounds = array<i64: 9, 256>}, {pipeline_mode = #tpu.pipeline_mode<synchronous>, transform_indices = @transform_3, window_bounds = array<i64: 1024, 256>}, {pipeline_mode = #tpu.pipeline_mode<synchronous>, transform_indices = @transform_4, window_bounds = array<i64: 256, 64>}, {pipeline_mode = #tpu.pipeline_mode<synchronous>, transform_indices = @transform_5, window_bounds = array<i64: 8, 72>}, {pipeline_mode = #tpu.pipeline_mode<synchronous>, transform_indices = @transform_6, window_bounds = array<i64: 8, 1>}, {pipeline_mode = #tpu.pipeline_mode<synchronous>, transform_indices = @transform_7, window_bounds = array<i64: 16, 72>}, {pipeline_mode = #tpu.pipeline_mode<synchronous>, transform_indices = @transform_8, window_bounds = array<i64: 16, 1>}, {pipeline_mode = #tpu.pipeline_mode<synchronous>, transform_indices = @transform_9, window_bounds = array<i64: 1024, 64>}, {pipeline_mode = #tpu.pipeline_mode<synchronous>, transform_indices = @transform_10, window_bounds = array<i64: 1, 64>}, {pipeline_mode = #tpu.pipeline_mode<synchronous>, transform_indices = @transform_11, window_bounds = array<i64: 64, 128>}, {pipeline_mode = #tpu.pipeline_mode<synchronous>, transform_indices = @transform_12, window_bounds = array<i64: 1, 128>}, {transform_indices = @transform_13, window_bounds = array<i64: 1, 1, 128>}]} {
    %c0 = arith.constant 0 : index
    %c0_0 = arith.constant 0 : index
    %c0_1 = arith.constant 0 : index
    %0 = vector.load %arg1[%c0, %c0_0, %c0_1] : memref<1x8x1024xf32, #tpu.memory_space<vmem>>, vector<1x8x1024xf32>
    %1 = vector.shape_cast %0 : vector<1x8x1024xf32> to vector<8x1024xf32>
    %c33_i32 = arith.constant 33 : i32
    %2 = tpu.dynamic_rotate %1 by %c33_i32 dim 1 : vector<8x1024xf32>, i32 -> vector<8x1024xf32>
    %c0_2 = arith.constant 0 : index
    %c0_3 = arith.constant 0 : index
    %3 = vector.load %arg2[%c0_2, %c0_3] : memref<9x1024xf32, #tpu.memory_space<vmem>>, vector<1x1024xf32>
    %4 = vector.broadcast %3 : vector<1x1024xf32> to vector<8x1024xf32>
    %5 = arith.mulf %2, %4 : vector<8x1024xf32>
    %c32_i32 = arith.constant 32 : i32
    %6 = tpu.dynamic_rotate %1 by %c32_i32 dim 1 : vector<8x1024xf32>, i32 -> vector<8x1024xf32>
    %c1 = arith.constant 1 : index
    %c0_4 = arith.constant 0 : index
    %7 = vector.load %arg2[%c1, %c0_4] : memref<9x1024xf32, #tpu.memory_space<vmem>>, vector<1x1024xf32>
    %8 = vector.broadcast %7 : vector<1x1024xf32> to vector<8x1024xf32>
    %9 = arith.mulf %6, %8 : vector<8x1024xf32>
    %c31_i32 = arith.constant 31 : i32
    %10 = tpu.dynamic_rotate %1 by %c31_i32 dim 1 : vector<8x1024xf32>, i32 -> vector<8x1024xf32>
    %c2 = arith.constant 2 : index
    %c0_5 = arith.constant 0 : index
    %11 = vector.load %arg2[%c2, %c0_5] : memref<9x1024xf32, #tpu.memory_space<vmem>>, vector<1x1024xf32>
    %12 = vector.broadcast %11 : vector<1x1024xf32> to vector<8x1024xf32>
    %13 = arith.mulf %10, %12 : vector<8x1024xf32>
    %c1_i32 = arith.constant 1 : i32
    %14 = tpu.dynamic_rotate %1 by %c1_i32 dim 1 : vector<8x1024xf32>, i32 -> vector<8x1024xf32>
    %c3 = arith.constant 3 : index
    %c0_6 = arith.constant 0 : index
    %15 = vector.load %arg2[%c3, %c0_6] : memref<9x1024xf32, #tpu.memory_space<vmem>>, vector<1x1024xf32>
    %16 = vector.broadcast %15 : vector<1x1024xf32> to vector<8x1024xf32>
    %17 = arith.mulf %14, %16 : vector<8x1024xf32>
    %c1023_i32 = arith.constant 1023 : i32
    %18 = tpu.dynamic_rotate %1 by %c1023_i32 dim 1 : vector<8x1024xf32>, i32 -> vector<8x1024xf32>
    %c5 = arith.constant 5 : index
    %c0_7 = arith.constant 0 : index
    %19 = vector.load %arg2[%c5, %c0_7] : memref<9x1024xf32, #tpu.memory_space<vmem>>, vector<1x1024xf32>
    %20 = vector.broadcast %19 : vector<1x1024xf32> to vector<8x1024xf32>
    %21 = arith.mulf %18, %20 : vector<8x1024xf32>
    %c993_i32 = arith.constant 993 : i32
    %22 = tpu.dynamic_rotate %1 by %c993_i32 dim 1 : vector<8x1024xf32>, i32 -> vector<8x1024xf32>
    %c6 = arith.constant 6 : index
    %c0_8 = arith.constant 0 : index
    %23 = vector.load %arg2[%c6, %c0_8] : memref<9x1024xf32, #tpu.memory_space<vmem>>, vector<1x1024xf32>
    %24 = vector.broadcast %23 : vector<1x1024xf32> to vector<8x1024xf32>
    %25 = arith.mulf %22, %24 : vector<8x1024xf32>
    %c992_i32 = arith.constant 992 : i32
    %26 = tpu.dynamic_rotate %1 by %c992_i32 dim 1 : vector<8x1024xf32>, i32 -> vector<8x1024xf32>
    %c7 = arith.constant 7 : index
    %c0_9 = arith.constant 0 : index
    %27 = vector.load %arg2[%c7, %c0_9] : memref<9x1024xf32, #tpu.memory_space<vmem>>, vector<1x1024xf32>
    %28 = vector.broadcast %27 : vector<1x1024xf32> to vector<8x1024xf32>
    %29 = arith.mulf %26, %28 : vector<8x1024xf32>
    %c991_i32 = arith.constant 991 : i32
    %30 = tpu.dynamic_rotate %1 by %c991_i32 dim 1 : vector<8x1024xf32>, i32 -> vector<8x1024xf32>
    %c8 = arith.constant 8 : index
    %c0_10 = arith.constant 0 : index
    %31 = vector.load %arg2[%c8, %c0_10] : memref<9x1024xf32, #tpu.memory_space<vmem>>, vector<1x1024xf32>
    %32 = vector.broadcast %31 : vector<1x1024xf32> to vector<8x1024xf32>
    %33 = arith.mulf %30, %32 : vector<8x1024xf32>
    %34 = tpu.concatenate %5, %9, %13, %17, %1, %21, %25, %29, %33 in 0 : vector<8x1024xf32>, vector<8x1024xf32>, vector<8x1024xf32>, vector<8x1024xf32>, vector<8x1024xf32>, vector<8x1024xf32>, vector<8x1024xf32>, vector<8x1024xf32>, vector<8x1024xf32> -> vector<72x1024xf32>
    %c0_11 = arith.constant 0 : index
    %c0_12 = arith.constant 0 : index
    %35 = vector.load %arg6[%c0_11, %c0_12] : memref<8x72xf32, #tpu.memory_space<vmem>>, vector<8x72xf32>
    %cst = arith.constant dense<0.000000e+00> : vector<8x1024xf32>
    %36 = tpu.matmul %35, %34, %cst {dimension_numbers = #tpu.dot_dimension_numbers<[1], [0], [0], [1], [0, 0, 1, 1], [], []>} : vector<8x72xf32>, vector<72x1024xf32>, vector<8x1024xf32> -> vector<8x1024xf32>
    %c0_13 = arith.constant 0 : index
    %c0_14 = arith.constant 0 : index
    %37 = vector.load %arg7[%c0_13, %c0_14] : memref<8x1xf32, #tpu.memory_space<vmem>>, vector<8x1xf32>
    %38 = vector.broadcast %37 : vector<8x1xf32> to vector<8x1024xf32>
    %39 = arith.addf %36, %38 : vector<8x1024xf32>
    %cst_15 = arith.constant 0.000000e+00 : f32
    %40 = vector.broadcast %cst_15 : f32 to vector<8x1024xf32>
    %41 = arith.maximumf %39, %40 : vector<8x1024xf32>
    %c1023_i32_16 = arith.constant 1023 : i32
    %42 = tpu.dynamic_rotate %41 by %c1023_i32_16 dim 1 : vector<8x1024xf32>, i32 -> vector<8x1024xf32>
    %43 = arith.maximumf %41, %42 : vector<8x1024xf32>
    %c992_i32_17 = arith.constant 992 : i32
    %44 = tpu.dynamic_rotate %43 by %c992_i32_17 dim 1 : vector<8x1024xf32>, i32 -> vector<8x1024xf32>
    %45 = arith.maximumf %43, %44 : vector<8x1024xf32>
    %c0_18 = arith.constant 0 : index
    %c0_19 = arith.constant 0 : index
    %46 = vector.load %arg4[%c0_18, %c0_19] : memref<1024x256xf32, #tpu.memory_space<vmem>>, vector<1024x256xf32>
    %cst_20 = arith.constant dense<0.000000e+00> : vector<8x256xf32>
    %47 = tpu.matmul %45, %46, %cst_20 {dimension_numbers = #tpu.dot_dimension_numbers<[1], [0], [0], [1], [0, 0, 1, 1], [], []>} : vector<8x1024xf32>, vector<1024x256xf32>, vector<8x256xf32> -> vector<8x256xf32>
    %c17_i32 = arith.constant 17 : i32
    %48 = tpu.dynamic_rotate %47 by %c17_i32 dim 1 : vector<8x256xf32>, i32 -> vector<8x256xf32>
    %c0_21 = arith.constant 0 : index
    %c0_22 = arith.constant 0 : index
    %49 = vector.load %arg3[%c0_21, %c0_22] : memref<9x256xf32, #tpu.memory_space<vmem>>, vector<1x256xf32>
    %50 = vector.broadcast %49 : vector<1x256xf32> to vector<8x256xf32>
    %51 = arith.mulf %48, %50 : vector<8x256xf32>
    %c16_i32 = arith.constant 16 : i32
    %52 = tpu.dynamic_rotate %47 by %c16_i32 dim 1 : vector<8x256xf32>, i32 -> vector<8x256xf32>
    %c1_23 = arith.constant 1 : index
    %c0_24 = arith.constant 0 : index
    %53 = vector.load %arg3[%c1_23, %c0_24] : memref<9x256xf32, #tpu.memory_space<vmem>>, vector<1x256xf32>
    %54 = vector.broadcast %53 : vector<1x256xf32> to vector<8x256xf32>
    %55 = arith.mulf %52, %54 : vector<8x256xf32>
    %c15_i32 = arith.constant 15 : i32
    %56 = tpu.dynamic_rotate %47 by %c15_i32 dim 1 : vector<8x256xf32>, i32 -> vector<8x256xf32>
    %c2_25 = arith.constant 2 : index
    %c0_26 = arith.constant 0 : index
    %57 = vector.load %arg3[%c2_25, %c0_26] : memref<9x256xf32, #tpu.memory_space<vmem>>, vector<1x256xf32>
    %58 = vector.broadcast %57 : vector<1x256xf32> to vector<8x256xf32>
    %59 = arith.mulf %56, %58 : vector<8x256xf32>
    %c1_i32_27 = arith.constant 1 : i32
    %60 = tpu.dynamic_rotate %47 by %c1_i32_27 dim 1 : vector<8x256xf32>, i32 -> vector<8x256xf32>
    %c3_28 = arith.constant 3 : index
    %c0_29 = arith.constant 0 : index
    %61 = vector.load %arg3[%c3_28, %c0_29] : memref<9x256xf32, #tpu.memory_space<vmem>>, vector<1x256xf32>
    %62 = vector.broadcast %61 : vector<1x256xf32> to vector<8x256xf32>
    %63 = arith.mulf %60, %62 : vector<8x256xf32>
    %c255_i32 = arith.constant 255 : i32
    %64 = tpu.dynamic_rotate %47 by %c255_i32 dim 1 : vector<8x256xf32>, i32 -> vector<8x256xf32>
    %c5_30 = arith.constant 5 : index
    %c0_31 = arith.constant 0 : index
    %65 = vector.load %arg3[%c5_30, %c0_31] : memref<9x256xf32, #tpu.memory_space<vmem>>, vector<1x256xf32>
    %66 = vector.broadcast %65 : vector<1x256xf32> to vector<8x256xf32>
    %67 = arith.mulf %64, %66 : vector<8x256xf32>
    %c241_i32 = arith.constant 241 : i32
    %68 = tpu.dynamic_rotate %47 by %c241_i32 dim 1 : vector<8x256xf32>, i32 -> vector<8x256xf32>
    %c6_32 = arith.constant 6 : index
    %c0_33 = arith.constant 0 : index
    %69 = vector.load %arg3[%c6_32, %c0_33] : memref<9x256xf32, #tpu.memory_space<vmem>>, vector<1x256xf32>
    %70 = vector.broadcast %69 : vector<1x256xf32> to vector<8x256xf32>
    %71 = arith.mulf %68, %70 : vector<8x256xf32>
    %c240_i32 = arith.constant 240 : i32
    %72 = tpu.dynamic_rotate %47 by %c240_i32 dim 1 : vector<8x256xf32>, i32 -> vector<8x256xf32>
    %c7_34 = arith.constant 7 : index
    %c0_35 = arith.constant 0 : index
    %73 = vector.load %arg3[%c7_34, %c0_35] : memref<9x256xf32, #tpu.memory_space<vmem>>, vector<1x256xf32>
    %74 = vector.broadcast %73 : vector<1x256xf32> to vector<8x256xf32>
    %75 = arith.mulf %72, %74 : vector<8x256xf32>
    %c239_i32 = arith.constant 239 : i32
    %76 = tpu.dynamic_rotate %47 by %c239_i32 dim 1 : vector<8x256xf32>, i32 -> vector<8x256xf32>
    %c8_36 = arith.constant 8 : index
    %c0_37 = arith.constant 0 : index
    %77 = vector.load %arg3[%c8_36, %c0_37] : memref<9x256xf32, #tpu.memory_space<vmem>>, vector<1x256xf32>
    %78 = vector.broadcast %77 : vector<1x256xf32> to vector<8x256xf32>
    %79 = arith.mulf %76, %78 : vector<8x256xf32>
    %80 = tpu.concatenate %51, %55, %59, %63, %47, %67, %71, %75, %79 in 0 : vector<8x256xf32>, vector<8x256xf32>, vector<8x256xf32>, vector<8x256xf32>, vector<8x256xf32>, vector<8x256xf32>, vector<8x256xf32>, vector<8x256xf32>, vector<8x256xf32> -> vector<72x256xf32>
    %c0_38 = arith.constant 0 : index
    %c0_39 = arith.constant 0 : index
    %81 = vector.load %arg8[%c0_38, %c0_39] : memref<16x72xf32, #tpu.memory_space<vmem>>, vector<16x72xf32>
    %cst_40 = arith.constant dense<0.000000e+00> : vector<16x256xf32>
    %82 = tpu.matmul %81, %80, %cst_40 {dimension_numbers = #tpu.dot_dimension_numbers<[1], [0], [0], [1], [0, 0, 1, 1], [], []>} : vector<16x72xf32>, vector<72x256xf32>, vector<16x256xf32> -> vector<16x256xf32>
    %c0_41 = arith.constant 0 : index
    %c0_42 = arith.constant 0 : index
    %83 = vector.load %arg9[%c0_41, %c0_42] : memref<16x1xf32, #tpu.memory_space<vmem>>, vector<16x1xf32>
    %84 = vector.broadcast %83 : vector<16x1xf32> to vector<16x256xf32>
    %85 = arith.addf %82, %84 : vector<16x256xf32>
    %cst_43 = arith.constant 0.000000e+00 : f32
    %86 = vector.broadcast %cst_43 : f32 to vector<16x256xf32>
    %87 = arith.maximumf %85, %86 : vector<16x256xf32>
    %c255_i32_44 = arith.constant 255 : i32
    %88 = tpu.dynamic_rotate %87 by %c255_i32_44 dim 1 : vector<16x256xf32>, i32 -> vector<16x256xf32>
    %89 = arith.maximumf %87, %88 : vector<16x256xf32>
    %c240_i32_45 = arith.constant 240 : i32
    %90 = tpu.dynamic_rotate %89 by %c240_i32_45 dim 1 : vector<16x256xf32>, i32 -> vector<16x256xf32>
    %91 = arith.maximumf %89, %90 : vector<16x256xf32>
    %c0_46 = arith.constant 0 : index
    %c0_47 = arith.constant 0 : index
    %92 = vector.load %arg5[%c0_46, %c0_47] : memref<256x64xf32, #tpu.memory_space<vmem>>, vector<256x64xf32>
    %cst_48 = arith.constant dense<0.000000e+00> : vector<16x64xf32>
    %93 = tpu.matmul %91, %92, %cst_48 {dimension_numbers = #tpu.dot_dimension_numbers<[1], [0], [0], [1], [0, 0, 1, 1], [], []>} : vector<16x256xf32>, vector<256x64xf32>, vector<16x64xf32> -> vector<16x64xf32>
    %94 = vector.extract_strided_slice %93 {offsets = [0, 0], sizes = [1, 64], strides = [1, 1]} : vector<16x64xf32> to vector<1x64xf32>
    %95 = vector.extract_strided_slice %93 {offsets = [1, 0], sizes = [1, 64], strides = [1, 1]} : vector<16x64xf32> to vector<1x64xf32>
    %96 = vector.extract_strided_slice %93 {offsets = [2, 0], sizes = [1, 64], strides = [1, 1]} : vector<16x64xf32> to vector<1x64xf32>
    %97 = vector.extract_strided_slice %93 {offsets = [3, 0], sizes = [1, 64], strides = [1, 1]} : vector<16x64xf32> to vector<1x64xf32>
    %98 = vector.extract_strided_slice %93 {offsets = [4, 0], sizes = [1, 64], strides = [1, 1]} : vector<16x64xf32> to vector<1x64xf32>
    %99 = vector.extract_strided_slice %93 {offsets = [5, 0], sizes = [1, 64], strides = [1, 1]} : vector<16x64xf32> to vector<1x64xf32>
    %100 = vector.extract_strided_slice %93 {offsets = [6, 0], sizes = [1, 64], strides = [1, 1]} : vector<16x64xf32> to vector<1x64xf32>
    %101 = vector.extract_strided_slice %93 {offsets = [7, 0], sizes = [1, 64], strides = [1, 1]} : vector<16x64xf32> to vector<1x64xf32>
    %102 = vector.extract_strided_slice %93 {offsets = [8, 0], sizes = [1, 64], strides = [1, 1]} : vector<16x64xf32> to vector<1x64xf32>
    %103 = vector.extract_strided_slice %93 {offsets = [9, 0], sizes = [1, 64], strides = [1, 1]} : vector<16x64xf32> to vector<1x64xf32>
    %104 = vector.extract_strided_slice %93 {offsets = [10, 0], sizes = [1, 64], strides = [1, 1]} : vector<16x64xf32> to vector<1x64xf32>
    %105 = vector.extract_strided_slice %93 {offsets = [11, 0], sizes = [1, 64], strides = [1, 1]} : vector<16x64xf32> to vector<1x64xf32>
    %106 = vector.extract_strided_slice %93 {offsets = [12, 0], sizes = [1, 64], strides = [1, 1]} : vector<16x64xf32> to vector<1x64xf32>
    %107 = vector.extract_strided_slice %93 {offsets = [13, 0], sizes = [1, 64], strides = [1, 1]} : vector<16x64xf32> to vector<1x64xf32>
    %108 = vector.extract_strided_slice %93 {offsets = [14, 0], sizes = [1, 64], strides = [1, 1]} : vector<16x64xf32> to vector<1x64xf32>
    %109 = vector.extract_strided_slice %93 {offsets = [15, 0], sizes = [1, 64], strides = [1, 1]} : vector<16x64xf32> to vector<1x64xf32>
    %110 = tpu.concatenate %94, %95, %96, %97, %98, %99, %100, %101, %102, %103, %104, %105, %106, %107, %108, %109 in 1 : vector<1x64xf32>, vector<1x64xf32>, vector<1x64xf32>, vector<1x64xf32>, vector<1x64xf32>, vector<1x64xf32>, vector<1x64xf32>, vector<1x64xf32>, vector<1x64xf32>, vector<1x64xf32>, vector<1x64xf32>, vector<1x64xf32>, vector<1x64xf32>, vector<1x64xf32>, vector<1x64xf32>, vector<1x64xf32> -> vector<1x1024xf32>
    %c0_49 = arith.constant 0 : index
    %c0_50 = arith.constant 0 : index
    %111 = vector.load %arg10[%c0_49, %c0_50] : memref<1024x64xf32, #tpu.memory_space<vmem>>, vector<1024x64xf32>
    %cst_51 = arith.constant dense<0.000000e+00> : vector<1x64xf32>
    %112 = tpu.matmul %110, %111, %cst_51 {dimension_numbers = #tpu.dot_dimension_numbers<[1], [0], [0], [1], [0, 0, 1, 1], [], []>} : vector<1x1024xf32>, vector<1024x64xf32>, vector<1x64xf32> -> vector<1x64xf32>
    %c0_52 = arith.constant 0 : index
    %c0_53 = arith.constant 0 : index
    %113 = vector.load %arg11[%c0_52, %c0_53] : memref<1x64xf32, #tpu.memory_space<vmem>>, vector<1x64xf32>
    %114 = arith.addf %112, %113 : vector<1x64xf32>
    %cst_54 = arith.constant 0.000000e+00 : f32
    %115 = vector.broadcast %cst_54 : f32 to vector<1x64xf32>
    %116 = arith.maximumf %114, %115 : vector<1x64xf32>
    %c0_55 = arith.constant 0 : index
    %c0_56 = arith.constant 0 : index
    %117 = vector.load %arg12[%c0_55, %c0_56] : memref<64x128xf32, #tpu.memory_space<vmem>>, vector<64x128xf32>
    %cst_57 = arith.constant dense<0.000000e+00> : vector<1x128xf32>
    %118 = tpu.matmul %116, %117, %cst_57 {dimension_numbers = #tpu.dot_dimension_numbers<[1], [0], [0], [1], [0, 0, 1, 1], [], []>} : vector<1x64xf32>, vector<64x128xf32>, vector<1x128xf32> -> vector<1x128xf32>
    %c0_58 = arith.constant 0 : index
    %c0_59 = arith.constant 0 : index
    %119 = vector.load %arg13[%c0_58, %c0_59] : memref<1x128xf32, #tpu.memory_space<vmem>>, vector<1x128xf32>
    %120 = arith.addf %118, %119 : vector<1x128xf32>
    %c0_60 = arith.constant 0 : index
    %c0_61 = arith.constant 0 : index
    %c0_62 = arith.constant 0 : index
    %121 = vector.load %arg14[%c0_60, %c0_61, %c0_62] : memref<1x1x128xf32, #tpu.memory_space<vmem>>, vector<1x1x128xf32>
    %122 = vector.shape_cast %121 : vector<1x1x128xf32> to vector<1x128xf32>
    %123 = vector.shape_cast %120 : vector<1x128xf32> to vector<1x1x128xf32>
    tpu.vector_store %arg14[%c0_60, %c0_61, %c0_62], %123 {strides = array<i32>} : memref<1x1x128xf32, #tpu.memory_space<vmem>>, vector<1x1x128xf32>,
    return
  }
  func.func @transform_0(%arg0: i32) -> (i32, i32, i32) {
    %c0_i32 = arith.constant 0 : i32
    %c0_i32_0 = arith.constant 0 : i32
    %c0_i32_1 = arith.constant 0 : i32
    return %arg0, %c0_i32, %c0_i32_0 : i32, i32, i32
  }
  func.func @transform_1(%arg0: i32) -> (i32, i32) {
    %c0_i32 = arith.constant 0 : i32
    %c0_i32_0 = arith.constant 0 : i32
    %c0_i32_1 = arith.constant 0 : i32
    return %c0_i32, %c0_i32_0 : i32, i32
  }
  func.func @transform_2(%arg0: i32) -> (i32, i32) {
    %c0_i32 = arith.constant 0 : i32
    %c0_i32_0 = arith.constant 0 : i32
    %c0_i32_1 = arith.constant 0 : i32
    return %c0_i32, %c0_i32_0 : i32, i32
  }
  func.func @transform_3(%arg0: i32) -> (i32, i32) {
    %c0_i32 = arith.constant 0 : i32
    %c0_i32_0 = arith.constant 0 : i32
    %c0_i32_1 = arith.constant 0 : i32
    return %c0_i32, %c0_i32_0 : i32, i32
  }
  func.func @transform_4(%arg0: i32) -> (i32, i32) {
    %c0_i32 = arith.constant 0 : i32
    %c0_i32_0 = arith.constant 0 : i32
    %c0_i32_1 = arith.constant 0 : i32
    return %c0_i32, %c0_i32_0 : i32, i32
  }
  func.func @transform_5(%arg0: i32) -> (i32, i32) {
    %c0_i32 = arith.constant 0 : i32
    %c0_i32_0 = arith.constant 0 : i32
    %c0_i32_1 = arith.constant 0 : i32
    return %c0_i32, %c0_i32_0 : i32, i32
  }
  func.func @transform_6(%arg0: i32) -> (i32, i32) {
    %c0_i32 = arith.constant 0 : i32
    %c0_i32_0 = arith.constant 0 : i32
    %c0_i32_1 = arith.constant 0 : i32
    return %c0_i32, %c0_i32_0 : i32, i32
  }
  func.func @transform_7(%arg0: i32) -> (i32, i32) {
    %c0_i32 = arith.constant 0 : i32
    %c0_i32_0 = arith.constant 0 : i32
    %c0_i32_1 = arith.constant 0 : i32
    return %c0_i32, %c0_i32_0 : i32, i32
  }
  func.func @transform_8(%arg0: i32) -> (i32, i32) {
    %c0_i32 = arith.constant 0 : i32
    %c0_i32_0 = arith.constant 0 : i32
    %c0_i32_1 = arith.constant 0 : i32
    return %c0_i32, %c0_i32_0 : i32, i32
  }
  func.func @transform_9(%arg0: i32) -> (i32, i32) {
    %c0_i32 = arith.constant 0 : i32
    %c0_i32_0 = arith.constant 0 : i32
    %c0_i32_1 = arith.constant 0 : i32
    return %c0_i32, %c0_i32_0 : i32, i32
  }
  func.func @transform_10(%arg0: i32) -> (i32, i32) {
    %c0_i32 = arith.constant 0 : i32
    %c0_i32_0 = arith.constant 0 : i32
    %c0_i32_1 = arith.constant 0 : i32
    return %c0_i32, %c0_i32_0 : i32, i32
  }
  func.func @transform_11(%arg0: i32) -> (i32, i32) {
    %c0_i32 = arith.constant 0 : i32
    %c0_i32_0 = arith.constant 0 : i32
    %c0_i32_1 = arith.constant 0 : i32
    return %c0_i32, %c0_i32_0 : i32, i32
  }
  func.func @transform_12(%arg0: i32) -> (i32, i32) {
    %c0_i32 = arith.constant 0 : i32
    %c0_i32_0 = arith.constant 0 : i32
    %c0_i32_1 = arith.constant 0 : i32
    return %c0_i32, %c0_i32_0 : i32, i32
  }
  func.func @transform_13(%arg0: i32) -> (i32, i32, i32) {
    %c0_i32 = arith.constant 0 : i32
    %c0_i32_0 = arith.constant 0 : i32
    %c0_i32_1 = arith.constant 0 : i32
    return %arg0, %c0_i32, %c0_i32_0 : i32, i32, i32
  }
}

</mosaic_0001>

<bundles_post_ra>
// kernel: nested_model_forward.1
= control target key start
LH: loop header
LB: loop body
LE: loop exit
PB: predicated region body
PF: predicated region fallthrough
CT: control target
= control target key end

     0   :  { %s6446_s0 = inlined_call_operand.vmem [shape: f32[2,8,1024], index: 0, kind: input, shape index: {}]   ;;  %s6447_s1 = inlined_call_operand.vmem [shape: f32[9,1024], index: 1, kind: input, shape index: {}]   ;;  %s6448_s2 = inlined_call_operand.vmem [shape: f32[9,256], index: 2, kind: input, shape index: {}]   ;;  %s6449_s3 = inlined_call_operand.vmem [shape: f32[1024,256], index: 3, kind: input, shape index: {}]   ;;  %s6450_s4 = inlined_call_operand.vmem [shape: f32[256,64], index: 4, kind: input, shape index: {}]   ;;  %s6451_s5 = inlined_call_operand.vmem [shape: f32[8,72], index: 5, kind: input, shape index: {}]   ;;  %s6452_s6 = inlined_call_operand.vmem [shape: f32[8,1], index: 6, kind: input, shape index: {}]   ;;  %s6453_s7 = inlined_call_operand.vmem [shape: f32[16,72], index: 7, kind: input, shape index: {}]   ;;  %s6454_s8 = inlined_call_operand.vmem [shape: f32[16,1], index: 8, kind: input, shape index: {}]   ;;  %s6455_s9 = inlined_call_operand.vmem [shape: f32[1024,64], index: 9, kind: input, shape index: {}]   ;;  %s6456_s10 = inlined_call_operand.vmem [shape: f32[1,64], index: 10, kind: input, shape index: {}]   ;;  %s6457_s11 = inlined_call_operand.vmem [shape: f32[64,128], index: 11, kind: input, shape index: {}]   ;;  %s6458_s12 = inlined_call_operand.vmem [shape: f32[1,128], index: 12, kind: input, shape index: {}]   ;;  %s6459_s13 = inlined_call_operand.hbm [shape: f32[2,1,128], index: 13, kind: output, shape index: {}]  }
   0x1   :  { %6475 = sst [smem:[#allocation8_spill]] %s6446_s0 }
   0x2   :  { %6476 = sst [smem:[#allocation9_spill]] %s6447_s1 }
   0x3   :  { %6477 = sst [smem:[#allocation10_spill]] %s6451_s5 }
   0x4   :  { %18 = vsyncpa [#allocation3], 0 }
   0x5   :  { %20 = vsyncpa [#allocation3 + $0x1], 0  ;;  %s4054_s25 = smov 0   ;;  %s4056_s26 = smov 0  }
   0x6   :  { %s4058_s27 = smov 0   ;;  %s4060_s28 = smov 0  }
   0x7 LB: > { %6478 = sst [smem:[#allocation5_spill]] %s3958_s27  ;;  %s4075_s29 = sadd.s32 4294967295, %s3962_s28   ;;  %s3962_s28 = sphi %s4060_s28, %s6493_s28   ;;  %s3958_s27 = sphi %s4058_s27, %s6495_s27   ;;  %s3954_s26 = sphi %s4056_s26, %s6497_s26   ;;  %s3950_s25 = sphi %s4054_s25, %s6496_s25  }
   0x8   : > { %s3007_s30 = sadd.s32 4294967294, %s3962_s28   ;;  %s4079_s14 = sadd.s32 1, %s3962_s28  }
   0x9   : > { %6479 = sst [smem:[#allocation6_spill]] %s4079_s14  ;;  %s311_s15 = sadd.s32 1, %s3958_s27 }
   0xa   : > { %s308_s16 = ssub.s32 %s3962_s28, %s4079_s14  ;;  %p321_p0 = scmp.ne.s32.totalorder %s3958_s27, %s3954_s26 }
   0xb   : > { %p309_p1 = scmp.eq.s32.totalorder %s308_s16, 0  ;;  %p322_p2 = scmp.eq.s32.totalorder %s4075_s29, 1 }
   0xc   : > { %p327_p3 = scmp.ne.s32.totalorder %s3954_s26, %s3950_s25  ;;  %p328_p4 = scmp.eq.s32.totalorder %s3007_s30, 1 }
   0xd   : > { %s4090_s17 = scalar_select %p309_p1, %s3958_s27, %s311_s15  }
   0xe   : > { %p4092_p5 = por %p322_p2, %p321_p0  ;;  %p4096_p6 = por %p328_p4, %p327_p3 }
   0xf   : > { %6480 = sst [smem:[#allocation7_spill]] %s4090_s17  ;;  %p3010_p7 = scmp.ge.s32.totalorder %s3962_s28, 1 }
  0x10   : > { %p390_p8 = scmp.lt.s32.totalorder %s3962_s28, 3 }
  0x12   : > { %p391_p9 = pnand %p3010_p7, %p390_p8 }
  0x13   : > { %p433_p10 = scmp.lt.s32.totalorder (!%p391_p9), %s4075_s29, 1  ;;  %s6483_s0 = sld [smem:[#allocation8_spill]] (!%p391_p9)  ;;  %v3971_v5 = vmov (!%p391_p9), 0.0   ;;  %v462_v9 = vlaneseq (!%p391_p9)  ;;  %v3973_v42 = vmov (!%p391_p9), 0   ;;  %v1072_v46 = vld [vmem:[%s6452_s6] sm:$0xff] (!%p391_p9)  ;;  %vm1078_vm8 = vcmask (!%p391_p9), 588800  }
  0x14   : > { %394 = sbr.rel (%p391_p9) target bundleno = 2655 (0xa5f), region = 72  ;;  %s6462_s30 = smov (!%p391_p9), 32   ;;  %1146 = vmatprep.mubr.f32.mxu1 (!%p391_p9), %v3971_v5  ;;  %3823 = vset.pattern.permute.xlu0 (!%p391_p9), %v3973_v42  ;;  %vm2437_vm15 = vcmask (!%p391_p9), 523264  }
  0x15   : > { %s6466_s15 = smov (!%p391_p9), 33   ;;  %s6467_s16 = smov (!%p391_p9), 31   ;;  %v4249_v11 = vshrl.u32 (!%p391_p9), %v462_v9, 7  ;;  %v4264_v15 = vand.u32 (!%p391_p9), 127, %v462_v9  ;;  %3859 = vset.pattern.permute.xlu1 (!%p391_p9), %v3973_v42 }
  0x16   : > { %s6460_s22 = smov (!%p391_p9), 97   ;;  %s6471_s23 = smov (!%p391_p9), 96  }
  0x17   : > { %s6487_s1 = sld [smem:[#allocation9_spill]] (!%p391_p9)  ;;  %v4271_v18 = vsub.s32 (!%p391_p9), 1, %v4249_v11  ;;  %v4274_v21 = vsub.s32 (!%p391_p9), 0, %v4249_v11  ;;  %s6490_s27 = smov (!%p391_p9), 31   ;;  %vm541_vm0 = vcmp.lt.s32.totalorder (!%p391_p9), %v4264_v15, 32  ;;  %vm464_vm1 = vcmp.lt.s32.totalorder (!%p391_p9), %v4264_v15, 33 }
  0x18   : > { %vm619_vm2 = vcmp.lt.s32.totalorder (!%p391_p9), %v4264_v15, 31  ;;  %vm697_vm3 = vcmp.lt.s32.totalorder (!%p391_p9), %v4264_v15, 1  ;;  %vm775_vm4 = vcmp.lt.s32.totalorder (!%p391_p9), %v4264_v15, 127  ;;  %vm853_vm5 = vcmp.lt.s32.totalorder (!%p391_p9), %v4264_v15, 97  ;;  %s6492_s5 = sld [smem:[#allocation10_spill]] (!%p391_p9)  ;;  %s3974_s17 = smov (!%p391_p9), 17  }
  0x19   : > { %vm931_vm6 = vcmp.lt.s32.totalorder (!%p391_p9), %v4264_v15, 96  ;;  %vm1009_vm7 = vcmp.lt.s32.totalorder (!%p391_p9), %v4264_v15, 95  ;;  %vm1982_vm9 = vcmp.lt.s32.totalorder (!%p391_p9), %v4264_v15, 17  ;;  %vm2003_vm10 = vcmp.lt.s32.totalorder (!%p391_p9), %v4264_v15, 16 }
  0x1a   : > { %vm2025_vm11 = vcmp.lt.s32.totalorder (!%p391_p9), %v4264_v15, 15  ;;  %vm2089_vm12 = vcmp.lt.s32.totalorder (!%p391_p9), %v4264_v15, 113  ;;  %vm2111_vm13 = vcmp.lt.s32.totalorder (!%p391_p9), %v4264_v15, 112  ;;  %vm2133_vm14 = vcmp.lt.s32.totalorder (!%p391_p9), %v4264_v15, 111  ;;  %v2447_v15 = vld [vmem:[%s6455_s9 + $0x8] sm:$0xff] (!%p391_p9) }
  0x1b   : > { %s434_s20 = scalar_select %p433_p10, %s4075_s29, 1 }
  0x1d   : > { %s3044_s21 = sshll.u32 %s434_s20, 6  ;;  %s6468_s20 = smov 1   ;;  %v3013_v10 = vld [vmem:[%s6487_s1 + $0x1] ss:$8 sm:$0xf] }
  0x1e   : > { %s4107_s24 = scalar_lea.vmem %s6483_s0, %s3044_s21  ;;  %s6464_s21 = smov 127   ;;  %v3014_v12 = vld [vmem:[%s6487_s1 + $0x1] ss:$8 sm:$0xf0] }
  0x1f   : > { %v4110_v0 = vld [vmem:[%s4107_s24] sm:$0xff]  ;;  %v4117_v1 = vld [vmem:[%s4107_s24 + $0x8] sm:$0xff]  ;;  %v4124_v2 = vld [vmem:[%s4107_s24 + $0x38] sm:$0xff]  ;;  %v4266_v16 = vor.u32 %v3014_v12, %v3013_v10  ;;  %s6489_s0 = smov 1  }
  0x20   : > { %525 = vrot.lane.b32.xlu1 %v4110_v0, %s6462_s30  ;;  %446 = vrot.lane.b32.xlu0 %v4110_v0, %s6466_s15  ;;  %v4143_v3 = vld [vmem:[%s4107_s24 + $0x10] sm:$0xff]  ;;  %v4166_v4 = vld [vmem:[%s4107_s24 + $0x18] sm:$0xff] }
  0x21   : > { %v4190_v6 = vld [vmem:[%s4107_s24 + $0x20] sm:$0xff]  ;;  %v4209_v7 = vld [vmem:[%s4107_s24 + $0x28] sm:$0xff]  ;;  %v4228_v8 = vld [vmem:[%s4107_s24 + $0x30] sm:$0xff]  ;;  %v562_v23 = vrot.slane %v4266_v16, %v4271_v18  ;;  %v558_v28 = vrot.slane %v4266_v16, %v4274_v21  ;;  %s3979_s24 = smov 111  }
  0x22   : > { %v473_v13 = vld [vmem:[%s6487_s1] ss:$8 sm:$0xf]  ;;  %v3015_v32 = vld [vmem:[%s6487_s1 + $0x2] ss:$8 sm:$0xf] }
  0x23   : > { %v474_v14 = vld [vmem:[%s6487_s1] ss:$8 sm:$0xf0]  ;;  %v3016_v33 = vld [vmem:[%s6487_s1 + $0x2] ss:$8 sm:$0xf0] }
  0x24   : > { %527 = vrot.lane.b32.xlu1 %v4117_v1, %s6462_s30  ;;  %448 = vrot.lane.b32.xlu0 %v4117_v1, %s6466_s15  ;;  %v4268_v17 = vor.u32 %v474_v14, %v473_v13  ;;  %v3017_v34 = vld [vmem:[%s6487_s1 + $0x3] ss:$8 sm:$0xf]  ;;  %v4326_v41 = vor.u32 %v3016_v33, %v3015_v32  ;;  %v3019_v53 = vld [vmem:[%s6487_s1 + $0x5] ss:$8 sm:$0xf] }
  0x25   : > { %v3018_v35 = vld [vmem:[%s6487_s1 + $0x3] ss:$8 sm:$0xf0]  ;;  %v3020_v54 = vld [vmem:[%s6487_s1 + $0x5] ss:$8 sm:$0xf0] }
  0x26   : > { %v484_v22 = vrot.slane %v4268_v17, %v4271_v18  ;;  %v480_v29 = vrot.slane %v4268_v17, %v4274_v21  ;;  %v4332_v45 = vor.u32 %v3018_v35, %v3017_v34  ;;  %v640_v50 = vrot.slane %v4326_v41, %v4271_v18  ;;  %v3023_v32 = vld [vmem:[%s6487_s1 + $0x7] ss:$8 sm:$0xf] }
  0x27   : > { %v636_v61 = vrot.slane %v4326_v41, %v4274_v21  ;;  %v4363_v62 = vor.u32 %v3020_v54, %v3019_v53  ;;  %v3024_v33 = vld [vmem:[%s6487_s1 + $0x7] ss:$8 sm:$0xf0] }
  0x28   : > { %539 = vrot.lane.b32.xlu1 %v4124_v2, %s6462_s30  ;;  %460 = vrot.lane.b32.xlu0 %v4124_v2, %s6466_s15  ;;  %v718_v51 = vrot.slane %v4332_v45, %v4271_v18  ;;  %v714_v58 = vrot.slane %v4332_v45, %v4274_v21 }
  0x2c   : > { %605 = vrot.lane.b32.xlu1 %v4117_v1, %s6467_s16  ;;  %603 = vrot.lane.b32.xlu0 %v4110_v0, %s6467_s16 }
  0x30   : > { %683 = vrot.lane.b32.xlu1 %v4117_v1, %s6468_s20  ;;  %681 = vrot.lane.b32.xlu0 %v4110_v0, %s6468_s20 }
  0x34   : > { %695 = vrot.lane.b32.xlu1 %v4124_v2, %s6468_s20  ;;  %617 = vrot.lane.b32.xlu0 %v4124_v2, %s6467_s16 }
  0x38   : > { %763 = vrot.lane.b32.xlu1 %v4143_v3, %s6464_s21  ;;  %761 = vrot.lane.b32.xlu0 %v4117_v1, %s6464_s21 }
  0x3c   : > { %839 = vrot.lane.b32.xlu1 %v4117_v1, %s6460_s22  ;;  %759 = vrot.lane.b32.xlu0 %v4110_v0, %s6464_s21 }
  0x40   : > { %917 = vrot.lane.b32.xlu1 %v4117_v1, %s6471_s23  ;;  %841 = vrot.lane.b32.xlu0 %v4143_v3, %s6460_s22 }
  0x44   : > { %837 = vrot.lane.b32.xlu1 %v4110_v0, %s6460_s22  ;;  %919 = vrot.lane.b32.xlu0 %v4143_v3, %s6471_s23  ;;  %s3972_s22 = smov 95  }
  0x48   : > { %450 = vrot.lane.b32.xlu1 %v4143_v3, %s6466_s15  ;;  %915 = vrot.lane.b32.xlu0 %v4110_v0, %s6471_s23 }
  0x4c   : > { %529 = vrot.lane.b32.xlu1 %v4143_v3, %s6462_s30  ;;  %452 = vrot.lane.b32.xlu0 %v4166_v4, %s6466_s15 }
  0x50   : > { %995 = vrot.lane.b32.xlu1 %v4117_v1, %s3972_s22  ;;  %531 = vrot.lane.b32.xlu0 %v4166_v4, %s6462_s30  ;;  %s6484_s30 = smov 97  }
  0x54   : > { %993 = vrot.lane.b32.xlu1 %v4110_v0, %s3972_s22  ;;  %997 = vrot.lane.b32.xlu0 %v4143_v3, %s3972_s22 }
  0x58   : > { %609 = vrot.lane.b32.xlu1 %v4166_v4, %s6467_s16  ;;  %607 = vrot.lane.b32.xlu0 %v4143_v3, %s6467_s16 }
  0x5c   : > { %687 = vrot.lane.b32.xlu1 %v4166_v4, %s6468_s20  ;;  %685 = vrot.lane.b32.xlu0 %v4143_v3, %s6468_s20 }
  0x60   : > { %767 = vrot.lane.b32.xlu1 %v4190_v6, %s6464_s21  ;;  %765 = vrot.lane.b32.xlu0 %v4166_v4, %s6464_s21  ;;  %s6485_s21 = smov 32  }
  0x64   : > { %845 = vrot.lane.b32.xlu1 %v4190_v6, %s6484_s30  ;;  %843 = vrot.lane.b32.xlu0 %v4166_v4, %s6484_s30 }
  0x68   : > { %923 = vrot.lane.b32.xlu1 %v4190_v6, %s6471_s23  ;;  %921 = vrot.lane.b32.xlu0 %v4166_v4, %s6471_s23 }
  0x6c   : > { %1001 = vrot.lane.b32.xlu1 %v4190_v6, %s3972_s22  ;;  %999 = vrot.lane.b32.xlu0 %v4166_v4, %s3972_s22 }
  0x70   : > { %456 = vrot.lane.b32.xlu1 %v4209_v7, %s6466_s15  ;;  %454 = vrot.lane.b32.xlu0 %v4190_v6, %s6466_s15  ;;  %s6486_s15 = smov 127  }
  0x74   : > { %535 = vrot.lane.b32.xlu1 %v4209_v7, %s6485_s21  ;;  %533 = vrot.lane.b32.xlu0 %v4190_v6, %s6485_s21 }
  0x78   : > { %613 = vrot.lane.b32.xlu1 %v4209_v7, %s6467_s16  ;;  %611 = vrot.lane.b32.xlu0 %v4190_v6, %s6467_s16  ;;  %s6488_s16 = smov 33  }
  0x7c   : > { %691 = vrot.lane.b32.xlu1 %v4209_v7, %s6468_s20  ;;  %689 = vrot.lane.b32.xlu0 %v4190_v6, %s6468_s20  ;;  %s3976_s20 = smov 15  }
  0x80   : > { %771 = vrot.lane.b32.xlu1 %v4228_v8, %s6486_s15  ;;  %769 = vrot.lane.b32.xlu0 %v4209_v7, %s6486_s15 }
  0x84   : > { %849 = vrot.lane.b32.xlu1 %v4228_v8, %s6484_s30  ;;  %847 = vrot.lane.b32.xlu0 %v4209_v7, %s6484_s30 }
  0x88   : > { %927 = vrot.lane.b32.xlu1 %v4228_v8, %s6471_s23  ;;  %925 = vrot.lane.b32.xlu0 %v4209_v7, %s6471_s23  ;;  %s3978_s23 = smov 112  }
  0x8c   : > { %1005 = vrot.lane.b32.xlu1 %v4228_v8, %s3972_s22  ;;  %1003 = vrot.lane.b32.xlu0 %v4209_v7, %s3972_s22 }
  0x90   : > { %537 = vrot.lane.b32.xlu1 %v4228_v8, %s6485_s21  ;;  %458 = vrot.lane.b32.xlu0 %v4228_v8, %s6488_s16  ;;  %s3977_s21 = smov 113  }
  0x92   : > { %v526_v19 = vpop.permute.xlu1 %525  ;;  %v447_v20 = vpop.permute.xlu0 %446 }
  0x94   : > { %693 = vrot.lane.b32.xlu1 %v4228_v8, %s6489_s0  ;;  %615 = vrot.lane.b32.xlu0 %v4228_v8, %s6490_s27  ;;  %s6491_s27 = smov 96  }
  0x96   : > { %v4286_v24 = vpop.permute.xlu1 %527  ;;  %v4288_v25 = vpop.permute.xlu0 %448 }
  0x97   : > { %v548_v26 = vsel %vm541_vm0, %v526_v19, %v4286_v24  ;;  %v471_v27 = vsel %vm464_vm1, %v447_v20, %v4288_v25 }
  0x98   : > { %851 = vrot.lane.b32.xlu1 %v4124_v2, %s6484_s30  ;;  %773 = vrot.lane.b32.xlu0 %v4124_v2, %s6486_s15  ;;  %v518_v30 = vmul.f32 %v484_v22, %v471_v27  ;;  %v596_v31 = vmul.f32 %v562_v23, %v548_v26 }
  0x9a   : > { %v4316_v36 = vpop.permute.xlu1 %539  ;;  %v4318_v37 = vpop.permute.xlu0 %460  ;;  %v3251_v38 = vpack.c.bf16 %v596_v31, %v518_v30  ;;  %v3021_v30 = vld [vmem:[%s6487_s1 + $0x6] ss:$8 sm:$0xf] }
  0x9b   : > { %v549_v39 = vsel %vm541_vm0, %v4316_v36, %v526_v19  ;;  %v472_v40 = vsel %vm464_vm1, %v4318_v37, %v447_v20  ;;  %v796_v20 = vrot.slane %v4363_v62, %v4271_v18  ;;  %v3022_v31 = vld [vmem:[%s6487_s1 + $0x6] ss:$8 sm:$0xf0] }
  0x9c   : > { %v595_v43 = vmul.f32 %v558_v28, %v549_v39  ;;  %v517_v44 = vmul.f32 %v480_v29, %v472_v40  ;;  %1007 = vrot.lane.b32.xlu1 %v4124_v2, %s3972_s22  ;;  %929 = vrot.lane.b32.xlu0 %v4124_v2, %s6491_s27  ;;  %v792_v29 = vrot.slane %v4363_v62, %v4274_v21  ;;  %s3975_s22 = smov 16  }
  0x9d   : > { %3252 = vmatprep.subr.bf16.mxu1 %v3251_v38  ;;  %v4403_v42 = vor.u32 %v3022_v31, %v3021_v30 }
  0x9e   : > { %v4337_v47 = vpop.permute.xlu1 %605  ;;  %v604_v48 = vpop.permute.xlu0 %603  ;;  %v3253_v49 = vpack.c.bf16 %v595_v43, %v517_v44  ;;  %v4405_v43 = vor.u32 %v3024_v33, %v3023_v32 }
  0x9f   : > { %v626_v52 = vsel %vm619_vm2, %v604_v48, %v4337_v47  ;;  %v870_v54 = vrot.slane %v4403_v42, %v4274_v21 }
  0xa0   : > { %3254 = vmatpush1.bf16.msra.mxu1 %v3253_v49  ;;  %1075 = vperm.xlu0 %3823, %v1072_v46   ;;  %v674_v59 = vmul.f32 %v640_v50, %v626_v52  ;;  %v952_v49 = vrot.slane %v4405_v43, %v4271_v18 }
  0xa2   : > { %v4354_v55 = vpop.permute.xlu1 %683  ;;  %v682_v56 = vpop.permute.xlu0 %681 }
  0xa3   : > { %v704_v57 = vsel %vm697_vm3, %v682_v56, %v4354_v55 }
  0xa4   : > { %v752_v60 = vmul.f32 %v718_v51, %v704_v57  ;;  %v948_v57 = vrot.slane %v4405_v43, %v4274_v21 }
  0xa6   : > { %v4365_v63 = vpop.permute.xlu1 %695  ;;  %v4367_v9 = vpop.permute.xlu0 %617  ;;  %v3255_v10 = vpack.c.bf16 %v752_v60, %v674_v59 }
  0xa7   : > { %v705_v12 = vsel %vm697_vm3, %v4365_v63, %v682_v56  ;;  %v627_v13 = vsel %vm619_vm2, %v4367_v9, %v604_v48 }
  0xa8   : > { %v751_v14 = vmul.f32 %v714_v58, %v705_v12  ;;  %v673_v19 = vmul.f32 %v636_v61, %v627_v13  ;;  %3256 = vmatprep.subr.bf16.mxu1 %v3255_v10 }
  0xaa   : > { %v4378_v22 = vpop.permute.xlu1 %763  ;;  %v762_v23 = vpop.permute.xlu0 %761  ;;  %v3257_v26 = vpack.c.bf16 %v751_v14, %v673_v19  ;;  %v3025_v14 = vld [vmem:[%s6487_s1 + $0x40] ss:$8 sm:$0xf] }
  0xab   : > { %v781_v27 = vsel %vm775_vm4, %v762_v23, %v4378_v22  ;;  %v3026_v19 = vld [vmem:[%s6487_s1 + $0x40] ss:$8 sm:$0xf0] }
  0xac   : > { %v830_v28 = vmul.f32 %v796_v20, %v781_v27  ;;  %3258 = vmatpush1.bf16.msra.mxu1 %v3257_v26  ;;  %v4447_v27 = vsub.s32 3, %v4249_v11 }
  0xae   : > { %v840_v34 = vpop.permute.xlu1 %839  ;;  %v4397_v35 = vpop.permute.xlu0 %759  ;;  %v3259_v38 = vpack.c.bf16 %v830_v28, %v4117_v1  ;;  %v874_v1 = vrot.slane %v4403_v42, %v4271_v18  ;;  %v4449_v28 = vor.u32 %v3026_v19, %v3025_v14  ;;  %v570_v31 = vrot.slane %v4266_v16, %v4447_v27 }
  0xaf   : > { %v782_v39 = vsel %vm775_vm4, %v4397_v35, %v762_v23 }
  0xb0   : > { %v829_v40 = vmul.f32 %v792_v29, %v782_v39  ;;  %3260 = vmatprep.subr.bf16.mxu1 %v3259_v38  ;;  %v4452_v29 = vsub.s32 2, %v4249_v11 }
  0xb2   : > { %v918_v44 = vpop.permute.xlu1 %917  ;;  %v4408_v46 = vpop.permute.xlu0 %841  ;;  %v3261_v48 = vpack.c.bf16 %v829_v40, %v4110_v0  ;;  %v566_v33 = vrot.slane %v4266_v16, %v4452_v29  ;;  %v1026_v40 = vrot.slane %v4449_v28, %v4274_v21  ;;  %v644_v19 = vrot.slane %v4326_v41, %v4452_v29 }
  0xb3   : > { %v859_v50 = vsel %vm853_vm5, %v840_v34, %v4408_v46 }
  0xb4   : > { %3262 = vmatpush1.bf16.msra.mxu1 %v3261_v48  ;;  %v908_v53 = vmul.f32 %v874_v1, %v859_v50  ;;  %v488_v48 = vrot.slane %v4268_v17, %v4452_v29 }
  0xb6   : > { %v4419_v51 = vpop.permute.xlu1 %837  ;;  %v4421_v52 = vpop.permute.xlu0 %919 }
  0xb7   : > { %v937_v0 = vsel %vm931_vm6, %v918_v44, %v4421_v52  ;;  %v860_v58 = vsel %vm853_vm5, %v4419_v51, %v840_v34  ;;  %v492_v34 = vrot.slane %v4268_v17, %v4447_v27 }
  0xb8   : > { %v986_v56 = vmul.f32 %v952_v49, %v937_v0  ;;  %v907_v12 = vmul.f32 %v870_v54, %v860_v58 }
  0xba   : > { %v451_v59 = vpop.permute.xlu1 %450  ;;  %v4433_v60 = vpop.permute.xlu0 %915  ;;  %v3263_v61 = vpack.c.bf16 %v986_v56, %v908_v53 }
  0xbb   : > { %v938_v10 = vsel %vm931_vm6, %v4433_v60, %v918_v44  ;;  %v1030_v44 = vrot.slane %v4449_v28, %v4271_v18  ;;  %v470_v49 = vsel %vm464_vm1, %v4288_v25, %v451_v59  ;;  %v4494_v25 = vld [vmem:[%s6492_s5] sm:$0xff] }
  0xbc   : > { %v985_v13 = vmul.f32 %v948_v57, %v938_v10  ;;  %3264 = vmatprep.subr.bf16.mxu1 %v3263_v61  ;;  %v519_v10 = vmul.f32 %v488_v48, %v470_v49 }
  0xbe   : > { %v530_v20 = vpop.permute.xlu1 %529  ;;  %v4444_v23 = vpop.permute.xlu0 %452  ;;  %v3265_v26 = vpack.c.bf16 %v985_v13, %v907_v12 }
  0xbf   : > { %v547_v39 = vsel %vm541_vm0, %v4286_v24, %v530_v20  ;;  %v469_v1 = vsel %vm464_vm1, %v451_v59, %v4444_v23 }
  0xc0   : > { %3266 = vmatpush1.bf16.msra.mxu1 %v3265_v26  ;;  %v597_v53 = vmul.f32 %v566_v33, %v547_v39  ;;  %v520_v57 = vmul.f32 %v492_v34, %v469_v1  ;;  %v722_v26 = vrot.slane %v4332_v45, %v4452_v29 }
  0xc2   : > { %v996_v30 = vpop.permute.xlu1 %995  ;;  %v4456_v32 = vpop.permute.xlu0 %531  ;;  %v3269_v14 = vpack.c.bf16 %v597_v53, %v519_v10 }
  0xc3   : > { %v546_v38 = vsel %vm541_vm0, %v530_v20, %v4456_v32  ;;  %v648_v20 = vrot.slane %v4326_v41, %v4447_v27 }
  0xc4   : > { %v598_v24 = vmul.f32 %v570_v31, %v546_v38 }
  0xc6   : > { %v4481_v50 = vpop.permute.xlu1 %993  ;;  %v4483_v0 = vpop.permute.xlu0 %997  ;;  %v3267_v13 = vpack.c.bf16 %v598_v24, %v520_v57 }
  0xc7   : > { %v1016_v54 = vsel %vm1009_vm7, %v4481_v50, %v996_v30  ;;  %v1015_v56 = vsel %vm1009_vm7, %v996_v30, %v4483_v0  ;;  %v726_v30 = vrot.slane %v4332_v45, %v4447_v27 }
  0xc8   : > { %v1063_v58 = vmul.f32 %v1026_v40, %v1016_v54  ;;  %v1064_v61 = vmul.f32 %v1030_v44, %v1015_v56  ;;  %v800_v44 = vrot.slane %v4363_v62, %v4452_v29 }
  0xca   : > { %v4496_v59 = vpop.permute.xlu1 %609  ;;  %1098 = vmatprep.subr.mxu1 %v1064_v61  ;;  %v608_v12 = vpop.permute.xlu0 %607 }
  0xcb   : > { %1099 = vmatpush1.msra.mxu1 %v1063_v58  ;;  %v624_v31 = vsel %vm619_vm2, %v608_v12, %v4496_v59  ;;  %v625_v33 = vsel %vm619_vm2, %v4337_v47, %v608_v12  ;;  %v804_v47 = vrot.slane %v4363_v62, %v4447_v27 }
  0xcc   : > { %3268 = vmatprep.subr.bf16.mxu1 %v3267_v13  ;;  %3027 = vmatmul.mubr.msk.f32.vlgmr.msra.gmra.mrb[0].mxu1 %vm1078_vm8, %v4494_v25  ;;  %v675_v48 = vmul.f32 %v644_v19, %v625_v33  ;;  %v676_v1 = vmul.f32 %v648_v20, %v624_v31  ;;  %v878_v20 = vrot.slane %v4403_v42, %v4452_v29 }
  0xcd   : > { %3270 = vmatpush1.bf16.msra.mxu1 %v3269_v14  ;;  %1217 = vmatprep.mubr.f32.mxu1 %v3971_v5 }
  0xce   : > { %v4515_v34 = vpop.permute.xlu1 %687  ;;  %v686_v38 = vpop.permute.xlu0 %685 }
  0xcf   : > { %v702_v39 = vsel %vm697_vm3, %v686_v38, %v4515_v34  ;;  %v703_v40 = vsel %vm697_vm3, %v4354_v55, %v686_v38 }
  0xd0   : > { %v753_v49 = vmul.f32 %v722_v26, %v703_v40  ;;  %v754_v24 = vmul.f32 %v726_v30, %v702_v39  ;;  %v882_v26 = vrot.slane %v4403_v42, %v4447_v27  ;;  %v960_v30 = vrot.slane %v4405_v43, %v4447_v27 }
  0xd1   : > { %v1038_v40 = vrot.slane %v4449_v28, %v4447_v27 }
  0xd2   : > { %v3273_v53 = vpack.c.bf16 %v753_v49, %v675_v48  ;;  %v4527_v54 = vpop.permute.xlu1 %767  ;;  %v766_v56 = vpop.permute.xlu0 %765  ;;  %v3271_v57 = vpack.c.bf16 %v754_v24, %v676_v1 }
  0xd3   : > { %v779_v58 = vsel %vm775_vm4, %v766_v56, %v4527_v54  ;;  %v780_v55 = vsel %vm775_vm4, %v4378_v22, %v766_v56  ;;  %v956_v22 = vrot.slane %v4405_v43, %v4452_v29  ;;  %v4566_v56 = vsub.s32 5, %v4249_v11 }
  0xd4   : > { %v831_v61 = vmul.f32 %v800_v44, %v780_v55  ;;  %v832_v10 = vmul.f32 %v804_v47, %v779_v58  ;;  %3272 = vmatprep.subr.bf16.mxu1 %v3271_v57  ;;  %v1034_v57 = vrot.slane %v4449_v28, %v4452_v29  ;;  %v4577_v55 = vsub.s32 4, %v4249_v11 }
  0xd5   : > { %3274 = vmatpush1.bf16.msra.mxu1 %v3273_v53 }
  0xd6   : > { %v3277_v12 = vpack.c.bf16 %v831_v61, %v4143_v3  ;;  %v4536_v13 = vpop.permute.xlu1 %845  ;;  %v844_v14 = vpop.permute.xlu0 %843  ;;  %v3275_v19 = vpack.c.bf16 %v832_v10, %v4166_v4  ;;  %v500_v10 = vrot.slane %v4268_v17, %v4566_v56 }
  0xd7   : > { %v857_v3 = vsel %vm853_vm5, %v844_v14, %v4536_v13  ;;  %v858_v4 = vsel %vm853_vm5, %v4408_v46, %v844_v14 }
  0xd8   : > { %3276 = vmatprep.subr.bf16.mxu1 %v3275_v19  ;;  %v909_v44 = vmul.f32 %v878_v20, %v858_v4  ;;  %v910_v47 = vmul.f32 %v882_v26, %v857_v3  ;;  %v574_v19 = vrot.slane %v4266_v16, %v4577_v55  ;;  %v578_v20 = vrot.slane %v4266_v16, %v4566_v56 }
  0xd9   : > { %3278 = vmatpush1.bf16.msra.mxu1 %v3277_v12 }
  0xda   : > { %v4553_v31 = vpop.permute.xlu1 %923  ;;  %v922_v33 = vpop.permute.xlu0 %921 }
  0xdb   : > { %v935_v38 = vsel %vm931_vm6, %v922_v33, %v4553_v31  ;;  %v936_v39 = vsel %vm931_vm6, %v4421_v52, %v922_v33 }
  0xdc   : > { %v987_v48 = vmul.f32 %v956_v22, %v936_v39  ;;  %v988_v1 = vmul.f32 %v960_v30, %v935_v38 }
  0xde   : > { %v3281_v46 = vpack.c.bf16 %v987_v48, %v909_v44  ;;  %v4563_v49 = vpop.permute.xlu1 %1001  ;;  %v1000_v24 = vpop.permute.xlu0 %999  ;;  %v3279_v53 = vpack.c.bf16 %v988_v1, %v910_v47  ;;  %v656_v47 = vrot.slane %v4326_v41, %v4566_v56 }
  0xdf   : > { %v1013_v52 = vsel %vm1009_vm7, %v1000_v24, %v4563_v49  ;;  %v1014_v27 = vsel %vm1009_vm7, %v4483_v0, %v1000_v24  ;;  %v496_v0 = vrot.slane %v4268_v17, %v4577_v55  ;;  %v730_v24 = vrot.slane %v4332_v45, %v4577_v55 }
  0xe0   : > { %v1066_v58 = vmul.f32 %v1038_v40, %v1013_v52  ;;  %3280 = vmatprep.subr.bf16.mxu1 %v3279_v53  ;;  %v1065_v12 = vmul.f32 %v1034_v57, %v1014_v27  ;;  %v734_v53 = vrot.slane %v4332_v45, %v4566_v56 }
  0xe1   : > { %3282 = vmatpush1.bf16.msra.mxu1 %v3281_v46 }
  0xe2   : > { %v4579_v61 = vpop.permute.xlu1 %456  ;;  %v455_v29 = vpop.permute.xlu0 %454  ;;  %1169 = vmatprep.subr.mxu1 %v1066_v58 }
  0xe3   : > { %v467_v14 = vsel %vm464_vm1, %v455_v29, %v4579_v61  ;;  %v468_v26 = vsel %vm464_vm1, %v4444_v23, %v455_v29 }
  0xe4   : > { %v522_v22 = vmul.f32 %v500_v10, %v467_v14  ;;  %v521_v38 = vmul.f32 %v496_v0, %v468_v26 }
  0xe5   : > { %1170 = vmatpush1.msra.mxu1 %v1065_v12  ;;  %v808_v12 = vrot.slane %v4363_v62, %v4577_v55 }
  0xe6   : > { %v4595_v30 = vpop.permute.xlu1 %535  ;;  %3028 = vmatmul.mubr.msk.f32.vlgmr.msra.gmra.mrb[2].mxu1 %vm1078_vm8, %v4494_v25  ;;  %v534_v3 = vpop.permute.xlu0 %533 }
  0xe7   : > { %v544_v4 = vsel %vm541_vm0, %v534_v3, %v4595_v30  ;;  %v545_v33 = vsel %vm541_vm0, %v4456_v32, %v534_v3  ;;  %1288 = vmatprep.mubr.f32.mxu1 %v3971_v5  ;;  %v652_v32 = vrot.slane %v4326_v41, %v4577_v55 }
  0xe8   : > { %v599_v23 = vmul.f32 %v574_v19, %v545_v33  ;;  %v600_v39 = vmul.f32 %v578_v20, %v544_v4 }
  0xea   : > { %v3285_v40 = vpack.c.bf16 %v599_v23, %v521_v38  ;;  %v4606_v44 = vpop.permute.xlu1 %613  ;;  %v612_v48 = vpop.permute.xlu0 %611  ;;  %v3283_v1 = vpack.c.bf16 %v600_v39, %v522_v22 }
  0xeb   : > { %v622_v46 = vsel %vm619_vm2, %v612_v48, %v4606_v44  ;;  %v623_v57 = vsel %vm619_vm2, %v4496_v59, %v612_v48  ;;  %v812_v59 = vrot.slane %v4363_v62, %v4566_v56 }
  0xec   : > { %3284 = vmatprep.subr.bf16.mxu1 %v3283_v1  ;;  %v678_v52 = vmul.f32 %v656_v47, %v622_v46  ;;  %v677_v14 = vmul.f32 %v652_v32, %v623_v57  ;;  %v964_v46 = vrot.slane %v4405_v43, %v4577_v55 }
  0xed   : > { %3286 = vmatpush1.bf16.msra.mxu1 %v3285_v40  ;;  %v890_v40 = vrot.slane %v4403_v42, %v4566_v56 }
  0xee   : > { %v4622_v27 = vpop.permute.xlu1 %691  ;;  %v690_v58 = vpop.permute.xlu0 %689 }
  0xef   : > { %v700_v10 = vsel %vm697_vm3, %v690_v58, %v4622_v27  ;;  %v701_v29 = vsel %vm697_vm3, %v4515_v34, %v690_v58  ;;  %v1046_v58 = vrot.slane %v4449_v28, %v4566_v56 }
  0xf0   : > { %v755_v0 = vmul.f32 %v730_v24, %v701_v29  ;;  %v756_v19 = vmul.f32 %v734_v53, %v700_v10  ;;  %v4671_v10 = vsub.s32 6, %v4249_v11 }
  0xf2   : > { %v3289_v20 = vpack.c.bf16 %v755_v0, %v677_v14  ;;  %v4634_v26 = vpop.permute.xlu1 %771  ;;  %v770_v22 = vpop.permute.xlu0 %769  ;;  %v3287_v3 = vpack.c.bf16 %v756_v19, %v678_v52  ;;  %v4674_v14 = vsub.s32 7, %v4249_v11  ;;  %v582_v11 = vrot.slane %v4266_v16, %v4671_v10 }
  0xf3   : > { %v777_v4 = vsel %vm775_vm4, %v770_v22, %v4634_v26  ;;  %v778_v34 = vsel %vm775_vm4, %v4527_v54, %v770_v22  ;;  %v886_v54 = vrot.slane %v4403_v42, %v4577_v55 }
  0xf4   : > { %v833_v33 = vmul.f32 %v808_v12, %v778_v34  ;;  %v834_v38 = vmul.f32 %v812_v59, %v777_v4  ;;  %3288 = vmatprep.subr.bf16.mxu1 %v3287_v3  ;;  %v1042_v59 = vrot.slane %v4449_v28, %v4577_v55  ;;  %v586_v4 = vrot.slane %v4266_v16, %v4674_v14 }
  0xf5   : > { %3290 = vmatpush1.bf16.msra.mxu1 %v3289_v20  ;;  %v504_v55 = vrot.slane %v4268_v17, %v4671_v10  ;;  %v508_v34 = vrot.slane %v4268_v17, %v4674_v14  ;;  %v660_v16 = vrot.slane %v4326_v41, %v4671_v10 }
  0xf6   : > { %v3293_v23 = vpack.c.bf16 %v833_v33, %v4190_v6  ;;  %v4643_v39 = vpop.permute.xlu1 %849  ;;  %v848_v47 = vpop.permute.xlu0 %847  ;;  %v3291_v48 = vpack.c.bf16 %v834_v38, %v4209_v7  ;;  %v968_v6 = vrot.slane %v4405_v43, %v4566_v56  ;;  %v738_v33 = vrot.slane %v4332_v45, %v4671_v10 }
  0xf7   : > { %v855_v1 = vsel %vm853_vm5, %v848_v47, %v4643_v39  ;;  %v856_v32 = vsel %vm853_vm5, %v4536_v13, %v848_v47  ;;  %v664_v47 = vrot.slane %v4326_v41, %v4674_v14 }
  0xf8   : > { %3292 = vmatprep.subr.bf16.mxu1 %v3291_v48  ;;  %v912_v7 = vmul.f32 %v890_v40, %v855_v1  ;;  %v911_v13 = vmul.f32 %v886_v54, %v856_v32  ;;  %v742_v40 = vrot.slane %v4332_v45, %v4674_v14 }
  0xf9   : > { %3294 = vmatpush1.bf16.msra.mxu1 %v3293_v23 }
  0xfa   : > { %v4660_v24 = vpop.permute.xlu1 %927  ;;  %v926_v53 = vpop.permute.xlu0 %925 }
  0xfb   : > { %v933_v57 = vsel %vm931_vm6, %v926_v53, %v4660_v24  ;;  %v934_v52 = vsel %vm931_vm6, %v4553_v31, %v926_v53  ;;  %v816_v53 = vrot.slane %v4363_v62, %v4671_v10 }
  0xfc   : > { %v989_v29 = vmul.f32 %v964_v46, %v934_v52  ;;  %v990_v12 = vmul.f32 %v968_v6, %v933_v57 }
  0xfe   : > { %v3297_v0 = vpack.c.bf16 %v989_v29, %v911_v13  ;;  %v4676_v19 = vpop.permute.xlu1 %1005  ;;  %v1004_v20 = vpop.permute.xlu0 %1003  ;;  %v3295_v31 = vpack.c.bf16 %v990_v12, %v912_v7 }
  0xff   : > { %v1011_v56 = vsel %vm1009_vm7, %v1004_v20, %v4676_v19  ;;  %v1012_v22 = vsel %vm1009_vm7, %v4563_v49, %v1004_v20 }
 0x100   : > { %v1068_v3 = vmul.f32 %v1046_v58, %v1011_v56  ;;  %3296 = vmatprep.subr.bf16.mxu1 %v3295_v31  ;;  %v1067_v38 = vmul.f32 %v1042_v59, %v1012_v22 }
 0x101   : > { %3298 = vmatpush1.bf16.msra.mxu1 %v3297_v0 }
 0x102   : > { %v538_v49 = vpop.permute.xlu1 %537  ;;  %v459_v23 = vpop.permute.xlu0 %458  ;;  %1240 = vmatprep.subr.mxu1 %v1068_v3  ;;  %v972_v3 = vrot.slane %v4405_v43, %v4671_v10 }
 0x103   : > { %v542_v17 = vsel %vm541_vm0, %v538_v49, %v4316_v36  ;;  %v543_v48 = vsel %vm541_vm0, %v4595_v30, %v538_v49  ;;  %v465_v1 = vsel %vm464_vm1, %v459_v23, %v4318_v37  ;;  %v466_v45 = vsel %vm464_vm1, %v4579_v61, %v459_v23 }
 0x104   : > { %v601_v54 = vmul.f32 %v582_v11, %v543_v48  ;;  %v602_v46 = vmul.f32 %v586_v4, %v542_v17  ;;  %v523_v6 = vmul.f32 %v504_v55, %v466_v45  ;;  %v524_v41 = vmul.f32 %v508_v34, %v465_v1 }
 0x105   : > { %1241 = vmatpush1.msra.mxu1 %v1067_v38  ;;  %v820_v37 = vrot.slane %v4363_v62, %v4674_v14  ;;  %vm3982_vm0 = vmmov 0  }
 0x106   : > { %v3301_v32 = vpack.c.bf16 %v601_v54, %v523_v6  ;;  %v694_v7 = vpop.permute.xlu1 %693  ;;  %3029 = vmatmul.mubr.msk.f32.vlgmr.msra.gmra.mrb[4].mxu1 %vm1078_vm8, %v4494_v25  ;;  %v616_v36 = vpop.permute.xlu0 %615  ;;  %v3299_v30 = vpack.c.bf16 %v602_v46, %v524_v41 }
 0x107   : > { %v698_v61 = vsel %vm697_vm3, %v694_v7, %v4365_v63  ;;  %v699_v57 = vsel %vm697_vm3, %v4622_v27, %v694_v7  ;;  %v620_v52 = vsel %vm619_vm2, %v616_v36, %v4367_v9  ;;  %v621_v58 = vsel %vm619_vm2, %v4606_v44, %v616_v36  ;;  %1359 = vmatprep.mubr.f32.mxu1 %v3971_v5  ;;  %v1439_v7 = vld [vmem:[%s6449_s3 + $0x8] sm:$0xff]  ;;  %v1441_v36 = vld [vmem:[%s6449_s3 + $0x18] sm:$0xff] }
 0x108   : > { %v757_v13 = vmul.f32 %v738_v33, %v699_v57  ;;  %v758_v62 = vmul.f32 %v742_v40, %v698_v61  ;;  %v679_v29 = vmul.f32 %v660_v16, %v621_v58  ;;  %v680_v12 = vmul.f32 %v664_v47, %v620_v52  ;;  %3300 = vmatprep.subr.bf16.mxu1 %v3299_v30  ;;  %v1438_v30 = vld [vmem:[%s6449_s3] sm:$0xff]  ;;  %v1443_v61 = vld [vmem:[%s6449_s3 + $0x28] sm:$0xff]  ;;  %v1445_v57 = vld [vmem:[%s6449_s3 + $0x38] sm:$0xff] }
 0x109   : > { %3302 = vmatpush1.bf16.msra.mxu1 %v3301_v32  ;;  %v894_v27 = vrot.slane %v4403_v42, %v4671_v10  ;;  %v898_v9 = vrot.slane %v4403_v42, %v4674_v14  ;;  %v976_v42 = vrot.slane %v4405_v43, %v4674_v14  ;;  %v3319_v58 = vpack.c.bf16 %v1445_v57, %v1443_v61  ;;  %v1477_v61 = vld [vmem:[%s6449_s3 + $0x138] sm:$0xff] }
 0x10a   : > { %v3305_v63 = vpack.c.bf16 %v757_v13, %v679_v29  ;;  %v852_v0 = vpop.permute.xlu1 %851  ;;  %v774_v59 = vpop.permute.xlu0 %773  ;;  %v3303_v20 = vpack.c.bf16 %v758_v62, %v680_v12  ;;  %v1442_v13 = vld [vmem:[%s6449_s3 + $0x20] sm:$0xff]  ;;  %v1444_v62 = vld [vmem:[%s6449_s3 + $0x30] sm:$0xff]  ;;  %v1447_v29 = vld [vmem:[%s6449_s3 + $0x48] sm:$0xff] }
 0x10b   : > { %v854_v44 = vsel %vm853_vm5, %v4643_v39, %v852_v0  ;;  %v776_v31 = vsel %vm775_vm4, %v4634_v26, %v774_v59  ;;  %v783_v56 = vsel %vm775_vm4, %v774_v59, %v4397_v35  ;;  %v861_v39 = vsel %vm853_vm5, %v852_v0, %v4419_v51  ;;  %v1449_v12 = vld [vmem:[%s6449_s3 + $0x58] sm:$0xff]  ;;  %v1446_v0 = vld [vmem:[%s6449_s3 + $0x40] sm:$0xff]  ;;  %v1448_v59 = vld [vmem:[%s6449_s3 + $0x50] sm:$0xff] }
 0x10c   : > { %v835_v22 = vmul.f32 %v816_v53, %v776_v31  ;;  %v836_v11 = vmul.f32 %v820_v37, %v783_v56  ;;  %3304 = vmatprep.subr.bf16.mxu1 %v3303_v20  ;;  %v913_v4 = vmul.f32 %v894_v27, %v854_v44  ;;  %v914_v38 = vmul.f32 %v898_v9, %v861_v39  ;;  %v1440_v37 = vld [vmem:[%s6449_s3 + $0x10] sm:$0xff]  ;;  %v1451_v20 = vld [vmem:[%s6449_s3 + $0x68] sm:$0xff]  ;;  %v1453_v9 = vld [vmem:[%s6449_s3 + $0x78] sm:$0xff] }
 0x10d   : > { %3306 = vmatpush1.bf16.msra.mxu1 %v3305_v63  ;;  %v1054_v51 = vrot.slane %v4449_v28, %v4674_v14  ;;  %v3315_v53 = vpack.c.bf16 %v1441_v36, %v1439_v7  ;;  %v3317_v52 = vpack.c.bf16 %v1440_v37, %v1438_v30  ;;  %v3321_v63 = vpack.c.bf16 %v1444_v62, %v1442_v13  ;;  %v1450_v56 = vld [vmem:[%s6449_s3 + $0x60] sm:$0xff]  ;;  %v1475_v37 = vld [vmem:[%s6449_s3 + $0x128] sm:$0xff]  ;;  %v1476_v13 = vld [vmem:[%s6449_s3 + $0x130] sm:$0xff] }
 0x10e   : > { %v3309_v26 = vpack.c.bf16 %v835_v22, %v4228_v8  ;;  %v1008_v55 = vpop.permute.xlu1 %1007  ;;  %v930_v34 = vpop.permute.xlu0 %929  ;;  %v3307_v35 = vpack.c.bf16 %v836_v11, %v4124_v2  ;;  %v1050_v8 = vrot.slane %v4449_v28, %v4671_v10  ;;  %v3323_v27 = vpack.c.bf16 %v1449_v12, %v1447_v29  ;;  %v1452_v22 = vld [vmem:[%s6449_s3 + $0x70] sm:$0xff]  ;;  %v1455_v11 = vld [vmem:[%s6449_s3 + $0x88] sm:$0xff]  ;;  %v1470_v30 = vld [vmem:[%s6449_s3 + $0x100] sm:$0xff] }
 0x10f   : > { %v932_v33 = vsel %vm931_vm6, %v4660_v24, %v930_v34  ;;  %v939_v43 = vsel %vm931_vm6, %v930_v34, %v4433_v60  ;;  %v1017_v2 = vsel %vm1009_vm7, %v1008_v55, %v4481_v50  ;;  %v1010_v24 = vsel %vm1009_vm7, %v4676_v19, %v1008_v55  ;;  %3316 = vmatprep.subr.bf16.mxu0 %v3315_v53  ;;  %v1459_v55 = vld [vmem:[%s6449_s3 + $0xa8] sm:$0xff]  ;;  %v1461_v34 = vld [vmem:[%s6449_s3 + $0xb8] sm:$0xff]  ;;  %v1472_v53 = vld [vmem:[%s6449_s3 + $0x110] sm:$0xff] }
 0x110   : > { %v991_v49 = vmul.f32 %v972_v3, %v932_v33  ;;  %v992_v23 = vmul.f32 %v976_v42, %v939_v43  ;;  %3308 = vmatprep.subr.bf16.mxu1 %v3307_v35  ;;  %v1070_v16 = vmul.f32 %v1054_v51, %v1017_v2  ;;  %v1069_v14 = vmul.f32 %v1050_v8, %v1010_v24  ;;  %v1457_v3 = vld [vmem:[%s6449_s3 + $0x98] sm:$0xff]  ;;  %v1458_v43 = vld [vmem:[%s6449_s3 + $0xa0] sm:$0xff]  ;;  %v1463_v51 = vld [vmem:[%s6449_s3 + $0xc8] sm:$0xff] }
 0x111   : > { %3310 = vmatpush1.bf16.msra.mxu1 %v3309_v26  ;;  %3318 = vmatpush1.bf16.msra.mxu0 %v3317_v52  ;;  %v3325_v44 = vpack.c.bf16 %v1448_v59, %v1446_v0  ;;  %v3327_v31 = vpack.c.bf16 %v1453_v9, %v1451_v20  ;;  %v3329_v42 = vpack.c.bf16 %v1452_v22, %v1450_v56  ;;  %v1456_v26 = vld [vmem:[%s6449_s3 + $0x90] sm:$0xff]  ;;  %v1479_v62 = vld [vmem:[%s6449_s3 + $0x148] sm:$0xff]  ;;  %v1481_v29 = vld [vmem:[%s6449_s3 + $0x158] sm:$0xff] }
 0x112   : > { %v3313_v60 = vpack.c.bf16 %v991_v49, %v913_v4  ;;  %v3311_v40 = vpack.c.bf16 %v992_v23, %v914_v38  ;;  %3320 = vmatprep.subr.bf16.mxu0 %v3319_v58  ;;  %v3331_v39 = vpack.c.bf16 %v1457_v3, %v1455_v11  ;;  %v1454_v4 = vld [vmem:[%s6449_s3 + $0x80] sm:$0xff]  ;;  %v3335_v33 = vpack.c.bf16 %v1461_v34, %v1459_v55  ;;  %v1460_v38 = vld [vmem:[%s6449_s3 + $0xb0] sm:$0xff]  ;;  %v1465_v49 = vld [vmem:[%s6449_s3 + $0xd8] sm:$0xff] }
 0x113   : > { %v3333_v35 = vpack.c.bf16 %v1456_v26, %v1454_v4  ;;  %v3337_v2 = vpack.c.bf16 %v1460_v38, %v1458_v43  ;;  %v3339_v24 = vpack.c.bf16 %v1465_v49, %v1463_v51  ;;  %v3349_v57 = vpack.c.bf16 %v1472_v53, %v1470_v30  ;;  %v1474_v58 = vld [vmem:[%s6449_s3 + $0x120] sm:$0xff]  ;;  %v1480_v0 = vld [vmem:[%s6449_s3 + $0x150] sm:$0xff]  ;;  %v1483_v59 = vld [vmem:[%s6449_s3 + $0x168] sm:$0xff] }
 0x114   : > { %3312 = vmatprep.subr.bf16.mxu1 %v3311_v40  ;;  %v1464_v40 = vld [vmem:[%s6449_s3 + $0xd0] sm:$0xff]  ;;  %v3351_v52 = vpack.c.bf16 %v1477_v61, %v1475_v37  ;;  %v3353_v12 = vpack.c.bf16 %v1476_v13, %v1474_v58  ;;  %v1485_v20 = vld [vmem:[%s6449_s3 + $0x178] sm:$0xff]  ;;  %v1482_v22 = vld [vmem:[%s6449_s3 + $0x160] sm:$0xff] }
 0x115   : > { %3314 = vmatpush1.bf16.msra.mxu1 %v3313_v60  ;;  %3322 = vmatpush1.bf16.msra.mxu0 %v3321_v63  ;;  %v1462_v60 = vld [vmem:[%s6449_s3 + $0xc0] sm:$0xff]  ;;  %v3355_v63 = vpack.c.bf16 %v1481_v29, %v1479_v62  ;;  %v3359_v56 = vpack.c.bf16 %v1485_v20, %v1483_v59  ;;  %v1484_v11 = vld [vmem:[%s6449_s3 + $0x170] sm:$0xff]  ;;  %v1487_v3 = vld [vmem:[%s6449_s3 + $0x188] sm:$0xff] }
 0x116   : > { %1311 = vmatprep.subr.mxu1 %v1070_v16  ;;  %3324 = vmatprep.subr.bf16.mxu0 %v3323_v27  ;;  %v1467_v16 = vld [vmem:[%s6449_s3 + $0xe8] sm:$0xff]  ;;  %v1478_v27 = vld [vmem:[%s6449_s3 + $0x140] sm:$0xff]  ;;  %v1488_v55 = vld [vmem:[%s6449_s3 + $0x190] sm:$0xff] }
 0x117   : > { %v1486_v26 = vld [vmem:[%s6449_s3 + $0x180] sm:$0xff]  ;;  %v1491_v34 = vld [vmem:[%s6449_s3 + $0x1a8] sm:$0xff]  ;;  %v1492_v51 = vld [vmem:[%s6449_s3 + $0x1b0] sm:$0xff] }
 0x118   : > { %v1490_v38 = vld [vmem:[%s6449_s3 + $0x1a0] sm:$0xff] }
 0x119   : > { %1312 = vmatpush1.msra.mxu1 %v1069_v14  ;;  %3326 = vmatpush1.bf16.msra.mxu0 %v3325_v44  ;;  %v1469_v14 = vld [vmem:[%s6449_s3 + $0xf8] sm:$0xff]  ;;  %v3369_v49 = vpack.c.bf16 %v1492_v51, %v1490_v38  ;;  %v1506_v38 = vld [vmem:[%s6449_s3 + $0x220] sm:$0xff]  ;;  %v1508_v51 = vld [vmem:[%s6449_s3 + $0x230] sm:$0xff] }
 0x11a   : > { %3030 = vmatmul.mubr.msk.f32.vlgmr.msra.gmra.mrb[6].mxu1 %vm1078_vm8, %v4494_v25  ;;  %3328 = vmatprep.subr.bf16.mxu0 %v3327_v31  ;;  %v3357_v31 = vpack.c.bf16 %v1480_v0, %v1478_v27 }
 0x11b   : > { %2235 = vmatprep.mubr.f32.mxu1 %v3971_v5 }
 0x11d   : > { %3330 = vmatpush1.bf16.msra.mxu0 %v3329_v42  ;;  %v1489_v42 = vld [vmem:[%s6449_s3 + $0x198] sm:$0xff] }
 0x11e   : > { %3332 = vmatprep.subr.bf16.mxu0 %v3331_v39  ;;  %v3361_v39 = vpack.c.bf16 %v1484_v11, %v1482_v22  ;;  %v3363_v4 = vpack.c.bf16 %v1489_v42, %v1487_v3  ;;  %v1507_v11 = vld [vmem:[%s6449_s3 + $0x228] sm:$0xff]  ;;  %v1509_v3 = vld [vmem:[%s6449_s3 + $0x238] sm:$0xff] }
 0x11f   : > { %v4774_v10 = vpop.permute.xlu0 %1075 }
 0x121   : > { %3334 = vmatpush1.bf16.msra.mxu0 %v3333_v35  ;;  %v1493_v35 = vld [vmem:[%s6449_s3 + $0x1b8] sm:$0xff] }
 0x122   : > { %3336 = vmatprep.subr.bf16.mxu0 %v3335_v33  ;;  %v3365_v33 = vpack.c.bf16 %v1488_v55, %v1486_v26  ;;  %v3367_v43 = vpack.c.bf16 %v1493_v35, %v1491_v34 }
 0x125   : > { %3338 = vmatpush1.bf16.msra.mxu0 %v3337_v2  ;;  %v1495_v2 = vld [vmem:[%s6449_s3 + $0x1c8] sm:$0xff] }
 0x126   : > { %3340 = vmatprep.subr.bf16.mxu0 %v3339_v24  ;;  %v1497_v24 = vld [vmem:[%s6449_s3 + $0x1d8] sm:$0xff] }
 0x19f   : > { %v1148_v28 = vpop.f32.mrb[0].mxu1 }
 0x1a0   : > { %v1150_v50 = vpop.f32.mrb[1].mxu1  ;;  %v4788_v54 = vadd.f32 %v1148_v28, %v4774_v10  ;;  %v3341_v28 = vpack.c.bf16 %v1464_v40, %v1462_v60  ;;  %v3371_v60 = vpack.c.bf16 %v1497_v24, %v1495_v2  ;;  %v1494_v40 = vld [vmem:[%s6449_s3 + $0x1c0] sm:$0xff]  ;;  %v1513_v2 = vld [vmem:[%s6449_s3 + $0x258] sm:$0xff] }
 0x1a1   : > { %v4777_v47 = vadd.f32 %v1150_v50, %v4774_v10  ;;  %v3343_v50 = vpack.c.bf16 %v1469_v14, %v1467_v16  ;;  %v1496_v16 = vld [vmem:[%s6449_s3 + $0x1d0] sm:$0xff] }
 0x1a2   : > { %v1366_v41 = vmax.f32 %v4788_v54, 0.0  ;;  %3342 = vmatpush1.bf16.msra.mxu0 %v3341_v28  ;;  %v3373_v14 = vpack.c.bf16 %v1496_v16, %v1494_v40  ;;  %v1499_v28 = vld [vmem:[%s6449_s3 + $0x1e8] sm:$0xff] }
 0x1a3   : > { %v1367_v45 = vmax.f32 %v4777_v47, 0.0  ;;  %3344 = vmatprep.subr.bf16.mxu0 %v3343_v50  ;;  %v1501_v50 = vld [vmem:[%s6449_s3 + $0x1f8] sm:$0xff] }
 0x1b9   : > { %v1219_v19 = vpop.f32.mrb[2].mxu1 }
 0x1ba   : > { %v4780_v17 = vadd.f32 %v1219_v19, %v4774_v10  ;;  %v1221_v48 = vpop.f32.mrb[3].mxu1  ;;  %v1466_v19 = vld [vmem:[%s6449_s3 + $0xe0] sm:$0xff] }
 0x1bb   : > { %v4783_v1 = vadd.f32 %v1221_v48, %v4774_v10  ;;  %v1468_v48 = vld [vmem:[%s6449_s3 + $0xf0] sm:$0xff] }
 0x1bc   : > { %v1368_v25 = vmax.f32 %v4780_v17, 0.0  ;;  %v3345_v7 = vpack.c.bf16 %v1468_v48, %v1466_v19  ;;  %v1498_v19 = vld [vmem:[%s6449_s3 + $0x1e0] sm:$0xff]  ;;  %v1503_v17 = vld [vmem:[%s6449_s3 + $0x208] sm:$0xff] }
 0x1bd   : > { %v1369_v6 = vmax.f32 %v4783_v1, 0.0 }
 0x1be   : > { %v3824_v46 = vpack.i.bf16 %v1368_v25, %v1367_v45  ;;  %3346 = vmatpush1.bf16.msra.mxu0 %v3345_v7 }
 0x1bf   : > { %v3829_v32 = vpack.i.bf16 %v1366_v41, %v1369_v6 }
 0x1c0   : > { %3825 = vrot.lane.b32.xlu1 %v3824_v46, %s6486_s15  ;;  %v1471_v46 = vld [vmem:[%s6449_s3 + $0x108] sm:$0xff] }
 0x1c4   : > { %3830 = vrot.lane.b32.xlu1 %v3829_v32, %s6486_s15  ;;  %v1473_v32 = vld [vmem:[%s6449_s3 + $0x118] sm:$0xff] }
 0x1c5   : > { %v3347_v36 = vpack.c.bf16 %v1473_v32, %v1471_v46  ;;  %v3375_v46 = vpack.c.bf16 %v1501_v50, %v1499_v28  ;;  %v1500_v32 = vld [vmem:[%s6449_s3 + $0x1f0] sm:$0xff]  ;;  %v3385_v28 = vpack.c.bf16 %v1508_v51, %v1506_v38  ;;  %v1510_v50 = vld [vmem:[%s6449_s3 + $0x240] sm:$0xff] }
 0x1c6   : > { %v3377_v30 = vpack.c.bf16 %v1500_v32, %v1498_v19  ;;  %v1512_v19 = vld [vmem:[%s6449_s3 + $0x250] sm:$0xff]  ;;  %v1534_v51 = vld [vmem:[%s6449_s3 + $0x300] sm:$0xff] }
 0x1c7   : > { %3348 = vmatprep.subr.bf16.mxu0 %v3347_v36 }
 0x1c8   : > { %3350 = vmatpush1.bf16.msra.mxu0 %v3349_v57 }
 0x1c9   : > { %3352 = vmatprep.subr.bf16.mxu0 %v3351_v52 }
 0x1cc   : > { %3354 = vmatpush1.bf16.msra.mxu0 %v3353_v12 }
 0x1cd   : > { %3356 = vmatprep.subr.bf16.mxu0 %v3355_v63 }
 0x1d0   : > { %3358 = vmatpush1.bf16.msra.mxu0 %v3357_v31  ;;  %v1502_v31 = vld [vmem:[%s6449_s3 + $0x200] sm:$0xff] }
 0x1d1   : > { %3360 = vmatprep.subr.bf16.mxu0 %v3359_v56  ;;  %v1504_v56 = vld [vmem:[%s6449_s3 + $0x210] sm:$0xff] }
 0x1d2   : > { %v3381_v34 = vpack.c.bf16 %v1504_v56, %v1502_v31 }
 0x1d4   : > { %3362 = vmatpush1.bf16.msra.mxu0 %v3361_v39 }
 0x1d5   : > { %3364 = vmatprep.subr.bf16.mxu0 %v3363_v4 }
 0x1d8   : > { %3366 = vmatpush1.bf16.msra.mxu0 %v3365_v33 }
 0x1d9   : > { %v4880_v23 = vpop.f32.mrb[4].mxu1  ;;  %3368 = vmatprep.subr.bf16.mxu0 %v3367_v43  ;;  %v3383_v43 = vpack.c.bf16 %v1509_v3, %v1507_v11  ;;  %v1526_v11 = vld [vmem:[%s6449_s3 + $0x2c0] sm:$0xff]  ;;  %v1528_v3 = vld [vmem:[%s6449_s3 + $0x2d0] sm:$0xff] }
 0x1da   : > { %v4882_v8 = vpop.f32.mrb[5].mxu1  ;;  %v1291_v37 = vadd.f32 %v4880_v23, %v4774_v10 }
 0x1db   : > { %v5008_v58 = vadd.f32 %v4882_v8, %v4774_v10 }
 0x1dc   : > { %3370 = vmatpush1.bf16.msra.mxu0 %v3369_v49  ;;  %v1370_v8 = vmax.f32 %v1291_v37, 0.0  ;;  %v1511_v49 = vld [vmem:[%s6449_s3 + $0x248] sm:$0xff] }
 0x1dd   : > { %3372 = vmatprep.subr.bf16.mxu0 %v3371_v60  ;;  %v1371_v63 = vmax.f32 %v5008_v58, 0.0  ;;  %v3387_v32 = vpack.c.bf16 %v1513_v2, %v1511_v49  ;;  %v1536_v49 = vld [vmem:[%s6449_s3 + $0x310] sm:$0xff]  ;;  %v1539_v2 = vld [vmem:[%s6449_s3 + $0x328] sm:$0xff] }
 0x1df   : > { %v3839_v54 = vpack.i.bf16 %v1371_v63, %v1370_v8 }
 0x1e0   : > { %3374 = vmatpush1.bf16.msra.mxu0 %v3373_v14 }
 0x1e1   : > { %3376 = vmatprep.subr.bf16.mxu0 %v3375_v46 }
 0x1e4   : > { %3378 = vmatpush1.bf16.msra.mxu0 %v3377_v30 }
 0x1ed   : > { %v1361_v9 = vpop.f32.mrb[6].mxu1 }
 0x1ee   : > { %v1363_v44 = vpop.f32.mrb[7].mxu1  ;;  %v1362_v27 = vadd.f32 %v1361_v9, %v4774_v10 }
 0x1ef   : > { %v1364_v0 = vadd.f32 %v1363_v44, %v4774_v10 }
 0x1f0   : > { %v1372_v47 = vmax.f32 %v1362_v27, 0.0 }
 0x232   : > { %v3826_v48 = vpop.permute.xlu1 %3825 }
 0x233   : > { %v3828_v7 = vunpack.i.h.bf16 %v3826_v48  ;;  %v3827_v36 = vunpack.i.l.bf16 %v3826_v48 }
 0x235   : > { %v1395_v61 = vsel %vm775_vm4, %v3827_v36, %v3828_v7 }
 0x236   : > { %v4998_v53 = vpop.permute.xlu1 %3830  ;;  %v1399_v29 = vmax.f32 %v1367_v45, %v1395_v61  ;;  %v1373_v45 = vmax.f32 %v1364_v0, 0.0  ;;  %v3389_v61 = vpack.c.bf16 %v1512_v19, %v1510_v50  ;;  %v1518_v0 = vld [vmem:[%s6449_s3 + $0x280] sm:$0xff]  ;;  %v1540_v50 = vld [vmem:[%s6449_s3 + $0x330] sm:$0xff]  ;;  %v1543_v19 = vld [vmem:[%s6449_s3 + $0x348] sm:$0xff] }
 0x237   : > { %v3833_v57 = vunpack.i.h.bf16 %v4998_v53  ;;  %v3832_v52 = vunpack.i.l.bf16 %v4998_v53  ;;  %v1516_v53 = vld [vmem:[%s6449_s3 + $0x270] sm:$0xff] }
 0x238   : > { %v3849_v10 = vpack.i.bf16 %v1373_v45, %v1372_v47 }
 0x239   : > { %v1394_v13 = vsel %vm775_vm4, %v3828_v7, %v3832_v52  ;;  %v1396_v62 = vsel %vm775_vm4, %v3833_v57, %v3827_v36  ;;  %v1517_v7 = vld [vmem:[%s6449_s3 + $0x278] sm:$0xff] }
 0x23a   : > { %v1398_v23 = vmax.f32 %v1366_v41, %v1396_v62  ;;  %v5022_v12 = vmax.f32 %v1368_v25, %v1394_v13  ;;  %v1505_v25 = vld [vmem:[%s6449_s3 + $0x218] sm:$0xff] }
 0x23b   : > { %v3379_v41 = vpack.c.bf16 %v1505_v25, %v1503_v17  ;;  %v1522_v25 = vld [vmem:[%s6449_s3 + $0x2a0] sm:$0xff] }
 0x23c   : > { %1406 = vrot.lane.b32.xlu1 %v1398_v23, %s6491_s27  ;;  %v3834_v59 = vpack.i.bf16 %v5022_v12, %v1399_v29 }
 0x23d   : > { %3380 = vmatprep.subr.bf16.mxu0 %v3379_v41  ;;  %v1524_v41 = vld [vmem:[%s6449_s3 + $0x2b0] sm:$0xff] }
 0x23e   : > { %3835 = vrot.lane.b32.xlu0 %v3834_v59, %s6491_s27  ;;  %v1520_v59 = vld [vmem:[%s6449_s3 + $0x290] sm:$0xff]  ;;  %v3401_v31 = vpack.c.bf16 %v1524_v41, %v1522_v25  ;;  %v1561_v25 = vld [vmem:[%s6449_s3 + $0x3d8] sm:$0xff] }
 0x242   : > { %3840 = vrot.lane.b32.xlu0 %v3839_v54, %s6486_s15  ;;  %v1523_v54 = vld [vmem:[%s6449_s3 + $0x2a8] sm:$0xff] }
 0x246   : > { %3850 = vrot.lane.b32.xlu0 %v3849_v10, %s6486_s15  ;;  %v1527_v10 = vld [vmem:[%s6449_s3 + $0x2c8] sm:$0xff] }
 0x2ae   : > { %v5048_v22 = vpop.permute.xlu1 %1406 }
 0x2b0   : > { %v5038_v20 = vpop.permute.xlu0 %3835 }
 0x2b1   : > { %v3838_v9 = vunpack.i.h.bf16 %v5038_v20  ;;  %v3837_v44 = vunpack.i.l.bf16 %v5038_v20 }
 0x2b3   : > { %v1427_v42 = vsel %vm931_vm6, %v3837_v44, %v3838_v9  ;;  %v1428_v39 = vsel %vm931_vm6, %v5048_v22, %v3837_v44  ;;  %v1529_v44 = vld [vmem:[%s6449_s3 + $0x2d8] sm:$0xff] }
 0x2b4   : > { %v3841_v4 = vpop.permute.xlu0 %3840  ;;  %v1431_v26 = vmax.f32 %v1399_v29, %v1427_v42  ;;  %v1430_v55 = vmax.f32 %v1398_v23, %v1428_v39  ;;  %v1514_v23 = vld [vmem:[%s6449_s3 + $0x260] sm:$0xff]  ;;  %v1519_v29 = vld [vmem:[%s6449_s3 + $0x288] sm:$0xff]  ;;  %v3403_v56 = vpack.c.bf16 %v1529_v44, %v1527_v10  ;;  %v1533_v39 = vld [vmem:[%s6449_s3 + $0x2f8] sm:$0xff] }
 0x2b5   : > { %v3843_v35 = vunpack.i.h.bf16 %v3841_v4  ;;  %v3842_v33 = vunpack.i.l.bf16 %v3841_v4  ;;  %v1531_v42 = vld [vmem:[%s6449_s3 + $0x2e8] sm:$0xff]  ;;  %v3405_v4 = vpack.c.bf16 %v1528_v3, %v1526_v11  ;;  %v1558_v44 = vld [vmem:[%s6449_s3 + $0x3c0] sm:$0xff]  ;;  %v1565_v11 = vld [vmem:[%s6449_s3 + $0x3f8] sm:$0xff] }
 0x2b6   : > { %1758 = vmatprep.mubr.f32.mxu0 %v1431_v26  ;;  %v3407_v26 = vpack.c.bf16 %v1533_v39, %v1531_v42  ;;  %v1562_v39 = vld [vmem:[%s6449_s3 + $0x3e0] sm:$0xff] }
 0x2b7   : > { %v1392_v24 = vsel %vm775_vm4, %v3842_v33, %v3843_v35  ;;  %v1393_v60 = vsel %vm775_vm4, %v3832_v52, %v3842_v33  ;;  %1759 = vmatmul.mubr.f32.vlgmr.msra.gmra.mrb[0].mxu0 %v1430_v55  ;;  %v1530_v55 = vld [vmem:[%s6449_s3 + $0x2e0] sm:$0xff]  ;;  %v1537_v33 = vld [vmem:[%s6449_s3 + $0x318] sm:$0xff] }
 0x2b8   : > { %v3851_v40 = vpop.permute.xlu0 %3850  ;;  %v5081_v16 = vmax.f32 %v1369_v6, %v1393_v60  ;;  %v5083_v14 = vmax.f32 %v1370_v8, %v1392_v24  ;;  %3382 = vmatpush1.bf16.msra.mxu0 %v3381_v34  ;;  %v1515_v6 = vld [vmem:[%s6449_s3 + $0x268] sm:$0xff]  ;;  %v1521_v8 = vld [vmem:[%s6449_s3 + $0x298] sm:$0xff]  ;;  %v1532_v34 = vld [vmem:[%s6449_s3 + $0x2f0] sm:$0xff]  ;;  %v3413_v60 = vpack.c.bf16 %v1536_v49, %v1534_v51 }
 0x2b9   : > { %v3853_v48 = vunpack.i.h.bf16 %v3851_v40  ;;  %v3852_v46 = vunpack.i.l.bf16 %v3851_v40  ;;  %3384 = vmatprep.subr.bf16.mxu0 %v3383_v43  ;;  %v3391_v62 = vpack.c.bf16 %v1517_v7, %v1515_v6  ;;  %v3395_v27 = vpack.c.bf16 %v1521_v8, %v1519_v29  ;;  %v1541_v24 = vld [vmem:[%s6449_s3 + $0x338] sm:$0xff]  ;;  %v1544_v6 = vld [vmem:[%s6449_s3 + $0x350] sm:$0xff]  ;;  %v1547_v7 = vld [vmem:[%s6449_s3 + $0x368] sm:$0xff] }
 0x2ba   : > { %v3844_v1 = vpack.i.bf16 %v5083_v14, %v5081_v16  ;;  %v3409_v43 = vpack.c.bf16 %v1532_v34, %v1530_v55  ;;  %v3415_v40 = vpack.c.bf16 %v1541_v24, %v1539_v2  ;;  %v1550_v8 = vld [vmem:[%s6449_s3 + $0x380] sm:$0xff]  ;;  %v1569_v55 = vld [vmem:[%s6449_s3 + $0x418] sm:$0xff]  ;;  %v1568_v49 = vld [vmem:[%s6449_s3 + $0x410] sm:$0xff] }
 0x2bb   : > { %v1390_v36 = vsel %vm775_vm4, %v3852_v46, %v3853_v48  ;;  %v1391_v30 = vsel %vm775_vm4, %v3843_v35, %v3852_v46  ;;  %v1397_v37 = vsel %vm775_vm4, %v3853_v48, %v3833_v57  ;;  %v1535_v35 = vld [vmem:[%s6449_s3 + $0x308] sm:$0xff]  ;;  %v1545_v48 = vld [vmem:[%s6449_s3 + $0x358] sm:$0xff]  ;;  %v1566_v51 = vld [vmem:[%s6449_s3 + $0x400] sm:$0xff] }
 0x2bc   : > { %3845 = vrot.lane.b32.xlu1 %v3844_v1, %s6491_s27  ;;  %v5108_v52 = vmax.f32 %v1373_v45, %v1397_v37  ;;  %v5110_v58 = vmax.f32 %v1371_v63, %v1391_v30  ;;  %v5112_v13 = vmax.f32 %v1372_v47, %v1390_v36  ;;  %3386 = vmatpush1.bf16.msra.mxu0 %v3385_v28  ;;  %v1525_v47 = vld [vmem:[%s6449_s3 + $0x2b8] sm:$0xff]  ;;  %v1538_v28 = vld [vmem:[%s6449_s3 + $0x320] sm:$0xff]  ;;  %v1571_v2 = vld [vmem:[%s6449_s3 + $0x428] sm:$0xff] }
 0x2bd   : > { %3388 = vmatprep.subr.bf16.mxu0 %v3387_v32  ;;  %v3393_v63 = vpack.c.bf16 %v1516_v53, %v1514_v23  ;;  %v3397_v45 = vpack.c.bf16 %v1520_v59, %v1518_v0  ;;  %v3399_v17 = vpack.c.bf16 %v1525_v47, %v1523_v54  ;;  %v3411_v38 = vpack.c.bf16 %v1537_v33, %v1535_v35  ;;  %v1542_v1 = vld [vmem:[%s6449_s3 + $0x340] sm:$0xff]  ;;  %v1549_v36 = vld [vmem:[%s6449_s3 + $0x378] sm:$0xff]  ;;  %v1551_v23 = vld [vmem:[%s6449_s3 + $0x388] sm:$0xff] }
 0x2be   : > { %1420 = vrot.lane.b32.xlu0 %v5108_v52, %s6491_s27  ;;  %v3854_v57 = vpack.i.bf16 %v5112_v13, %v5110_v58  ;;  %v3417_v46 = vpack.c.bf16 %v1540_v50, %v1538_v28  ;;  %v3419_v32 = vpack.c.bf16 %v1545_v48, %v1543_v19  ;;  %v3421_v30 = vpack.c.bf16 %v1544_v6, %v1542_v1  ;;  %v1553_v53 = vld [vmem:[%s6449_s3 + $0x398] sm:$0xff]  ;;  %v1554_v47 = vld [vmem:[%s6449_s3 + $0x3a0] sm:$0xff]  ;;  %v1572_v1 = vld [vmem:[%s6449_s3 + $0x430] sm:$0xff] }
 0x2bf   : > { %v3423_v37 = vpack.c.bf16 %v1549_v36, %v1547_v7  ;;  %v3427_v29 = vpack.c.bf16 %v1553_v53, %v1551_v23  ;;  %v1557_v0 = vld [vmem:[%s6449_s3 + $0x3b8] sm:$0xff]  ;;  %v3445_v48 = vpack.c.bf16 %v1568_v49, %v1566_v51 }
 0x2c0   : > { %3855 = vrot.lane.b32.xlu1 %v3854_v57, %s6491_s27  ;;  %3390 = vmatpush1.bf16.msra.mxu0 %v3389_v61  ;;  %v1546_v61 = vld [vmem:[%s6449_s3 + $0x360] sm:$0xff]  ;;  %v1573_v24 = vld [vmem:[%s6449_s3 + $0x438] sm:$0xff] }
 0x2c1   : > { %3392 = vmatprep.subr.bf16.mxu0 %v3391_v62  ;;  %v1548_v62 = vld [vmem:[%s6449_s3 + $0x370] sm:$0xff]  ;;  %v3447_v20 = vpack.c.bf16 %v1573_v24, %v1571_v2  ;;  %v1601_v51 = vld [vmem:[%s6449_s3 + $0x518] sm:$0xff]  ;;  %v1598_v24 = vld [vmem:[%s6449_s3 + $0x500] sm:$0xff] }
 0x2c2   : > { %v3425_v57 = vpack.c.bf16 %v1548_v62, %v1546_v61  ;;  %v1576_v61 = vld [vmem:[%s6449_s3 + $0x450] sm:$0xff]  ;;  %v1579_v62 = vld [vmem:[%s6449_s3 + $0x468] sm:$0xff] }
 0x2c4   : > { %3394 = vmatpush1.bf16.msra.mxu0 %v3393_v63  ;;  %v1552_v63 = vld [vmem:[%s6449_s3 + $0x390] sm:$0xff] }
 0x2c5   : > { %3396 = vmatprep.subr.bf16.mxu0 %v3395_v27  ;;  %v1555_v27 = vld [vmem:[%s6449_s3 + $0x3a8] sm:$0xff]  ;;  %v3429_v59 = vpack.c.bf16 %v1552_v63, %v1550_v8  ;;  %v1585_v63 = vld [vmem:[%s6449_s3 + $0x498] sm:$0xff] }
 0x2c6   : > { %v3431_v54 = vpack.c.bf16 %v1557_v0, %v1555_v27  ;;  %v1583_v8 = vld [vmem:[%s6449_s3 + $0x488] sm:$0xff] }
 0x2c7   : > { %v3459_v0 = vpack.c.bf16 %v1585_v63, %v1583_v8  ;;  %v1614_v63 = vld [vmem:[%s6449_s3 + $0x580] sm:$0xff] }
 0x2c8   : > { %3398 = vmatpush1.bf16.msra.mxu0 %v3397_v45  ;;  %v1556_v45 = vld [vmem:[%s6449_s3 + $0x3b0] sm:$0xff] }
 0x2c9   : > { %3400 = vmatprep.subr.bf16.mxu0 %v3399_v17  ;;  %v1559_v17 = vld [vmem:[%s6449_s3 + $0x3c8] sm:$0xff]  ;;  %v3433_v41 = vpack.c.bf16 %v1556_v45, %v1554_v47  ;;  %v1589_v45 = vld [vmem:[%s6449_s3 + $0x4b8] sm:$0xff] }
 0x2ca   : > { %v3435_v10 = vpack.c.bf16 %v1561_v25, %v1559_v17  ;;  %v1587_v47 = vld [vmem:[%s6449_s3 + $0x4a8] sm:$0xff] }
 0x2cb   : > { %v3463_v25 = vpack.c.bf16 %v1589_v45, %v1587_v47  ;;  %v1618_v45 = vld [vmem:[%s6449_s3 + $0x5a0] sm:$0xff] }
 0x2cc   : > { %3402 = vmatpush1.bf16.msra.mxu0 %v3401_v31  ;;  %v1560_v31 = vld [vmem:[%s6449_s3 + $0x3d0] sm:$0xff] }
 0x2cd   : > { %3404 = vmatprep.subr.bf16.mxu0 %v3403_v56  ;;  %v1563_v56 = vld [vmem:[%s6449_s3 + $0x3e8] sm:$0xff]  ;;  %v3437_v3 = vpack.c.bf16 %v1560_v31, %v1558_v44  ;;  %v1593_v31 = vld [vmem:[%s6449_s3 + $0x4d8] sm:$0xff] }
 0x2ce   : > { %v3439_v42 = vpack.c.bf16 %v1565_v11, %v1563_v56  ;;  %v1591_v44 = vld [vmem:[%s6449_s3 + $0x4c8] sm:$0xff] }
 0x2cf   : > { %v3467_v11 = vpack.c.bf16 %v1593_v31, %v1591_v44  ;;  %v1622_v31 = vld [vmem:[%s6449_s3 + $0x5c0] sm:$0xff] }
 0x2d0   : > { %3406 = vmatpush1.bf16.msra.mxu0 %v3405_v4  ;;  %v1564_v4 = vld [vmem:[%s6449_s3 + $0x3f0] sm:$0xff] }
 0x2d1   : > { %3408 = vmatprep.subr.bf16.mxu0 %v3407_v26  ;;  %v1567_v26 = vld [vmem:[%s6449_s3 + $0x408] sm:$0xff]  ;;  %v3441_v34 = vpack.c.bf16 %v1564_v4, %v1562_v39  ;;  %v1597_v4 = vld [vmem:[%s6449_s3 + $0x4f8] sm:$0xff] }
 0x2d2   : > { %v3443_v35 = vpack.c.bf16 %v1569_v55, %v1567_v26  ;;  %v1595_v39 = vld [vmem:[%s6449_s3 + $0x4e8] sm:$0xff] }
 0x2d3   : > { %v3471_v55 = vpack.c.bf16 %v1597_v4, %v1595_v39  ;;  %v1626_v4 = vld [vmem:[%s6449_s3 + $0x5e0] sm:$0xff] }
 0x2d4   : > { %3410 = vmatpush1.bf16.msra.mxu0 %v3409_v43 }
 0x2d5   : > { %3412 = vmatprep.subr.bf16.mxu0 %v3411_v38 }
 0x2d8   : > { %3414 = vmatpush1.bf16.msra.mxu0 %v3413_v60 }
 0x2d9   : > { %3416 = vmatprep.subr.bf16.mxu0 %v3415_v40 }
 0x2dc   : > { %3418 = vmatpush1.bf16.msra.mxu0 %v3417_v46 }
 0x2dd   : > { %3420 = vmatprep.subr.bf16.mxu0 %v3419_v32 }
 0x2e0   : > { %3422 = vmatpush1.bf16.msra.mxu0 %v3421_v30 }
 0x2e1   : > { %3424 = vmatprep.subr.bf16.mxu0 %v3423_v37  ;;  %v1574_v37 = vld [vmem:[%s6449_s3 + $0x440] sm:$0xff] }
 0x2e2   : > { %v3453_v23 = vpack.c.bf16 %v1576_v61, %v1574_v37  ;;  %v1613_v37 = vld [vmem:[%s6449_s3 + $0x578] sm:$0xff] }
 0x2e4   : > { %3426 = vmatpush1.bf16.msra.mxu0 %v3425_v57  ;;  %v1578_v57 = vld [vmem:[%s6449_s3 + $0x460] sm:$0xff] }
 0x2e5   : > { %3428 = vmatprep.subr.bf16.mxu0 %v3427_v29  ;;  %v1580_v29 = vld [vmem:[%s6449_s3 + $0x470] sm:$0xff] }
 0x2e6   : > { %v3457_v27 = vpack.c.bf16 %v1580_v29, %v1578_v57  ;;  %v1617_v57 = vld [vmem:[%s6449_s3 + $0x598] sm:$0xff] }
 0x2e8   : > { %3430 = vmatpush1.bf16.msra.mxu0 %v3429_v59  ;;  %v1582_v59 = vld [vmem:[%s6449_s3 + $0x480] sm:$0xff] }
 0x2e9   : > { %3432 = vmatprep.subr.bf16.mxu0 %v3431_v54  ;;  %v1584_v54 = vld [vmem:[%s6449_s3 + $0x490] sm:$0xff] }
 0x2ea   : > { %v3461_v17 = vpack.c.bf16 %v1584_v54, %v1582_v59  ;;  %v1621_v59 = vld [vmem:[%s6449_s3 + $0x5b8] sm:$0xff] }
 0x2ec   : > { %3434 = vmatpush1.bf16.msra.mxu0 %v3433_v41  ;;  %v1586_v41 = vld [vmem:[%s6449_s3 + $0x4a0] sm:$0xff] }
 0x2ed   : > { %3436 = vmatprep.subr.bf16.mxu0 %v3435_v10  ;;  %v1588_v10 = vld [vmem:[%s6449_s3 + $0x4b0] sm:$0xff] }
 0x2ee   : > { %v3465_v56 = vpack.c.bf16 %v1588_v10, %v1586_v41  ;;  %v1625_v41 = vld [vmem:[%s6449_s3 + $0x5d8] sm:$0xff] }
 0x2f0   : > { %3438 = vmatpush1.bf16.msra.mxu0 %v3437_v3  ;;  %v1590_v3 = vld [vmem:[%s6449_s3 + $0x4c0] sm:$0xff] }
 0x2f1   : > { %3440 = vmatprep.subr.bf16.mxu0 %v3439_v42  ;;  %v1592_v42 = vld [vmem:[%s6449_s3 + $0x4d0] sm:$0xff] }
 0x2f2   : > { %v3469_v26 = vpack.c.bf16 %v1592_v42, %v1590_v3  ;;  %v1629_v3 = vld [vmem:[%s6449_s3 + $0x5f8] sm:$0xff] }
 0x2f4   : > { %3442 = vmatpush1.bf16.msra.mxu0 %v3441_v34  ;;  %v1594_v34 = vld [vmem:[%s6449_s3 + $0x4e0] sm:$0xff] }
 0x2f5   : > { %3444 = vmatprep.subr.bf16.mxu0 %v3443_v35  ;;  %v1596_v35 = vld [vmem:[%s6449_s3 + $0x4f0] sm:$0xff] }
 0x2f6   : > { %v3473_v49 = vpack.c.bf16 %v1596_v35, %v1594_v34  ;;  %v1633_v34 = vld [vmem:[%s6449_s3 + $0x618] sm:$0xff] }
 0x32e   : > { %v5275_v33 = vpop.permute.xlu1 %3845 }
 0x32f   : > { %v3848_v43 = vunpack.i.h.bf16 %v5275_v33  ;;  %v3847_v38 = vunpack.i.l.bf16 %v5275_v33 }
 0x330   : > { %v5492_v35 = vpop.permute.xlu0 %1420 }
 0x331   : > { %v1426_v60 = vsel %vm931_vm6, %v3838_v9, %v3847_v38  ;;  %v1425_v40 = vsel %vm931_vm6, %v3847_v38, %v3848_v43  ;;  %v1570_v9 = vld [vmem:[%s6449_s3 + $0x420] sm:$0xff]  ;;  %v1599_v38 = vld [vmem:[%s6449_s3 + $0x508] sm:$0xff] }
 0x332   : > { %v1432_v28 = vmax.f32 %v5022_v12, %v1426_v60  ;;  %v5300_v50 = vpop.permute.xlu1 %3855  ;;  %v1433_v19 = vmax.f32 %v5081_v16, %v1425_v40  ;;  %v1575_v12 = vld [vmem:[%s6449_s3 + $0x448] sm:$0xff]  ;;  %v1577_v16 = vld [vmem:[%s6449_s3 + $0x458] sm:$0xff]  ;;  %v3449_v36 = vpack.c.bf16 %v1572_v1, %v1570_v9  ;;  %v3475_v2 = vpack.c.bf16 %v1601_v51, %v1599_v38  ;;  %v1600_v60 = vld [vmem:[%s6449_s3 + $0x510] sm:$0xff] }
 0x333   : > { %v3858_v46 = vunpack.i.h.bf16 %v5300_v50  ;;  %v3857_v32 = vunpack.i.l.bf16 %v5300_v50  ;;  %v3451_v30 = vpack.c.bf16 %v1577_v16, %v1575_v12  ;;  %v1603_v40 = vld [vmem:[%s6449_s3 + $0x528] sm:$0xff]  ;;  %v1604_v9 = vld [vmem:[%s6449_s3 + $0x530] sm:$0xff]  ;;  %v1609_v12 = vld [vmem:[%s6449_s3 + $0x558] sm:$0xff] }
 0x334   : > { %1829 = vmatprep.mubr.f32.mxu0 %v1433_v19  ;;  %v3477_v19 = vpack.c.bf16 %v1600_v60, %v1598_v24  ;;  %v1607_v1 = vld [vmem:[%s6449_s3 + $0x548] sm:$0xff]  ;;  %v2153_v50 = vld [vmem:[%s6454_s8] sm:$0xff] }
 0x335   : > { %1830 = vmatmul.mubr.f32.vlgmr.msra.gmra.mrb[0].mxu0 %v1432_v28  ;;  %v1423_v6 = vsel %vm931_vm6, %v3857_v32, %v3858_v46  ;;  %v1605_v28 = vld [vmem:[%s6449_s3 + $0x538] sm:$0xff]  ;;  %v1424_v24 = vsel %vm931_vm6, %v3848_v43, %v3857_v32  ;;  %v1635_v60 = vld [vmem:[%s6449_s3 + $0x628] sm:$0xff]  ;;  %v1634_v43 = vld [vmem:[%s6449_s3 + $0x620] sm:$0xff] }
 0x336   : > { %3446 = vmatpush1.bf16.msra.mxu0 %v3445_v48  ;;  %v1435_v7 = vmax.f32 %v5110_v58, %v1423_v6  ;;  %v1581_v58 = vld [vmem:[%s6449_s3 + $0x478] sm:$0xff]  ;;  %v3479_v48 = vpack.c.bf16 %v1605_v28, %v1603_v40  ;;  %v3483_v6 = vpack.c.bf16 %v1609_v12, %v1607_v1  ;;  %v1429_v28 = vsel %vm931_vm6, %v5492_v35, %v5048_v22  ;;  %v1636_v32 = vld [vmem:[%s6449_s3 + $0x630] sm:$0xff]  ;;  %v1639_v22 = vld [vmem:[%s6449_s3 + $0x648] sm:$0xff] }
 0x337   : > { %3448 = vmatprep.subr.bf16.mxu0 %v3447_v20  ;;  %v3455_v53 = vpack.c.bf16 %v1581_v58, %v1579_v62  ;;  %v1602_v20 = vld [vmem:[%s6449_s3 + $0x520] sm:$0xff]  ;;  %v1637_v40 = vld [vmem:[%s6449_s3 + $0x638] sm:$0xff]  ;;  %v1434_v33 = vmax.f32 %v5083_v14, %v1424_v24 }
 0x338   : > { %1900 = vmatprep.mubr.f32.mxu0 %v1435_v7  ;;  %v3481_v16 = vpack.c.bf16 %v1604_v9, %v1602_v20  ;;  %v1606_v7 = vld [vmem:[%s6449_s3 + $0x540] sm:$0xff]  ;;  %v1437_v20 = vmax.f32 %v5108_v52, %v1429_v28  ;;  %v1641_v14 = vld [vmem:[%s6449_s3 + $0x658] sm:$0xff]  ;;  %v3513_v9 = vpack.c.bf16 %v1636_v32, %v1634_v43  ;;  %v1640_v52 = vld [vmem:[%s6449_s3 + $0x650] sm:$0xff] }
 0x339   : > { %v1610_v58 = vld [vmem:[%s6449_s3 + $0x560] sm:$0xff]  ;;  %v3515_v1 = vpack.c.bf16 %v1641_v14, %v1639_v22  ;;  %v1673_v28 = vld [vmem:[%s6449_s3 + $0x758] sm:$0xff]  ;;  %v1672_v43 = vld [vmem:[%s6449_s3 + $0x750] sm:$0xff] }
 0x33a   : > { %3450 = vmatpush1.bf16.msra.mxu0 %v3449_v36  ;;  %v1608_v36 = vld [vmem:[%s6449_s3 + $0x550] sm:$0xff]  ;;  %v1638_v12 = vld [vmem:[%s6449_s3 + $0x640] sm:$0xff]  ;;  %v1675_v32 = vld [vmem:[%s6449_s3 + $0x768] sm:$0xff] }
 0x33b   : > { %3452 = vmatprep.subr.bf16.mxu0 %v3451_v30  ;;  %v1611_v30 = vld [vmem:[%s6449_s3 + $0x568] sm:$0xff]  ;;  %v3485_v61 = vpack.c.bf16 %v1608_v36, %v1606_v7  ;;  %v3517_v7 = vpack.c.bf16 %v1640_v52, %v1638_v12  ;;  %v1666_v24 = vld [vmem:[%s6449_s3 + $0x720] sm:$0xff]  ;;  %v1681_v52 = vld [vmem:[%s6449_s3 + $0x798] sm:$0xff] }
 0x33c   : > { %v3487_v62 = vpack.c.bf16 %v1613_v37, %v1611_v30  ;;  %v1642_v30 = vld [vmem:[%s6449_s3 + $0x660] sm:$0xff]  ;;  %v1644_v37 = vld [vmem:[%s6449_s3 + $0x670] sm:$0xff]  ;;  %v1679_v12 = vld [vmem:[%s6449_s3 + $0x788] sm:$0xff] }
 0x33e   : > { %3454 = vmatpush1.bf16.msra.mxu0 %v3453_v23  ;;  %v1612_v23 = vld [vmem:[%s6449_s3 + $0x570] sm:$0xff] }
 0x33f   : > { %3456 = vmatprep.subr.bf16.mxu0 %v3455_v53  ;;  %v1615_v53 = vld [vmem:[%s6449_s3 + $0x588] sm:$0xff]  ;;  %v3489_v29 = vpack.c.bf16 %v1612_v23, %v1610_v58  ;;  %v3521_v58 = vpack.c.bf16 %v1644_v37, %v1642_v30  ;;  %v1685_v37 = vld [vmem:[%s6449_s3 + $0x7b8] sm:$0xff] }
 0x340   : > { %v3491_v8 = vpack.c.bf16 %v1617_v57, %v1615_v53  ;;  %v1646_v53 = vld [vmem:[%s6449_s3 + $0x680] sm:$0xff]  ;;  %v1648_v57 = vld [vmem:[%s6449_s3 + $0x690] sm:$0xff]  ;;  %v1683_v30 = vld [vmem:[%s6449_s3 + $0x7a8] sm:$0xff] }
 0x342   : > { %3458 = vmatpush1.bf16.msra.mxu0 %v3457_v27  ;;  %v1616_v27 = vld [vmem:[%s6449_s3 + $0x590] sm:$0xff] }
 0x343   : > { %3460 = vmatprep.subr.bf16.mxu0 %v3459_v0  ;;  %v1619_v0 = vld [vmem:[%s6449_s3 + $0x5a8] sm:$0xff]  ;;  %v3493_v54 = vpack.c.bf16 %v1616_v27, %v1614_v63  ;;  %v3525_v63 = vpack.c.bf16 %v1648_v57, %v1646_v53  ;;  %v1689_v57 = vld [vmem:[%s6449_s3 + $0x7d8] sm:$0xff] }
 0x344   : > { %v3495_v47 = vpack.c.bf16 %v1621_v59, %v1619_v0  ;;  %v1650_v0 = vld [vmem:[%s6449_s3 + $0x6a0] sm:$0xff]  ;;  %v1652_v59 = vld [vmem:[%s6449_s3 + $0x6b0] sm:$0xff]  ;;  %v1687_v53 = vld [vmem:[%s6449_s3 + $0x7c8] sm:$0xff] }
 0x346   : > { %3462 = vmatpush1.bf16.msra.mxu0 %v3461_v17  ;;  %v1620_v17 = vld [vmem:[%s6449_s3 + $0x5b0] sm:$0xff] }
 0x347   : > { %3464 = vmatprep.subr.bf16.mxu0 %v3463_v25  ;;  %v1623_v25 = vld [vmem:[%s6449_s3 + $0x5c8] sm:$0xff]  ;;  %v3497_v10 = vpack.c.bf16 %v1620_v17, %v1618_v45  ;;  %v3529_v45 = vpack.c.bf16 %v1652_v59, %v1650_v0  ;;  %v1693_v59 = vld [vmem:[%s6449_s3 + $0x7f8] sm:$0xff] }
 0x348   : > { %v3499_v44 = vpack.c.bf16 %v1625_v41, %v1623_v25  ;;  %v1654_v25 = vld [vmem:[%s6449_s3 + $0x6c0] sm:$0xff]  ;;  %v1656_v41 = vld [vmem:[%s6449_s3 + $0x6d0] sm:$0xff]  ;;  %v1691_v0 = vld [vmem:[%s6449_s3 + $0x7e8] sm:$0xff] }
 0x34a   : > { %3466 = vmatpush1.bf16.msra.mxu0 %v3465_v56  ;;  %v1624_v56 = vld [vmem:[%s6449_s3 + $0x5d0] sm:$0xff] }
 0x34b   : > { %3468 = vmatprep.subr.bf16.mxu0 %v3467_v11  ;;  %v1627_v11 = vld [vmem:[%s6449_s3 + $0x5e8] sm:$0xff]  ;;  %v3501_v42 = vpack.c.bf16 %v1624_v56, %v1622_v31  ;;  %v3533_v31 = vpack.c.bf16 %v1656_v41, %v1654_v25  ;;  %v1422_v41 = vsel %vm931_vm6, %v3858_v46, %v5492_v35 }
 0x34c   : > { %v3503_v39 = vpack.c.bf16 %v1629_v3, %v1627_v11  ;;  %v1658_v11 = vld [vmem:[%s6449_s3 + $0x6e0] sm:$0xff]  ;;  %v1660_v3 = vld [vmem:[%s6449_s3 + $0x6f0] sm:$0xff] }
 0x34d   : > { %v1985_v46 = vld [vmem:[%s6448_s2] ss:$8 sm:$0x3] }
 0x34e   : > { %3470 = vmatpush1.bf16.msra.mxu0 %v3469_v26  ;;  %v1628_v26 = vld [vmem:[%s6449_s3 + $0x5f0] sm:$0xff] }
 0x34f   : > { %3472 = vmatprep.subr.bf16.mxu0 %v3471_v55  ;;  %v1631_v55 = vld [vmem:[%s6449_s3 + $0x608] sm:$0xff]  ;;  %v3505_v38 = vpack.c.bf16 %v1628_v26, %v1626_v4  ;;  %v3537_v4 = vpack.c.bf16 %v1660_v3, %v1658_v11  ;;  %v1990_v3 = vrot.slane %v1985_v46, %v4274_v21 }
 0x350   : > { %v3507_v51 = vpack.c.bf16 %v1633_v34, %v1631_v55  ;;  %v1662_v55 = vld [vmem:[%s6449_s3 + $0x700] sm:$0xff]  ;;  %v1664_v34 = vld [vmem:[%s6449_s3 + $0x710] sm:$0xff] }
 0x352   : > { %3474 = vmatpush1.bf16.msra.mxu0 %v3473_v49  ;;  %v1630_v49 = vld [vmem:[%s6449_s3 + $0x600] sm:$0xff] }
 0x353   : > { %3476 = vmatprep.subr.bf16.mxu0 %v3475_v2  ;;  %v1632_v2 = vld [vmem:[%s6449_s3 + $0x610] sm:$0xff] }
 0x356   : > { %3478 = vmatpush1.bf16.msra.mxu0 %v3477_v19  ;;  %v3509_v19 = vpack.c.bf16 %v1632_v2, %v1630_v49  ;;  %v3541_v49 = vpack.c.bf16 %v1664_v34, %v1662_v55 }
 0x357   : > { %3480 = vmatprep.subr.bf16.mxu0 %v3479_v48  ;;  %v3511_v48 = vpack.c.bf16 %v1637_v40, %v1635_v60  ;;  %v1668_v60 = vld [vmem:[%s6449_s3 + $0x730] sm:$0xff]  ;;  %v1671_v40 = vld [vmem:[%s6449_s3 + $0x748] sm:$0xff] }
 0x35a   : > { %3482 = vmatpush1.bf16.msra.mxu0 %v3481_v16  ;;  %v1643_v16 = vld [vmem:[%s6449_s3 + $0x668] sm:$0xff] }
 0x35b   : > { %3484 = vmatprep.subr.bf16.mxu0 %v3483_v6  ;;  %v1645_v6 = vld [vmem:[%s6449_s3 + $0x678] sm:$0xff] }
 0x35c   : > { %v3519_v36 = vpack.c.bf16 %v1645_v6, %v1643_v16  ;;  %v3555_v6 = vpack.c.bf16 %v1681_v52, %v1679_v12 }
 0x35e   : > { %3486 = vmatpush1.bf16.msra.mxu0 %v3485_v61  ;;  %v1647_v61 = vld [vmem:[%s6449_s3 + $0x688] sm:$0xff] }
 0x35f   : > { %3488 = vmatprep.subr.bf16.mxu0 %v3487_v62  ;;  %v1649_v62 = vld [vmem:[%s6449_s3 + $0x698] sm:$0xff] }
 0x360   : > { %v3523_v23 = vpack.c.bf16 %v1649_v62, %v1647_v61  ;;  %v3559_v62 = vpack.c.bf16 %v1685_v37, %v1683_v30 }
 0x362   : > { %3490 = vmatpush1.bf16.msra.mxu0 %v3489_v29  ;;  %v1651_v29 = vld [vmem:[%s6449_s3 + $0x6a8] sm:$0xff] }
 0x363   : > { %3492 = vmatprep.subr.bf16.mxu0 %v3491_v8  ;;  %v1653_v8 = vld [vmem:[%s6449_s3 + $0x6b8] sm:$0xff] }
 0x364   : > { %v3527_v27 = vpack.c.bf16 %v1653_v8, %v1651_v29  ;;  %v3563_v8 = vpack.c.bf16 %v1689_v57, %v1687_v53 }
 0x366   : > { %3494 = vmatpush1.bf16.msra.mxu0 %v3493_v54  ;;  %v1655_v54 = vld [vmem:[%s6449_s3 + $0x6c8] sm:$0xff] }
 0x367   : > { %3496 = vmatprep.subr.bf16.mxu0 %v3495_v47  ;;  %v1657_v47 = vld [vmem:[%s6449_s3 + $0x6d8] sm:$0xff] }
 0x368   : > { %v3531_v17 = vpack.c.bf16 %v1657_v47, %v1655_v54  ;;  %v3567_v47 = vpack.c.bf16 %v1693_v59, %v1691_v0 }
 0x36a   : > { %3498 = vmatpush1.bf16.msra.mxu0 %v3497_v10  ;;  %v1659_v10 = vld [vmem:[%s6449_s3 + $0x6e8] sm:$0xff] }
 0x36b   : > { %3500 = vmatprep.subr.bf16.mxu0 %v3499_v44  ;;  %v1661_v44 = vld [vmem:[%s6449_s3 + $0x6f8] sm:$0xff] }
 0x36c   : > { %v3535_v56 = vpack.c.bf16 %v1661_v44, %v1659_v10  ;;  %v1436_v10 = vmax.f32 %v5112_v13, %v1422_v41  ;;  %v2154_v13 = vld [vmem:[%s6454_s8 + $0x8] sm:$0xff] }
 0x36e   : > { %3502 = vmatpush1.bf16.msra.mxu0 %v3501_v42  ;;  %v1663_v42 = vld [vmem:[%s6449_s3 + $0x708] sm:$0xff] }
 0x36f   : > { %3504 = vmatprep.subr.bf16.mxu0 %v3503_v39  ;;  %v1665_v39 = vld [vmem:[%s6449_s3 + $0x718] sm:$0xff] }
 0x370   : > { %v3539_v26 = vpack.c.bf16 %v1665_v39, %v1663_v42  ;;  %v1994_v42 = vrot.slane %v1985_v46, %v4271_v18 }
 0x372   : > { %3506 = vmatpush1.bf16.msra.mxu0 %v3505_v38  ;;  %v1667_v38 = vld [vmem:[%s6449_s3 + $0x728] sm:$0xff] }
 0x373   : > { %3508 = vmatprep.subr.bf16.mxu0 %v3507_v51  ;;  %v1669_v51 = vld [vmem:[%s6449_s3 + $0x738] sm:$0xff] }
 0x374   : > { %v3543_v2 = vpack.c.bf16 %v1669_v51, %v1667_v38 }
 0x375   : > { %1901 = vmatmul.mubr.f32.vlgmr.msra.gmra.mrb[0].mxu0 %v1434_v33  ;;  %v3547_v33 = vpack.c.bf16 %v1673_v28, %v1671_v40 }
 0x376   : > { %3510 = vmatpush1.bf16.msra.mxu0 %v3509_v19  ;;  %1971 = vmatprep.mubr.f32.mxu0 %v1437_v20  ;;  %v3545_v19 = vpack.c.bf16 %v1668_v60, %v1666_v24  ;;  %v1677_v20 = vld [vmem:[%s6449_s3 + $0x778] sm:$0xff] }
 0x377   : > { %3512 = vmatprep.subr.bf16.mxu0 %v3511_v48  ;;  %v1670_v48 = vld [vmem:[%s6449_s3 + $0x740] sm:$0xff]  ;;  %v3551_v14 = vpack.c.bf16 %v1677_v20, %v1675_v32 }
 0x378   : > { %v3549_v22 = vpack.c.bf16 %v1672_v43, %v1670_v48 }
 0x37a   : > { %3514 = vmatpush1.bf16.msra.mxu0 %v3513_v9  ;;  %v1674_v9 = vld [vmem:[%s6449_s3 + $0x760] sm:$0xff] }
 0x37b   : > { %3516 = vmatprep.subr.bf16.mxu0 %v3515_v1  ;;  %v1676_v1 = vld [vmem:[%s6449_s3 + $0x770] sm:$0xff] }
 0x37c   : > { %v3553_v16 = vpack.c.bf16 %v1676_v1, %v1674_v9  ;;  %v3034_v1 = vld [vmem:[%s6448_s2 + $0x5] ss:$8 sm:$0x3] }
 0x37d   : > { %v2076_v30 = vrot.slane %v3034_v1, %v4274_v21  ;;  %v2080_v37 = vrot.slane %v3034_v1, %v4271_v18 }
 0x37e   : > { %3518 = vmatpush1.bf16.msra.mxu0 %v3517_v7  ;;  %v1678_v7 = vld [vmem:[%s6449_s3 + $0x780] sm:$0xff] }
 0x37f   : > { %3520 = vmatprep.subr.bf16.mxu0 %v3519_v36  ;;  %v1680_v36 = vld [vmem:[%s6449_s3 + $0x790] sm:$0xff] }
 0x380   : > { %v3557_v61 = vpack.c.bf16 %v1680_v36, %v1678_v7 }
 0x382   : > { %3522 = vmatpush1.bf16.msra.mxu0 %v3521_v58  ;;  %v1682_v58 = vld [vmem:[%s6449_s3 + $0x7a0] sm:$0xff] }
 0x383   : > { %3524 = vmatprep.subr.bf16.mxu0 %v3523_v23  ;;  %v1684_v23 = vld [vmem:[%s6449_s3 + $0x7b0] sm:$0xff] }
 0x384   : > { %v3561_v29 = vpack.c.bf16 %v1684_v23, %v1682_v58 }
 0x386   : > { %3526 = vmatpush1.bf16.msra.mxu0 %v3525_v63  ;;  %v1686_v63 = vld [vmem:[%s6449_s3 + $0x7c0] sm:$0xff] }
 0x387   : > { %3528 = vmatprep.subr.bf16.mxu0 %v3527_v27  ;;  %v1688_v27 = vld [vmem:[%s6449_s3 + $0x7d0] sm:$0xff] }
 0x388   : > { %v3565_v54 = vpack.c.bf16 %v1688_v27, %v1686_v63 }
 0x38a   : > { %3530 = vmatpush1.bf16.msra.mxu0 %v3529_v45  ;;  %v1690_v45 = vld [vmem:[%s6449_s3 + $0x7e0] sm:$0xff] }
 0x38b   : > { %3532 = vmatprep.subr.bf16.mxu0 %v3531_v17  ;;  %v1692_v17 = vld [vmem:[%s6449_s3 + $0x7f0] sm:$0xff] }
 0x38c   : > { %v3569_v25 = vpack.c.bf16 %v1692_v17, %v1690_v45  ;;  %v3036_v45 = vld [vmem:[%s6448_s2 + $0x7] ss:$8 sm:$0x3] }
 0x38d   : > { %v2124_v46 = vrot.slane %v3036_v45, %v4271_v18 }
 0x38e   : > { %3534 = vmatpush1.bf16.msra.mxu0 %v3533_v31 }
 0x38f   : > { %3536 = vmatprep.subr.bf16.mxu0 %v3535_v56  ;;  %v3031_v56 = vld [vmem:[%s6448_s2 + $0x1] ss:$8 sm:$0x3] }
 0x390   : > { %v2012_v39 = vrot.slane %v3031_v56, %v4274_v21 }
 0x392   : > { %3538 = vmatpush1.bf16.msra.mxu0 %v3537_v4  ;;  %v2016_v4 = vrot.slane %v3031_v56, %v4271_v18 }
 0x393   : > { %3540 = vmatprep.subr.bf16.mxu0 %v3539_v26 }
 0x396   : > { %3542 = vmatpush1.bf16.msra.mxu0 %v3541_v49 }
 0x397   : > { %3544 = vmatprep.subr.bf16.mxu0 %v3543_v2 }
 0x39a   : > { %3546 = vmatpush1.bf16.msra.mxu0 %v3545_v19  ;;  %v3032_v19 = vld [vmem:[%s6448_s2 + $0x2] ss:$8 sm:$0x3] }
 0x39b   : > { %3548 = vmatprep.subr.bf16.mxu0 %v3547_v33  ;;  %v3033_v33 = vld [vmem:[%s6448_s2 + $0x3] ss:$8 sm:$0x3]  ;;  %v2034_v20 = vrot.slane %v3032_v19, %v4274_v21 }
 0x39c   : > { %v2059_v9 = vrot.slane %v3033_v33, %v4271_v18 }
 0x39e   : > { %3550 = vmatpush1.bf16.msra.mxu0 %v3549_v22  ;;  %v2038_v22 = vrot.slane %v3032_v19, %v4271_v18 }
 0x39f   : > { %3552 = vmatprep.subr.bf16.mxu0 %v3551_v14  ;;  %v2055_v14 = vrot.slane %v3033_v33, %v4274_v21 }
 0x3a2   : > { %3554 = vmatpush1.bf16.msra.mxu0 %v3553_v16 }
 0x3a3   : > { %3556 = vmatprep.subr.bf16.mxu0 %v3555_v6 }
 0x3a6   : > { %3558 = vmatpush1.bf16.msra.mxu0 %v3557_v61 }
 0x3a7   : > { %3560 = vmatprep.subr.bf16.mxu0 %v3559_v62 }
 0x3aa   : > { %3562 = vmatpush1.bf16.msra.mxu0 %v3561_v29 }
 0x3ab   : > { %3564 = vmatprep.subr.bf16.mxu0 %v3563_v8 }
 0x3ae   : > { %3566 = vmatpush1.bf16.msra.mxu0 %v3565_v54  ;;  %v3035_v54 = vld [vmem:[%s6448_s2 + $0x6] ss:$8 sm:$0x3] }
 0x3af   : > { %3568 = vmatprep.subr.bf16.mxu0 %v3567_v47 }
 0x3b2   : > { %3570 = vmatpush1.bf16.msra.mxu0 %v3569_v25 }
 0x3b5   : > { %1972 = vmatmul.mubr.f32.vlgmr.msra.gmra.mrb[0].mxu0 %v1436_v10  ;;  %v2098_v10 = vrot.slane %v3035_v54, %v4274_v21 }
 0x488   : > { %v5698_v44 = vpop.f32.mrb[0].mxu0 }
 0x489   : > { %1978 = vrot.lane.b32.xlu1 %v5698_v44, %s3974_s17  ;;  %v5701_v31 = vpop.f32.mrb[1].mxu0 }
 0x48a   : > { %1980 = vrot.lane.b32.xlu0 %v5701_v31, %s3974_s17 }
 0x48d   : > { %1999 = vrot.lane.b32.xlu1 %v5698_v44, %s3975_s22 }
 0x48e   : > { %2001 = vrot.lane.b32.xlu0 %v5701_v31, %s3975_s22  ;;  %s431_s22 = sand.u32 1, %s3954_s26  }
 0x48f   : > { %s2940_s1 = scalar_lea.sflag [#allocation3], %s431_s22 }
 0x491   : > { %2021 = vrot.lane.b32.xlu1 %v5698_v44, %s3976_s20 }
 0x492   : > { %2023 = vrot.lane.b32.xlu0 %v5701_v31, %s3976_s20 }
 0x495   : > { %2043 = vrot.lane.b32.xlu1 %v5698_v44, %s6489_s0 }
 0x496   : > { %2045 = vrot.lane.b32.xlu0 %v5701_v31, %s6489_s0  ;;  %s432_s0 = scalar_lea.vmem [#allocation2], %s431_s22 }
 0x499   : > { %2064 = vrot.lane.b32.xlu1 %v5698_v44, %s6486_s15 }
 0x49a   : > { %2066 = vrot.lane.b32.xlu0 %v5701_v31, %s6486_s15 }
 0x49d   : > { %2085 = vrot.lane.b32.xlu1 %v5698_v44, %s3977_s21 }
 0x49e   : > { %2087 = vrot.lane.b32.xlu0 %v5701_v31, %s3977_s21 }
 0x4a1   : > { %2107 = vrot.lane.b32.xlu1 %v5698_v44, %s3978_s23 }
 0x4a2   : > { %2109 = vrot.lane.b32.xlu0 %v5701_v31, %s3978_s23 }
 0x4a5   : > { %2129 = vrot.lane.b32.xlu1 %v5698_v44, %s3979_s24 }
 0x4a6   : > { %2131 = vrot.lane.b32.xlu0 %v5701_v31, %s3979_s24  ;;  %s3980_s24 = smov 64  }
 0x4a9   : > { %2157 = vperm.xlu1 %3859, %v2153_v50   ;;  %v2120_v50 = vrot.slane %v3036_v45, %v4274_v21  ;;  %v2288_v45 = vld [vmem:[%s6450_s4 + $0x20] sm:$0xff] }
 0x4aa   : > { %2162 = vperm.xlu0 %3823, %v2154_v13   ;;  %v2102_v13 = vrot.slane %v3035_v54, %v4271_v18 }
 0x4fb   : > { %v1979_v35 = vpop.permute.xlu1 %1978 }
 0x4fc   : > { %v1981_v11 = vpop.permute.xlu0 %1980 }
 0x4fd   : > { %v1983_v26 = vsel %vm1982_vm9, %v1979_v35, %v1981_v11  ;;  %v1984_v55 = vsel %vm1982_vm9, %v1981_v11, %v1979_v35 }
 0x4fe   : > { %v1997_v2 = vmul.f32 %v1990_v3, %v1984_v55  ;;  %v1998_v24 = vmul.f32 %v1994_v42, %v1983_v26 }
 0x4ff   : > { %v2000_v34 = vpop.permute.xlu1 %1999 }
 0x500   : > { %v2002_v38 = vpop.permute.xlu0 %2001 }
 0x501   : > { %v2004_v51 = vsel %vm2003_vm10, %v2000_v34, %v2002_v38  ;;  %v2005_v49 = vsel %vm2003_vm10, %v2002_v38, %v2000_v34 }
 0x502   : > { %v2019_v60 = vmul.f32 %v2012_v39, %v2005_v49  ;;  %v2020_v40 = vmul.f32 %v2016_v4, %v2004_v51 }
 0x503   : > { %v2022_v28 = vpop.permute.xlu1 %2021 }
 0x504   : > { %v3573_v48 = vpack.c.bf16 %v2019_v60, %v1997_v2  ;;  %v2024_v43 = vpop.permute.xlu0 %2023  ;;  %v3571_v32 = vpack.c.bf16 %v2020_v40, %v1998_v24 }
 0x505   : > { %v2026_v12 = vsel %vm2025_vm11, %v2022_v28, %v2024_v43  ;;  %v2027_v52 = vsel %vm2025_vm11, %v2024_v43, %v2022_v28 }
 0x506   : > { %3572 = vmatprep.subr.bf16.mxu1 %v3571_v32  ;;  %v2041_v61 = vmul.f32 %v2034_v20, %v2027_v52  ;;  %v2042_v62 = vmul.f32 %v2038_v22, %v2026_v12 }
 0x507   : > { %v2044_v16 = vpop.permute.xlu1 %2043  ;;  %3574 = vmatpush1.bf16.msra.mxu1 %v3573_v48 }
 0x508   : > { %v2046_v6 = vpop.permute.xlu0 %2045 }
 0x509   : > { %v2047_v7 = vsel %vm697_vm3, %v2044_v16, %v2046_v6  ;;  %v2048_v36 = vsel %vm697_vm3, %v2046_v6, %v2044_v16 }
 0x50a   : > { %v2062_v58 = vmul.f32 %v2055_v14, %v2048_v36  ;;  %v2063_v23 = vmul.f32 %v2059_v9, %v2047_v7  ;;  %v2300_v7 = vld [vmem:[%s6450_s4 + $0x80] sm:$0xff]  ;;  %v2301_v36 = vld [vmem:[%s6450_s4 + $0x88] sm:$0xff] }
 0x50b   : > { %v2065_v53 = vpop.permute.xlu1 %2064 }
 0x50c   : > { %v3577_v57 = vpack.c.bf16 %v2062_v58, %v2041_v61  ;;  %v2067_v29 = vpop.permute.xlu0 %2066  ;;  %v3575_v8 = vpack.c.bf16 %v2063_v23, %v2042_v62  ;;  %v3587_v61 = vpack.c.bf16 %v2301_v36, %v2300_v7  ;;  %v2285_v62 = vld [vmem:[%s6450_s4 + $0x8] sm:$0xff]  ;;  %v2302_v58 = vld [vmem:[%s6450_s4 + $0x90] sm:$0xff]  ;;  %v2303_v23 = vld [vmem:[%s6450_s4 + $0x98] sm:$0xff] }
 0x50d   : > { %v2068_v63 = vsel %vm775_vm4, %v2065_v53, %v2067_v29  ;;  %v2069_v27 = vsel %vm775_vm4, %v2067_v29, %v2065_v53  ;;  %v3591_v29 = vpack.c.bf16 %v2303_v23, %v2302_v58 }
 0x50e   : > { %v2083_v0 = vmul.f32 %v2076_v30, %v2068_v63  ;;  %v2084_v59 = vmul.f32 %v2080_v37, %v2069_v27  ;;  %3576 = vmatprep.subr.bf16.mxu1 %v3575_v8  ;;  %v2284_v30 = vld [vmem:[%s6450_s4] sm:$0xff]  ;;  %v2286_v8 = vld [vmem:[%s6450_s4 + $0x10] sm:$0xff]  ;;  %v2287_v63 = vld [vmem:[%s6450_s4 + $0x18] sm:$0xff] }
 0x50f   : > { %v2086_v47 = vpop.permute.xlu1 %2085  ;;  %3578 = vmatpush1.bf16.msra.mxu1 %v3577_v57  ;;  %v3589_v57 = vpack.c.bf16 %v2285_v62, %v2284_v30  ;;  %v2304_v27 = vld [vmem:[%s6450_s4 + $0xa0] sm:$0xff]  ;;  %v3593_v54 = vpack.c.bf16 %v2287_v63, %v2286_v8 }
 0x510   : > { %v3581_v17 = vpack.c.bf16 %v2083_v0, %v5698_v44  ;;  %v2088_v25 = vpop.permute.xlu0 %2087  ;;  %v3579_v41 = vpack.c.bf16 %v2084_v59, %v5701_v31  ;;  %v3037_v44 = vld [vmem:[%s6448_s2 + $0x10] ss:$8 sm:$0x3]  ;;  %v2305_v0 = vld [vmem:[%s6450_s4 + $0xa8] sm:$0xff] }
 0x511   : > { %v2090_v35 = vsel %vm2089_vm12, %v2086_v47, %v2088_v25  ;;  %v2091_v56 = vsel %vm2089_vm12, %v2088_v25, %v2086_v47  ;;  %v2146_v39 = vrot.slane %v3037_v44, %v4271_v18  ;;  %v2142_v24 = vrot.slane %v3037_v44, %v4274_v21  ;;  %v2151_v18 = vld [vmem:[%s6453_s7] sm:$0xff]  ;;  %v2152_v21 = vld [vmem:[%s6453_s7 + $0x8] sm:$0xff]  ;;  %v2306_v25 = vld [vmem:[%s6450_s4 + $0xb0] sm:$0xff] }
 0x512   : > { %3580 = vmatprep.subr.bf16.mxu1 %v3579_v41  ;;  %v2105_v4 = vmul.f32 %v2098_v10, %v2090_v35  ;;  %v2106_v26 = vmul.f32 %v2102_v13, %v2091_v56  ;;  %v3595_v47 = vpack.c.bf16 %v2305_v0, %v2304_v27  ;;  %v2307_v41 = vld [vmem:[%s6450_s4 + $0xb8] sm:$0xff]  ;;  %v2308_v44 = vld [vmem:[%s6450_s4 + $0xc0] sm:$0xff]  ;;  %v2309_v35 = vld [vmem:[%s6450_s4 + $0xc8] sm:$0xff] }
 0x513   : > { %v2108_v11 = vpop.permute.xlu1 %2107  ;;  %3582 = vmatpush1.bf16.msra.mxu1 %v3581_v17  ;;  %v2289_v17 = vld [vmem:[%s6450_s4 + $0x28] sm:$0xff]  ;;  %v3599_v13 = vpack.c.bf16 %v2307_v41, %v2306_v25  ;;  %v2446_v41 = vld [vmem:[%s6455_s9] sm:$0xff] }
 0x514   : > { %v2110_v31 = vpop.permute.xlu0 %2109  ;;  %v3597_v10 = vpack.c.bf16 %v2289_v17, %v2288_v45  ;;  %v2462_v17 = vld [vmem:[%s6455_s9 + $0x80] sm:$0xff]  ;;  %v2463_v25 = vld [vmem:[%s6455_s9 + $0x88] sm:$0xff] }
 0x515   : > { %v2112_v3 = vsel %vm2111_vm13, %v2108_v11, %v2110_v31  ;;  %v2113_v42 = vsel %vm2111_vm13, %v2110_v31, %v2108_v11  ;;  %v3603_v11 = vpack.c.bf16 %v2309_v35, %v2308_v44  ;;  %v2292_v31 = vld [vmem:[%s6450_s4 + $0x40] sm:$0xff]  ;;  %v2448_v35 = vld [vmem:[%s6455_s9 + $0x10] sm:$0xff] }
 0x516   : > { %v2127_v55 = vmul.f32 %v2120_v50, %v2112_v3  ;;  %v2128_v34 = vmul.f32 %v2124_v46, %v2113_v42  ;;  %v2290_v50 = vld [vmem:[%s6450_s4 + $0x30] sm:$0xff]  ;;  %v2291_v46 = vld [vmem:[%s6450_s4 + $0x38] sm:$0xff]  ;;  %v2293_v3 = vld [vmem:[%s6450_s4 + $0x48] sm:$0xff] }
 0x517   : > { %v2130_v38 = vpop.permute.xlu1 %2129  ;;  %v3601_v56 = vpack.c.bf16 %v2291_v46, %v2290_v50  ;;  %v2310_v42 = vld [vmem:[%s6450_s4 + $0xd0] sm:$0xff]  ;;  %v2465_v50 = vld [vmem:[%s6455_s9 + $0x98] sm:$0xff]  ;;  %v3621_v46 = vpack.c.bf16 %v2447_v15, %v2446_v41 }
 0x518   : > { %v3585_v51 = vpack.c.bf16 %v2127_v55, %v2105_v4  ;;  %v2132_v49 = vpop.permute.xlu0 %2131  ;;  %v3583_v2 = vpack.c.bf16 %v2128_v34, %v2106_v26  ;;  %v3605_v4 = vpack.c.bf16 %v2293_v3, %v2292_v31  ;;  %v2294_v55 = vld [vmem:[%s6450_s4 + $0x50] sm:$0xff]  ;;  %v2295_v34 = vld [vmem:[%s6450_s4 + $0x58] sm:$0xff]  ;;  %v2467_v31 = vld [vmem:[%s6455_s9 + $0xa8] sm:$0xff] }
 0x519   : > { %v2135_v60 = vsel %vm2133_vm14, %v2132_v49, %v2130_v38  ;;  %v2134_v40 = vsel %vm2133_vm14, %v2130_v38, %v2132_v49  ;;  %v2312_v38 = vld [vmem:[%s6450_s4 + $0xe0] sm:$0xff]  ;;  %v3609_v49 = vpack.c.bf16 %v2295_v34, %v2294_v55  ;;  %v2469_v55 = vld [vmem:[%s6455_s9 + $0xb8] sm:$0xff] }
 0x51a   : > { %v2150_v28 = vmul.f32 %v2146_v39, %v2135_v60  ;;  %3584 = vmatprep.subr.bf16.mxu1 %v3583_v2  ;;  %v2149_v19 = vmul.f32 %v2142_v24, %v2134_v40  ;;  %v2311_v39 = vld [vmem:[%s6450_s4 + $0xd8] sm:$0xff]  ;;  %v2296_v24 = vld [vmem:[%s6450_s4 + $0x60] sm:$0xff]  ;;  %v2297_v60 = vld [vmem:[%s6450_s4 + $0x68] sm:$0xff] }
 0x51b   : > { %3586 = vmatpush1.bf16.msra.mxu1 %v3585_v51  ;;  %v3607_v26 = vpack.c.bf16 %v2311_v39, %v2310_v42  ;;  %v2313_v51 = vld [vmem:[%s6450_s4 + $0xe8] sm:$0xff]  ;;  %v3613_v40 = vpack.c.bf16 %v2297_v60, %v2296_v24  ;;  %v2450_v39 = vld [vmem:[%s6455_s9 + $0x20] sm:$0xff] }
 0x51c   : > { %2187 = vmatprep.subr.mxu1 %v2150_v28  ;;  %v3611_v2 = vpack.c.bf16 %v2313_v51, %v2312_v38  ;;  %v2314_v28 = vld [vmem:[%s6450_s4 + $0xf0] sm:$0xff]  ;;  %v2471_v24 = vld [vmem:[%s6455_s9 + $0xc8] sm:$0xff] }
 0x51d   : > { %v2452_v51 = vld [vmem:[%s6455_s9 + $0x30] sm:$0xff] }
 0x51f   : > { %2188 = vmatpush1.msra.mxu1 %v2149_v19  ;;  %v2315_v19 = vld [vmem:[%s6450_s4 + $0xf8] sm:$0xff] }
 0x520   : > { %3038 = vmatmul.mubr.msk.f32.vlgmr.msra.gmra.mrb[8].mxu1 %vm1078_vm8, %v2151_v18  ;;  %3588 = vmatprep.subr.bf16.mxu1 %v3587_v61  ;;  %v3615_v18 = vpack.c.bf16 %v2315_v19, %v2314_v28  ;;  %v2454_v28 = vld [vmem:[%s6455_s9 + $0x40] sm:$0xff]  ;;  %v2455_v19 = vld [vmem:[%s6455_s9 + $0x48] sm:$0xff] }
 0x521   : > { %2241 = vmatprep.mubr.f32.mxu1 %v3971_v5  ;;  %3590 = vmatpush3.bf16.msra.mxu1 %v3589_v57 }
 0x522   : > { %3592 = vmatprep.subr.bf16.mxu1 %v3591_v29 }
 0x524   : > { %3039 = vmatmul.mubr.msk.f32.gmra.mrb[10].mxu1 %vm1078_vm8, %v2152_v21  ;;  %v2298_v21 = vld [vmem:[%s6450_s4 + $0x70] sm:$0xff] }
 0x525   : > { %3594 = vmatpush3.bf16.msra.mxu1 %v3593_v54 }
 0x526   : > { %3596 = vmatprep.subr.bf16.mxu1 %v3595_v47 }
 0x528   : > { %v2158_v33 = vpop.permute.xlu1 %2157 }
 0x529   : > { %v2163_v14 = vpop.permute.xlu0 %2162  ;;  %3598 = vmatpush3.bf16.msra.mxu1 %v3597_v10  ;;  %v3619_v10 = vpack.c.bf16 %v2463_v25, %v2462_v17 }
 0x52a   : > { %3600 = vmatprep.subr.bf16.mxu1 %v3599_v13  ;;  %v2464_v13 = vld [vmem:[%s6455_s9 + $0x90] sm:$0xff] }
 0x52b   : > { %v3623_v44 = vpack.c.bf16 %v2465_v50, %v2464_v13  ;;  %v2478_v50 = vld [vmem:[%s6455_s9 + $0x100] sm:$0xff] }
 0x52d   : > { %3602 = vmatpush3.bf16.msra.mxu1 %v3601_v56  ;;  %v2449_v56 = vld [vmem:[%s6455_s9 + $0x18] sm:$0xff] }
 0x52e   : > { %3604 = vmatprep.subr.bf16.mxu1 %v3603_v11  ;;  %v2466_v11 = vld [vmem:[%s6455_s9 + $0xa0] sm:$0xff]  ;;  %v3625_v3 = vpack.c.bf16 %v2449_v56, %v2448_v35  ;;  %v2496_v56 = vld [vmem:[%s6455_s9 + $0x190] sm:$0xff] }
 0x52f   : > { %v3627_v42 = vpack.c.bf16 %v2467_v31, %v2466_v11  ;;  %v2497_v11 = vld [vmem:[%s6455_s9 + $0x198] sm:$0xff] }
 0x531   : > { %3606 = vmatpush3.bf16.msra.mxu1 %v3605_v4  ;;  %v2451_v4 = vld [vmem:[%s6455_s9 + $0x28] sm:$0xff] }
 0x532   : > { %3608 = vmatprep.subr.bf16.mxu1 %v3607_v26  ;;  %v2468_v26 = vld [vmem:[%s6455_s9 + $0xb0] sm:$0xff]  ;;  %v3629_v34 = vpack.c.bf16 %v2451_v4, %v2450_v39 }
 0x533   : > { %v3631_v38 = vpack.c.bf16 %v2469_v55, %v2468_v26 }
 0x535   : > { %3610 = vmatpush3.bf16.msra.mxu1 %v3609_v49  ;;  %v2453_v49 = vld [vmem:[%s6455_s9 + $0x38] sm:$0xff] }
 0x536   : > { %3612 = vmatprep.subr.bf16.mxu1 %v3611_v2  ;;  %v2470_v2 = vld [vmem:[%s6455_s9 + $0xc0] sm:$0xff]  ;;  %v3633_v60 = vpack.c.bf16 %v2453_v49, %v2452_v51  ;;  %v2480_v51 = vld [vmem:[%s6455_s9 + $0x110] sm:$0xff]  ;;  %v2481_v49 = vld [vmem:[%s6455_s9 + $0x118] sm:$0xff] }
 0x539   : > { %3614 = vmatpush3.bf16.msra.mxu1 %v3613_v40  ;;  %v3635_v40 = vpack.c.bf16 %v2471_v24, %v2470_v2  ;;  %v2498_v2 = vld [vmem:[%s6455_s9 + $0x1a0] sm:$0xff]  ;;  %v2499_v24 = vld [vmem:[%s6455_s9 + $0x1a8] sm:$0xff] }
 0x53a   : > { %3616 = vmatprep.subr.bf16.mxu1 %v3615_v18  ;;  %v2472_v18 = vld [vmem:[%s6455_s9 + $0xd0] sm:$0xff] }
 0x5f3   : > { %v2237_v48 = vpop.f32.mrb[8].mxu1 }
 0x5f4   : > { %v5799_v43 = vadd.f32 %v2237_v48, %v2158_v33  ;;  %v2239_v32 = vpop.f32.mrb[9].mxu1 }
 0x5f5   : > { %v5801_v20 = vadd.f32 %v2239_v32, %v2158_v33  ;;  %v2299_v33 = vld [vmem:[%s6450_s4 + $0x78] sm:$0xff] }
 0x5f6   : > { %v2248_v22 = vmax.f32 %v5799_v43, 0.0  ;;  %v3617_v48 = vpack.c.bf16 %v2299_v33, %v2298_v21  ;;  %v2473_v21 = vld [vmem:[%s6455_s9 + $0xd8] sm:$0xff]  ;;  %v3637_v33 = vpack.c.bf16 %v2455_v19, %v2454_v28  ;;  %v3659_v28 = vpack.c.bf16 %v2499_v24, %v2498_v2  ;;  %v2482_v19 = vld [vmem:[%s6455_s9 + $0x120] sm:$0xff]  ;;  %v2532_v2 = vld [vmem:[%s6455_s9 + $0x2b0] sm:$0xff] }
 0x5f7   : > { %v2249_v9 = vmax.f32 %v5801_v20, 0.0  ;;  %v2243_v1 = vpop.f32.mrb[10].mxu1  ;;  %v2533_v24 = vld [vmem:[%s6455_s9 + $0x2b8] sm:$0xff] }
 0x5f8   : > { %v5805_v12 = vadd.f32 %v2243_v1, %v2163_v14  ;;  %v2245_v52 = vpop.f32.mrb[11].mxu1  ;;  %3618 = vmatpush3.bf16.msra.mxu1 %v3617_v48  ;;  %v3639_v48 = vpack.c.bf16 %v2473_v21, %v2472_v18  ;;  %v2483_v18 = vld [vmem:[%s6455_s9 + $0x128] sm:$0xff]  ;;  %v2500_v21 = vld [vmem:[%s6455_s9 + $0x1b0] sm:$0xff] }
 0x5f9   : > { %v3860_v16 = vpack.i.bf16 %v2249_v9, %v2248_v22  ;;  %v5811_v6 = vadd.f32 %v2245_v52, %v2163_v14  ;;  %3620 = vmatprep.subr.bf16.mxu1 %v3619_v10 }
 0x5fa   : > { %v2250_v37 = vmax.f32 %v5805_v12, 0.0 }
 0x5fb   : > { %v2251_v53 = vmax.f32 %v5811_v6, 0.0  ;;  %3861 = vrot.lane.b32.xlu1 %v3860_v16, %s6486_s15 }
 0x5fd   : > { %v3870_v59 = vpack.i.bf16 %v2251_v53, %v2250_v37 }
 0x5ff   : > { %3871 = vrot.lane.b32.xlu1 %v3870_v59, %s6486_s15 }
 0x66d   : > { %v3862_v32 = vpop.permute.xlu1 %3861 }
 0x66e   : > { %v3864_v14 = vunpack.i.h.bf16 %v3862_v32  ;;  %v3863_v1 = vunpack.i.l.bf16 %v3862_v32  ;;  %v2456_v32 = vld [vmem:[%s6455_s9 + $0x50] sm:$0xff] }
 0x670   : > { %v2260_v52 = vsel %vm775_vm4, %v3863_v1, %v3864_v14  ;;  %v2262_v16 = vsel %vm775_vm4, %v3864_v14, %v3863_v1  ;;  %v2457_v14 = vld [vmem:[%s6455_s9 + $0x58] sm:$0xff]  ;;  %v2474_v1 = vld [vmem:[%s6455_s9 + $0xe0] sm:$0xff] }
 0x671   : > { %v3872_v7 = vpop.permute.xlu1 %3871  ;;  %v2264_v36 = vmax.f32 %v2248_v22, %v2260_v52  ;;  %v2265_v30 = vmax.f32 %v2249_v9, %v2262_v16  ;;  %v2475_v52 = vld [vmem:[%s6455_s9 + $0xe8] sm:$0xff]  ;;  %v3641_v16 = vpack.c.bf16 %v2457_v14, %v2456_v32  ;;  %v2484_v14 = vld [vmem:[%s6455_s9 + $0x130] sm:$0xff] }
 0x672   : > { %v3874_v61 = vunpack.i.h.bf16 %v3872_v7  ;;  %v3873_v62 = vunpack.i.l.bf16 %v3872_v7  ;;  %v3643_v7 = vpack.c.bf16 %v2475_v52, %v2474_v1  ;;  %v2485_v1 = vld [vmem:[%s6455_s9 + $0x138] sm:$0xff]  ;;  %v2502_v52 = vld [vmem:[%s6455_s9 + $0x1c0] sm:$0xff] }
 0x673   : > { %v3865_v58 = vpack.i.bf16 %v2265_v30, %v2264_v36 }
 0x674   : > { %v2261_v23 = vsel %vm775_vm4, %v3873_v62, %v3874_v61  ;;  %v2263_v57 = vsel %vm775_vm4, %v3874_v61, %v3873_v62  ;;  %v2476_v61 = vld [vmem:[%s6455_s9 + $0xf0] sm:$0xff]  ;;  %v2477_v62 = vld [vmem:[%s6455_s9 + $0xf8] sm:$0xff] }
 0x675   : > { %3866 = vrot.lane.b32.xlu0 %v3865_v58, %s3978_s23  ;;  %v2266_v29 = vmax.f32 %v2250_v37, %v2261_v23  ;;  %v2267_v43 = vmax.f32 %v2251_v53, %v2263_v57  ;;  %v3647_v23 = vpack.c.bf16 %v2477_v62, %v2476_v61  ;;  %v2460_v57 = vld [vmem:[%s6455_s9 + $0x70] sm:$0xff]  ;;  %v2487_v61 = vld [vmem:[%s6455_s9 + $0x148] sm:$0xff] }
 0x676   : > { %v2504_v62 = vld [vmem:[%s6455_s9 + $0x1d0] sm:$0xff] }
 0x677   : > { %v3875_v22 = vpack.i.bf16 %v2267_v43, %v2266_v29 }
 0x679   : > { %3876 = vrot.lane.b32.xlu0 %v3875_v22, %s3978_s23  ;;  %v2494_v22 = vld [vmem:[%s6455_s9 + $0x180] sm:$0xff]  ;;  %s2952_s23 = sshll.u32 %s432_s0, 4  ;;  %s6406_s23 = int_to_ptr.vmem [resolvable:$true] %s2952_s23 }
 0x67a   : > { %s3900_s14 = scalar_lea.vmem %s6406_s23, 16 }
 0x67b   : > { %p3901_p11 = scmp.ne.s32.totalorder %s6406_s23, %s3900_s14 }
 0x67d   : > { %p3902_p12 = pnand %p3901_p11, %p4092_p5 }
 0x67f   : > { %p3903_p13 = pneg %p3902_p12 }
 0x6e7   : > { %v3867_v20 = vpop.permute.xlu0 %3866 }
 0x6e8   : > { %v3869_v9 = vunpack.i.h.bf16 %v3867_v20  ;;  %v3868_v8 = vunpack.i.l.bf16 %v3867_v20  ;;  %v2495_v20 = vld [vmem:[%s6455_s9 + $0x188] sm:$0xff] }
 0x6ea   : > { %v2276_v63 = vsel %vm2111_vm13, %v3868_v8, %v3869_v9  ;;  %v2278_v27 = vsel %vm2111_vm13, %v3869_v9, %v3868_v8  ;;  %v3651_v9 = vpack.c.bf16 %v2495_v20, %v2494_v22  ;;  %v2506_v22 = vld [vmem:[%s6455_s9 + $0x1e0] sm:$0xff]  ;;  %v2507_v20 = vld [vmem:[%s6455_s9 + $0x1e8] sm:$0xff] }
 0x6eb   : > { %v2280_v0 = vmax.f32 %v2264_v36, %v2276_v63  ;;  %v3877_v59 = vpop.permute.xlu0 %3876  ;;  %v2281_v54 = vmax.f32 %v2265_v30, %v2278_v27  ;;  %v2458_v36 = vld [vmem:[%s6455_s9 + $0x60] sm:$0xff]  ;;  %v2459_v30 = vld [vmem:[%s6455_s9 + $0x68] sm:$0xff] }
 0x6ec   : > { %v3879_v12 = vunpack.i.h.bf16 %v3877_v59  ;;  %v3878_v37 = vunpack.i.l.bf16 %v3877_v59  ;;  %v3645_v58 = vpack.c.bf16 %v2459_v30, %v2458_v36  ;;  %v2486_v30 = vld [vmem:[%s6455_s9 + $0x140] sm:$0xff] }
 0x6ed   : > { %2380 = vmatprep.mubr.f32.mxu1 %v2281_v54 }
 0x6ee   : > { %2381 = vmatmul.mubr.f32.vlgmr.msra.gmra.mrb[12].mxu1 %v2280_v0  ;;  %v2279_v6 = vsel %vm2111_vm13, %v3879_v12, %v3878_v37  ;;  %v2277_v53 = vsel %vm2111_vm13, %v3878_v37, %v3879_v12 }
 0x6ef   : > { %v2283_v47 = vmax.f32 %v2267_v43, %v2279_v6  ;;  %v2282_v45 = vmax.f32 %v2266_v29, %v2277_v53  ;;  %3622 = vmatpush3.bf16.msra.mxu1 %v3621_v46  ;;  %v2461_v29 = vld [vmem:[%s6455_s9 + $0x78] sm:$0xff]  ;;  %v2479_v46 = vld [vmem:[%s6455_s9 + $0x108] sm:$0xff] }
 0x6f0   : > { %3624 = vmatprep.subr.bf16.mxu1 %v3623_v44  ;;  %v3649_v43 = vpack.c.bf16 %v2461_v29, %v2460_v57  ;;  %v3653_v4 = vpack.c.bf16 %v2479_v46, %v2478_v50  ;;  %v2488_v29 = vld [vmem:[%s6455_s9 + $0x150] sm:$0xff] }
 0x6f1   : > { %2385 = vmatprep.mubr.f32.mxu1 %v2283_v47  ;;  %v2528_v46 = vld [vmem:[%s6455_s9 + $0x290] sm:$0xff] }
 0x6f2   : > { %2386 = vmatmul.mubr.f32.gmra.mrb[14].mxu1 %v2282_v45 }
 0x6f3   : > { %3626 = vmatpush3.bf16.msra.mxu1 %v3625_v3 }
 0x6f4   : > { %3628 = vmatprep.subr.bf16.mxu1 %v3627_v42 }
 0x6f7   : > { %3630 = vmatpush3.bf16.msra.mxu1 %v3629_v34 }
 0x6f8   : > { %3632 = vmatprep.subr.bf16.mxu1 %v3631_v38  ;;  %v3655_v38 = vpack.c.bf16 %v2497_v11, %v2496_v56 }
 0x6fb   : > { %3634 = vmatpush3.bf16.msra.mxu1 %v3633_v60 }
 0x6fc   : > { %3636 = vmatprep.subr.bf16.mxu1 %v3635_v40  ;;  %v3657_v40 = vpack.c.bf16 %v2481_v49, %v2480_v51  ;;  %v2514_v51 = vld [vmem:[%s6455_s9 + $0x220] sm:$0xff]  ;;  %v2515_v49 = vld [vmem:[%s6455_s9 + $0x228] sm:$0xff] }
 0x6ff   : > { %3638 = vmatpush3.bf16.msra.mxu1 %v3637_v33  ;;  %v2501_v33 = vld [vmem:[%s6455_s9 + $0x1b8] sm:$0xff] }
 0x700   : > { %3640 = vmatprep.subr.bf16.mxu1 %v3639_v48  ;;  %v3661_v48 = vpack.c.bf16 %v2483_v18, %v2482_v19  ;;  %v3663_v32 = vpack.c.bf16 %v2501_v33, %v2500_v21  ;;  %v2517_v19 = vld [vmem:[%s6455_s9 + $0x238] sm:$0xff]  ;;  %v2534_v18 = vld [vmem:[%s6455_s9 + $0x2c0] sm:$0xff]  ;;  %v2535_v21 = vld [vmem:[%s6455_s9 + $0x2c8] sm:$0xff] }
 0x703   : > { %3642 = vmatpush3.bf16.msra.mxu1 %v3641_v16  ;;  %v2503_v16 = vld [vmem:[%s6455_s9 + $0x1c8] sm:$0xff] }
 0x704   : > { %3644 = vmatprep.subr.bf16.mxu1 %v3643_v7  ;;  %v3665_v7 = vpack.c.bf16 %v2485_v1, %v2484_v14  ;;  %v3667_v36 = vpack.c.bf16 %v2503_v16, %v2502_v52  ;;  %v2519_v14 = vld [vmem:[%s6455_s9 + $0x248] sm:$0xff]  ;;  %v2536_v1 = vld [vmem:[%s6455_s9 + $0x2d0] sm:$0xff]  ;;  %v2537_v52 = vld [vmem:[%s6455_s9 + $0x2d8] sm:$0xff] }
 0x707   : > { %3646 = vmatpush3.bf16.msra.mxu1 %v3645_v58  ;;  %v2505_v58 = vld [vmem:[%s6455_s9 + $0x1d8] sm:$0xff] }
 0x708   : > { %3648 = vmatprep.subr.bf16.mxu1 %v3647_v23  ;;  %v3669_v23 = vpack.c.bf16 %v2487_v61, %v2486_v30  ;;  %v3671_v57 = vpack.c.bf16 %v2505_v58, %v2504_v62  ;;  %v2521_v30 = vld [vmem:[%s6455_s9 + $0x258] sm:$0xff]  ;;  %v2538_v61 = vld [vmem:[%s6455_s9 + $0x2e0] sm:$0xff]  ;;  %v2539_v62 = vld [vmem:[%s6455_s9 + $0x2e8] sm:$0xff] }
 0x70b   : > { %3650 = vmatpush3.bf16.msra.mxu1 %v3649_v43  ;;  %v2489_v43 = vld [vmem:[%s6455_s9 + $0x158] sm:$0xff] }
 0x70c   : > { %3652 = vmatprep.subr.bf16.mxu1 %v3651_v9  ;;  %v3673_v9 = vpack.c.bf16 %v2489_v43, %v2488_v29  ;;  %v2523_v29 = vld [vmem:[%s6455_s9 + $0x268] sm:$0xff]  ;;  %v2540_v43 = vld [vmem:[%s6455_s9 + $0x2f0] sm:$0xff] }
 0x7c1   : > { %v3077_v8 = vpop.f32.mrb[12].mxu1 }
 0x7c2   : > { %v3078_v63 = vpop.f32.mrb[13].mxu1 }
 0x7c3   : > { %v6045_v27 = vadd.f32 %v3078_v63, %v3077_v8  ;;  %v3675_v8 = vpack.c.bf16 %v2507_v20, %v2506_v22  ;;  %v2490_v63 = vld [vmem:[%s6455_s9 + $0x160] sm:$0xff]  ;;  %v2541_v22 = vld [vmem:[%s6455_s9 + $0x2f8] sm:$0xff] }
 0x7c5   : > { %v3080_v0 = vpop.f32.mrb[14].mxu1  ;;  %v2404_v59 = vrot.slane %v6045_v27, 5  ;;  %v2410_v54 = vrot.slane %v6045_v27, 7  ;;  %v2392_v12 = vrot.slane %v6045_v27, 1  ;;  %v2398_v37 = vrot.slane %v6045_v27, 3 }
 0x7c6   : > { %v3081_v6 = vpop.f32.mrb[15].mxu1  ;;  %v2396_v39 = vrot.slane %v6045_v27, 2  ;;  %v2408_v34 = vrot.slane %v6045_v27, 6  ;;  %v2402_v11 = vrot.slane %v6045_v27, 4 }
 0x7c7   : > { %v6051_v53 = vadd.f32 %v3081_v6, %v3080_v0  ;;  %v3885_v47 = vpack.i.bf16 %v2404_v59, %v2410_v54  ;;  %v3880_v45 = vpack.i.bf16 %v2392_v12, %v2398_v37  ;;  %v2491_v0 = vld [vmem:[%s6455_s9 + $0x168] sm:$0xff]  ;;  %v2508_v59 = vld [vmem:[%s6455_s9 + $0x1f0] sm:$0xff]  ;;  %v2509_v54 = vld [vmem:[%s6455_s9 + $0x1f8] sm:$0xff] }
 0x7c8   : > { %v3677_v12 = vpack.c.bf16 %v2491_v0, %v2490_v63  ;;  %v3679_v37 = vpack.c.bf16 %v2509_v54, %v2508_v59  ;;  %v2492_v6 = vld [vmem:[%s6455_s9 + $0x170] sm:$0xff]  ;;  %v2525_v63 = vld [vmem:[%s6455_s9 + $0x278] sm:$0xff]  ;;  %v2558_v0 = vld [vmem:[%s6455_s9 + $0x380] sm:$0xff] }
 0x7c9   : > { %3886 = vrot.lane.b32.xlu0 %v3885_v47, %s3980_s24  ;;  %3881 = vrot.lane.b32.xlu1 %v3880_v45, %s3980_s24  ;;  %v2427_v17 = vrot.slane %v6051_v53, 5  ;;  %v2433_v25 = vrot.slane %v6051_v53, 7  ;;  %v2415_v41 = vrot.slane %v6051_v53, 1  ;;  %v2421_v10 = vrot.slane %v6051_v53, 3  ;;  %v2493_v47 = vld [vmem:[%s6455_s9 + $0x178] sm:$0xff]  ;;  %v2526_v45 = vld [vmem:[%s6455_s9 + $0x280] sm:$0xff] }
 0x7ca   : > { %v2559_v59 = vld [vmem:[%s6455_s9 + $0x388] sm:$0xff] }
 0x7cb   : > { %v3895_v15 = vpack.i.bf16 %v2427_v17, %v2433_v25  ;;  %v3890_v13 = vpack.i.bf16 %v2415_v41, %v2421_v10  ;;  %v2527_v17 = vld [vmem:[%s6455_s9 + $0x288] sm:$0xff]  ;;  %v3681_v41 = vpack.c.bf16 %v2493_v47, %v2492_v6  ;;  %v2542_v6 = vld [vmem:[%s6455_s9 + $0x300] sm:$0xff] }
 0x7cc   : > { %v3683_v10 = vpack.c.bf16 %v2527_v17, %v2526_v45  ;;  %v2543_v47 = vld [vmem:[%s6455_s9 + $0x308] sm:$0xff]  ;;  %v2560_v17 = vld [vmem:[%s6455_s9 + $0x390] sm:$0xff] }
 0x7cd   : > { %3896 = vrot.lane.b32.xlu0 %v3895_v15, %s3980_s24  ;;  %3891 = vrot.lane.b32.xlu1 %v3890_v13, %s3980_s24  ;;  %v2510_v15 = vld [vmem:[%s6455_s9 + $0x200] sm:$0xff]  ;;  %v2511_v13 = vld [vmem:[%s6455_s9 + $0x208] sm:$0xff]  ;;  %s3041_s24 = sshll.u32 %s4075_s29, 4  ;;  %s3983_s29 = smov [#allocation2]  }
 0x7ce   : > { %s6404_s27 = scalar_lea.hbm %s6459_s13, %s3041_s24  ;;  %s3904_s5 = sshll.u32 %s3983_s29, 4  ;;  %s3905_s5 = int_to_ptr.vmem [resolvable:$false] %s3904_s5 }
 0x7cf   : > { %s3906_s17 = scalar_lea.vmem %s3905_s5, 32  ;;  %p3907_p0 = scmp.lt.s32.totalorder %s6406_s23, %s3905_s5 }
 0x7d0   : > { %p3908_p1 = scmp.lt.s32.totalorder %s3906_s17, %s3900_s14 }
 0x7d2   : > { %p3909_p2 = por %p3908_p1, %p3907_p0 }
 0x7d4   : > { %p3910_p3 = pnand %p3909_p2, %p3903_p13 }
 0x83b   : > { %v6063_v44 = vpop.permute.xlu0 %3886  ;;  %v3882_v35 = vpop.permute.xlu1 %3881 }
 0x83c   : > { %v3888_v31 = vunpack.i.l.bf16 %v6063_v44  ;;  %v3884_v3 = vunpack.i.h.bf16 %v3882_v35  ;;  %v3883_v42 = vunpack.i.l.bf16 %v3882_v35  ;;  %v3889_v50 = vunpack.i.h.bf16 %v6063_v44  ;;  %v2529_v35 = vld [vmem:[%s6455_s9 + $0x298] sm:$0xff]  ;;  %v2512_v44 = vld [vmem:[%s6455_s9 + $0x210] sm:$0xff] }
 0x83e   : > { %v2439_v26 = vsel %vm2437_vm15, %v2396_v39, %v3883_v42  ;;  %v2438_v55 = vsel %vm2437_vm15, %v6045_v27, %v3884_v3  ;;  %v2441_v60 = vsel %vm2437_vm15, %v2408_v34, %v3888_v31  ;;  %v3685_v31 = vpack.c.bf16 %v2511_v13, %v2510_v15  ;;  %v2513_v39 = vld [vmem:[%s6455_s9 + $0x218] sm:$0xff]  ;;  %v2531_v27 = vld [vmem:[%s6455_s9 + $0x2a8] sm:$0xff] }
 0x83f   : > { %2639 = vmatprep.mubr.f32.mxu1 %v2439_v26  ;;  %v6162_v25 = vpop.permute.xlu1 %3891  ;;  %v2419_v3 = vrot.slane %v6051_v53, 2  ;;  %v3687_v42 = vpack.c.bf16 %v2529_v35, %v2528_v46  ;;  %v2530_v26 = vld [vmem:[%s6455_s9 + $0x2a0] sm:$0xff]  ;;  %v3689_v34 = vpack.c.bf16 %v2513_v39, %v2512_v44  ;;  %v6266_v54 = vpop.permute.xlu0 %3896  ;;  %v3717_v15 = vpack.c.bf16 %v2543_v47, %v2542_v6  ;;  %v2545_v46 = vld [vmem:[%s6455_s9 + $0x318] sm:$0xff]  ;;  %v2547_v39 = vld [vmem:[%s6455_s9 + $0x328] sm:$0xff] }
 0x840   : > { %2640 = vmatmul.mubr.f32.vlgmr.msra.gmra.mrb[16].mxu1 %v2438_v55  ;;  %v3893_v56 = vunpack.i.l.bf16 %v6162_v25  ;;  %v3894_v45 = vunpack.i.h.bf16 %v6162_v25  ;;  %v2431_v13 = vrot.slane %v6051_v53, 6  ;;  %v2544_v25 = vld [vmem:[%s6455_s9 + $0x310] sm:$0xff]  ;;  %v2546_v44 = vld [vmem:[%s6455_s9 + $0x320] sm:$0xff]  ;;  %v2863_v47 = vld [vmem:[%s6457_s11 + $0x38] sm:$0xff] }
 0x841   : > { %3654 = vmatpush3.bf16.msra.mxu1 %v3653_v4  ;;  %2709 = vmatprep.mubr.f32.mxu1 %v2441_v60  ;;  %v2440_v4 = vsel %vm2437_vm15, %v2402_v11, %v3889_v50  ;;  %v3693_v60 = vpack.c.bf16 %v2515_v49, %v2514_v51  ;;  %v2563_v11 = vld [vmem:[%s6455_s9 + $0x3a8] sm:$0xff]  ;;  %v2566_v51 = vld [vmem:[%s6455_s9 + $0x3c0] sm:$0xff]  ;;  %v2862_v6 = vld [vmem:[%s6457_s11 + $0x30] sm:$0xff] }
 0x842   : > { %3656 = vmatprep.subr.bf16.mxu1 %v3655_v38  ;;  %v2443_v55 = vsel %vm2437_vm15, %v2419_v3, %v3893_v56  ;;  %v3691_v38 = vpack.c.bf16 %v2531_v27, %v2530_v26  ;;  %v2442_v35 = vsel %vm2437_vm15, %v6051_v53, %v3894_v45  ;;  %v2562_v56 = vld [vmem:[%s6455_s9 + $0x3a0] sm:$0xff]  ;;  %v3721_v3 = vpack.c.bf16 %v2545_v46, %v2544_v25  ;;  %v2565_v26 = vld [vmem:[%s6455_s9 + $0x3b8] sm:$0xff]  ;;  %v2567_v49 = vld [vmem:[%s6455_s9 + $0x3c8] sm:$0xff] }
 0x843   : > { %v3725_v27 = vpack.c.bf16 %v2547_v39, %v2546_v44  ;;  %v3757_v45 = vpack.c.bf16 %v2863_v47, %v2862_v6 }
 0x845   : > { %3658 = vmatpush3.bf16.msra.mxu1 %v3657_v40  ;;  %v3695_v40 = vpack.c.bf16 %v2533_v24, %v2532_v2  ;;  %v3731_v24 = vpack.c.bf16 %v2567_v49, %v2566_v51 }
 0x846   : > { %3660 = vmatprep.subr.bf16.mxu1 %v3659_v28  ;;  %v2516_v28 = vld [vmem:[%s6455_s9 + $0x230] sm:$0xff] }
 0x847   : > { %v3697_v33 = vpack.c.bf16 %v2517_v19, %v2516_v28  ;;  %v2568_v28 = vld [vmem:[%s6455_s9 + $0x3d0] sm:$0xff]  ;;  %v2569_v19 = vld [vmem:[%s6455_s9 + $0x3d8] sm:$0xff] }
 0x849   : > { %3662 = vmatpush3.bf16.msra.mxu1 %v3661_v48  ;;  %v3699_v48 = vpack.c.bf16 %v2535_v21, %v2534_v18  ;;  %v3735_v21 = vpack.c.bf16 %v2569_v19, %v2568_v28 }
 0x84a   : > { %3664 = vmatprep.subr.bf16.mxu1 %v3663_v32  ;;  %v2518_v32 = vld [vmem:[%s6455_s9 + $0x240] sm:$0xff] }
 0x84b   : > { %v3701_v16 = vpack.c.bf16 %v2519_v14, %v2518_v32  ;;  %v2570_v32 = vld [vmem:[%s6455_s9 + $0x3e0] sm:$0xff]  ;;  %v2571_v14 = vld [vmem:[%s6455_s9 + $0x3e8] sm:$0xff] }
 0x84d   : > { %3666 = vmatpush3.bf16.msra.mxu1 %v3665_v7  ;;  %v3703_v7 = vpack.c.bf16 %v2537_v52, %v2536_v1  ;;  %v3739_v52 = vpack.c.bf16 %v2571_v14, %v2570_v32 }
 0x84e   : > { %3668 = vmatprep.subr.bf16.mxu1 %v3667_v36  ;;  %v2520_v36 = vld [vmem:[%s6455_s9 + $0x250] sm:$0xff] }
 0x84f   : > { %v3705_v58 = vpack.c.bf16 %v2521_v30, %v2520_v36  ;;  %v2572_v36 = vld [vmem:[%s6455_s9 + $0x3f0] sm:$0xff]  ;;  %v2573_v30 = vld [vmem:[%s6455_s9 + $0x3f8] sm:$0xff] }
 0x851   : > { %3670 = vmatpush3.bf16.msra.mxu1 %v3669_v23  ;;  %v3707_v23 = vpack.c.bf16 %v2539_v62, %v2538_v61  ;;  %v3743_v62 = vpack.c.bf16 %v2573_v30, %v2572_v36 }
 0x852   : > { %3672 = vmatprep.subr.bf16.mxu1 %v3671_v57  ;;  %v2522_v57 = vld [vmem:[%s6455_s9 + $0x260] sm:$0xff] }
 0x853   : > { %v3709_v20 = vpack.c.bf16 %v2523_v29, %v2522_v57  ;;  %v3899_v29 = vunpack.i.h.bf16 %v6266_v54 }
 0x855   : > { %3674 = vmatpush3.bf16.msra.mxu1 %v3673_v9  ;;  %v3711_v9 = vpack.c.bf16 %v2541_v22, %v2540_v43  ;;  %v2425_v43 = vrot.slane %v6051_v53, 4  ;;  %v2859_v53 = vld [vmem:[%s6457_s11 + $0x18] sm:$0xff] }
 0x856   : > { %3676 = vmatprep.subr.bf16.mxu1 %v3675_v8  ;;  %v2524_v8 = vld [vmem:[%s6455_s9 + $0x270] sm:$0xff] }
 0x857   : > { %v2444_v22 = vsel %vm2437_vm15, %v2425_v43, %v3899_v29 }
 0x859   : > { %3678 = vmatpush3.bf16.msra.mxu1 %v3677_v12  ;;  %v3713_v12 = vpack.c.bf16 %v2525_v63, %v2524_v8  ;;  %v2858_v8 = vld [vmem:[%s6457_s11 + $0x10] sm:$0xff]  ;;  %v3981_v63 = vmov 0.0|0.0  }
 0x85a   : > { %3680 = vmatprep.subr.bf16.mxu1 %v3679_v37  ;;  %v3715_v37 = vpack.c.bf16 %v2559_v59, %v2558_v0  ;;  %v3751_v59 = vpack.c.bf16 %v2859_v53, %v2858_v8 }
 0x85d   : > { %3682 = vmatpush3.bf16.msra.mxu1 %v3681_v41  ;;  %v2561_v41 = vld [vmem:[%s6455_s9 + $0x398] sm:$0xff] }
 0x85e   : > { %3684 = vmatprep.subr.bf16.mxu1 %v3683_v10  ;;  %v3898_v10 = vunpack.i.l.bf16 %v6266_v54  ;;  %v3719_v50 = vpack.c.bf16 %v2561_v41, %v2560_v17  ;;  %v2860_v54 = vld [vmem:[%s6457_s11 + $0x20] sm:$0xff] }
 0x860   : > { %2710 = vmatmul.mubr.f32.vlgmr.msra.gmra.mrb[18].mxu1 %v2440_v4  ;;  %v2564_v4 = vld [vmem:[%s6455_s9 + $0x3b0] sm:$0xff] }
 0x861   : > { %3686 = vmatpush3.bf16.msra.mxu1 %v3685_v31  ;;  %2779 = vmatprep.mubr.f32.mxu1 %v2443_v55  ;;  %v2445_v31 = vsel %vm2437_vm15, %v2431_v13, %v3898_v10  ;;  %v3727_v55 = vpack.c.bf16 %v2565_v26, %v2564_v4  ;;  %v2864_v26 = vld [vmem:[%s6458_s12] sm:$0x1] }
 0x862   : > { %3688 = vmatprep.subr.bf16.mxu1 %v3687_v42  ;;  %v3723_v42 = vpack.c.bf16 %v2563_v11, %v2562_v56 }
 0x865   : > { %3690 = vmatpush3.bf16.msra.mxu1 %v3689_v34  ;;  %v2548_v34 = vld [vmem:[%s6455_s9 + $0x330] sm:$0xff] }
 0x866   : > { %3692 = vmatprep.subr.bf16.mxu1 %v3691_v38  ;;  %v2549_v38 = vld [vmem:[%s6455_s9 + $0x338] sm:$0xff] }
 0x867   : > { %v3729_v2 = vpack.c.bf16 %v2549_v38, %v2548_v34 }
 0x869   : > { %3694 = vmatpush3.bf16.msra.mxu1 %v3693_v60  ;;  %v2550_v60 = vld [vmem:[%s6455_s9 + $0x340] sm:$0xff] }
 0x86a   : > { %3696 = vmatprep.subr.bf16.mxu1 %v3695_v40  ;;  %v2551_v40 = vld [vmem:[%s6455_s9 + $0x348] sm:$0xff] }
 0x86b   : > { %v3733_v18 = vpack.c.bf16 %v2551_v40, %v2550_v60 }
 0x86d   : > { %3698 = vmatpush3.bf16.msra.mxu1 %v3697_v33  ;;  %v2552_v33 = vld [vmem:[%s6455_s9 + $0x350] sm:$0xff] }
 0x86e   : > { %3700 = vmatprep.subr.bf16.mxu1 %v3699_v48  ;;  %v2553_v48 = vld [vmem:[%s6455_s9 + $0x358] sm:$0xff] }
 0x86f   : > { %v3737_v1 = vpack.c.bf16 %v2553_v48, %v2552_v33 }
 0x871   : > { %3702 = vmatpush3.bf16.msra.mxu1 %v3701_v16  ;;  %v2554_v16 = vld [vmem:[%s6455_s9 + $0x360] sm:$0xff] }
 0x872   : > { %3704 = vmatprep.subr.bf16.mxu1 %v3703_v7  ;;  %v2555_v7 = vld [vmem:[%s6455_s9 + $0x368] sm:$0xff] }
 0x873   : > { %v3741_v61 = vpack.c.bf16 %v2555_v7, %v2554_v16 }
 0x875   : > { %3706 = vmatpush3.bf16.msra.mxu1 %v3705_v58  ;;  %v2556_v58 = vld [vmem:[%s6455_s9 + $0x370] sm:$0xff] }
 0x876   : > { %3708 = vmatprep.subr.bf16.mxu1 %v3707_v23  ;;  %v2557_v23 = vld [vmem:[%s6455_s9 + $0x378] sm:$0xff] }
 0x877   : > { %v3745_v57 = vpack.c.bf16 %v2557_v23, %v2556_v58 }
 0x879   : > { %3710 = vmatpush3.bf16.msra.mxu1 %v3709_v20  ;;  %v2856_v20 = vld [vmem:[%s6457_s11] sm:$0xff] }
 0x87a   : > { %3712 = vmatprep.subr.bf16.mxu1 %v3711_v9  ;;  %v2857_v9 = vld [vmem:[%s6457_s11 + $0x8] sm:$0xff] }
 0x87b   : > { %v3748_v0 = vpack.c.bf16 %v2857_v9, %v2856_v20 }
 0x87d   : > { %3714 = vmatpush3.bf16.msra.mxu1 %v3713_v12  ;;  %v2861_v12 = vld [vmem:[%s6457_s11 + $0x28] sm:$0xff] }
 0x87e   : > { %3716 = vmatprep.subr.bf16.mxu1 %v3715_v37  ;;  %v3754_v37 = vpack.c.bf16 %v2861_v12, %v2860_v54 }
 0x880   : > { %2780 = vmatmul.mubr.f32.vlgmr.msra.gmra.mrb[20].mxu1 %v2442_v35 }
 0x881   : > { %3718 = vmatpush3.bf16.msra.mxu1 %v3717_v15  ;;  %2849 = vmatprep.mubr.f32.mxu1 %v2445_v31  ;;  %v2574_v15 = vld [vmem:[%s6456_s10] sm:$0x1] }
 0x882   : > { %3720 = vmatprep.subr.bf16.mxu1 %v3719_v50 }
 0x885   : > { %3722 = vmatpush3.bf16.msra.mxu1 %v3721_v3 }
 0x886   : > { %3724 = vmatprep.subr.bf16.mxu1 %v3723_v42 }
 0x889   : > { %3726 = vmatpush3.bf16.msra.mxu1 %v3725_v27 }
 0x88a   : > { %3728 = vmatprep.subr.bf16.mxu1 %v3727_v55 }
 0x88d   : > { %3730 = vmatpush3.bf16.msra.mxu1 %v3729_v2 }
 0x88e   : > { %3732 = vmatprep.subr.bf16.mxu1 %v3731_v24 }
 0x891   : > { %3734 = vmatpush3.bf16.msra.mxu1 %v3733_v18 }
 0x892   : > { %3736 = vmatprep.subr.bf16.mxu1 %v3735_v21 }
 0x895   : > { %3738 = vmatpush3.bf16.msra.mxu1 %v3737_v1 }
 0x896   : > { %3740 = vmatprep.subr.bf16.mxu1 %v3739_v52 }
 0x899   : > { %3742 = vmatpush3.bf16.msra.mxu1 %v3741_v61 }
 0x89a   : > { %3744 = vmatprep.subr.bf16.mxu1 %v3743_v62 }
 0x89d   : > { %3746 = vmatpush3.bf16.msra.mxu1 %v3745_v57 }
 0x89e   : > { %3747 = vmatprep.subr.bf16.mxu1 %v3981_v63 }
 0x8a0   : > { %2850 = vmatmul.mubr.f32.vlgmr.msra.gmra.mrb[22].mxu1 %v2444_v22 }
 0x8a1   : > { %3749 = vmatpush3.bf16.msra.mxu1 %v3748_v0  ;;  %3248 = vmatprep.mubr.msk.f32.mxu1 %vm3982_vm0, %v3971_v5 }
 0x8a2   : > { %3750 = vmatprep.subr.bf16.mxu1 %v3981_v63 }
 0x8a5   : > { %3752 = vmatpush3.bf16.msra.mxu1 %v3751_v59 }
 0x8a6   : > { %3753 = vmatprep.subr.bf16.mxu1 %v3981_v63 }
 0x8a9   : > { %3755 = vmatpush3.bf16.msra.mxu1 %v3754_v37 }
 0x8aa   : > { %3756 = vmatprep.subr.bf16.mxu1 %v3981_v63 }
 0x8ad   : > { %3758 = vmatpush3.bf16.msra.mxu1 %v3757_v45 }
 0x913   : > { %v3115_v17 = vpop.f32.mrb[16].mxu1 }
 0x914   : > { %v3116_v41 = vpop.f32.mrb[17].mxu1 }
 0x915   : > { %v3117_v10 = vadd.f32 %v3116_v41, %v3115_v17 }
 0x917   : > { %v2642_v25 = vadd.f32 %v3117_v10, %v2574_v15 }
 0x933   : > { %v3150_v13 = vpop.f32.mrb[18].mxu1 }
 0x934   : > { %v3151_v50 = vpop.f32.mrb[19].mxu1 }
 0x935   : > { %v3152_v46 = vadd.f32 %v3151_v50, %v3150_v13 }
 0x937   : > { %v2712_v35 = vadd.f32 %v3152_v46, %v2642_v25 }
 0x953   : > { %v3185_v56 = vpop.f32.mrb[20].mxu1 }
 0x954   : > { %v3186_v11 = vpop.f32.mrb[21].mxu1 }
 0x955   : > { %v3187_v31 = vadd.f32 %v3186_v11, %v3185_v56 }
 0x957   : > { %v2782_v3 = vadd.f32 %v3187_v31, %v2712_v35 }
 0x973   : > { %v3220_v42 = vpop.f32.mrb[22].mxu1 }
 0x974   : > { %v3221_v5 = vpop.f32.mrb[23].mxu1 }
 0x975   : > { %v3222_v44 = vadd.f32 %v3221_v5, %v3220_v42 }
 0x977   : > { %v2852_v39 = vadd.f32 %v3222_v44, %v2782_v3 }
 0x979   : > { %v2855_v4 = vmax.f32 %v2852_v39, 0.0 }
 0x97b   : > { %3249 = vmatmul.mubr.msk.f32.vlgmr.msra.gmra.mrb[24].mxu1 %vm2437_vm15, %v2855_v4 }
 0xa4e   : > { %v2934_v27 = vpop.f32.mrb[24].mxu1 }
 0xa4f   : > { %v2935_v55 = vadd.f32 %v2934_v27, %v2864_v26  ;;  %v3250_v34 = vpop.f32.mrb[25].mxu1 }
 0xa51   : > { %2938 = vst [vmem:[%s432_s0] sm:$0x1] %v2935_v55 }
 0xa52   : > { %3913 = shalt.err (!%p3910_p3)
}
 0xa53   : > { %s3914_s15 = scalar_lea.hbm %s6404_s27, 16  ;;  %s3918_s21 = scalar_lea.hbm %s6459_s13, 32 }
 0xa54   : > { %p3915_p4 = scmp.ne.s32.totalorder %s6404_s27, %s3914_s15  ;;  %p3919_p9 = scmp.lt.u32.totalorder %s6404_s27, %s6459_s13 }
 0xa55   : > { %p3920_p10 = scmp.lt.u32.totalorder %s3918_s21, %s3914_s15  ;;  %p3922_p12 = scmp.lt.u32.totalorder %s3914_s15, %s6404_s27 }
 0xa56   : > { %p3916_p7 = pnand %p3915_p4, %p4092_p5 }
 0xa57   : > { %p3921_p11 = por %p3920_p10, %p3919_p9 }
 0xa58   : > { %p3917_p8 = pneg %p3916_p7 }
 0xa59   : > { %p3923_p13 = por %p3922_p12, %p3921_p11 }
 0xa5b   : > { %p3924_p0 = pnand %p3923_p13, %p3917_p8 }
 0xa5d   : > { %3927 = shalt.err (!%p3924_p0)
}
 0xa5e   : > { %3765 = dma.vmem_to_hbm [thread:$0]  (%p4092_p5), %s6406_s23, 16, %s6404_s27, %s2940_s1  }
 0xa5f PF: > { %p3771_p1 = scmp.ge.s32.totalorder %s3962_s28, 2  ;;  %s2964_s30 = sand.u32 1, %s3950_s25  }
 0xa60   : > { %s2965_s16 = scalar_lea.sflag [#allocation3], %s2964_s30 }
 0xa61   : > { %p3768_p2 = pnand %p3771_p1, %p4096_p6 }
 0xa63   : > { %3945 = dma.done.wait (!%p3768_p2), %s2965_s16, 16  }
 0xa64   : > { %3947 = vsyncadd (!%p3768_p2), %s2965_s16, 4294967280  ;;  %s6493_s28 = sld [smem:[#allocation6_spill]]  ;;  %s6494_s14 = sld [smem:[#allocation5_spill]] }
 0xa65   : > { %s6495_s27 = sld [smem:[#allocation7_spill]]  ;;  %s6496_s25 = smov %s3954_s26 }
 0xa6a   : > { %p23_p3 = scmp.ge.s32.totalorder %s6493_s28, 4   ;;  %s6497_s26 = smov %s6494_s14 }
 0xa6c   :  { %25 = sbr.rel (!%p23_p3) target bundleno = 7 (0x7), region = 121 }
 0xa73   :  { %2969 = vsyncpa [#allocation3], 1 }
 0xa74   :  { %2971 = vsyncpa [#allocation3 + $0x1], 1 }

</bundles_post_ra>
